<compile_context>
chip_gen: v7x
topology: tpu7x:2x2x1
jax: 0.10.0
libtpu: 0.0.40
codegen_flags: <defaults>
</compile_context>

<pallas_src>
import jax
import jax.numpy as jnp
from jax import lax
from jax.experimental import pallas as pl
from jax.experimental.pallas import tpu as pltpu

# ---------------- model dimensions (small, consistent with the forward) -------
B = 2                 # batch (sequences)
T = 8                 # timesteps per sequence (real model uses 8*5)
C = 3                 # image channels
H = W = 16            # spatial size (small synthetic)
KH = KW = 3           # conv kernel
KPATCH = C * KH * KW  # im2col patch length = 27
KPAD = 128            # lane-padded patch length
HW = H * W            # 256
FEAT = 128            # per-frame feature dim (surrogate backbone out)
DMODEL = 256          # embeddings_layer_neurons
NUM_HEADS = 4         # transformer_num_heads
HEAD_DIM = DMODEL // NUM_HEADS   # 64
HPAD = 128            # lane-padded per-head dim
QKVPAD = NUM_HEADS * HPAD        # 512 (all heads packed along lanes)
DFF = 256             # transformer feed-forward dim
NUM_CLASSES = 3
CPAD = 128            # lane-padded classifier output width
LN_EPS = 1e-5


# ------------------------------- Pallas kernel ---------------------------------
def _layernorm(x, gamma, beta):
    mu = jnp.mean(x, axis=-1, keepdims=True)
    d = x - mu
    var = jnp.mean(d * d, axis=-1, keepdims=True)
    return d * lax.rsqrt(var + LN_EPS) * gamma + beta


def _fused_er_kernel(patches_ref, pool_ref, conv_w, conv_b,
                     emb_w, emb_b,
                     wq, wk, wv, bq, bk, bv, wo, o_b,
                     ln1_g, ln1_b, ff1_w, ff1_b, ff2_w, ff2_b,
                     ln2_g, ln2_b, cls_w, cls_b,
                     out_ref):
    """One grid step = one sequence: backbone on all T frames + dynamic head."""
    f32 = jnp.float32
    bf16 = jnp.bfloat16

    # ---- static backbone surrogate: conv(3x3 as im2col matmul) -> ReLU -> GAP/frame
    p = patches_ref[0]                                             # (T*HW, KPAD) bf16
    h = jnp.dot(p, conv_w[...], preferred_element_type=f32) + conv_b[...]
    h = jnp.maximum(h, 0.0)                                        # (T*HW, FEAT) f32
    # per-frame mean pooling as a (T, T*HW) block-diagonal matmul on the MXU
    feats = jnp.dot(pool_ref[...], h, preferred_element_type=f32)  # (T, FEAT)

    # ---- embeddings layer
    e = jnp.tanh(jnp.dot(feats.astype(bf16), emb_w[...],
                         preferred_element_type=f32) + emb_b[...])  # (T, DMODEL)
    e_b = e.astype(bf16)

    # ---- multi-head self-attention (all heads packed along lanes, 64 -> 128 padded;
    #      score scale pre-folded into wq/bq)
    q_all = jnp.dot(e_b, wq[...], preferred_element_type=f32) + bq[...]   # (T, QKVPAD)
    k_all = jnp.dot(e_b, wk[...], preferred_element_type=f32) + bk[...]
    v_all = jnp.dot(e_b, wv[...], preferred_element_type=f32) + bv[...]

    ctxs = []
    for hh in range(NUM_HEADS):                                     # static unroll, 4 heads
        lo = hh * HPAD                                              # 128-lane aligned slice
        qh = q_all[:, lo:lo + HPAD].astype(bf16)
        kh = k_all[:, lo:lo + HPAD].astype(bf16)
        vh = v_all[:, lo:lo + HPAD].astype(bf16)
        s = lax.dot_general(qh, kh, (((1,), (1,)), ((), ())),
                            preferred_element_type=f32)             # (T, T)
        s = s - jnp.max(s, axis=-1, keepdims=True)
        pe = jnp.exp(s)
        attn = pe * pl.reciprocal(jnp.sum(pe, axis=-1, keepdims=True), approx=True)
        ctxs.append(jnp.dot(attn.astype(bf16), vh,
                            preferred_element_type=f32))             # (T, HPAD)
    ctx_all = jnp.concatenate(ctxs, axis=1).astype(bf16)             # (T, QKVPAD)
    attn_out = jnp.dot(ctx_all, wo[...], preferred_element_type=f32)  # (T, DMODEL)

    # ---- residual + LN, feed-forward, residual + LN
    x1 = _layernorm(e + attn_out + o_b[...], ln1_g[...], ln1_b[...])
    ffh = jnp.maximum(jnp.dot(x1.astype(bf16), ff1_w[...],
                              preferred_element_type=f32) + ff1_b[...], 0.0)
    ff = jnp.dot(ffh.astype(bf16), ff2_w[...],
                 preferred_element_type=f32) + ff2_b[...]
    x2 = _layernorm(x1 + ff, ln2_g[...], ln2_b[...])

    # ---- temporal mean pooling + classifier (output lane-padded to 128)
    pooled = jnp.mean(x2, axis=0, keepdims=True)                    # (1, DMODEL)
    logits = jnp.dot(pooled.astype(bf16), cls_w[...],
                     preferred_element_type=f32) + cls_b[...]       # (1, CPAD)
    out_ref[0] = logits


# ------------------------------- wrappers ---------------------------------------
def _const_spec(shape):
    zeros = (0,) * len(shape)
    return pl.BlockSpec(shape, lambda b, _z=zeros: _z)


_WEIGHT_ORDER = ["conv_w", "conv_b", "emb_w", "emb_b",
                 "wq", "wk", "wv", "bq", "bk", "bv", "wo", "o_b",
                 "ln1_g", "ln1_b", "ff1_w", "ff1_b", "ff2_w", "ff2_b",
                 "ln2_g", "ln2_b", "cls_w", "cls_b"]


def _fused_forward(patches, pool, w):
    n_seq = patches.shape[0]
    w_args = [w[k] for k in _WEIGHT_ORDER]
    w_specs = [_const_spec(a.shape) for a in w_args]
    return pl.pallas_call(
        _fused_er_kernel,
        out_shape=jax.ShapeDtypeStruct((n_seq, 1, CPAD), jnp.float32),
        grid=(n_seq,),
        in_specs=[pl.BlockSpec((1, T * HW, KPAD), lambda b: (b, 0, 0)),
                  _const_spec(pool.shape)] + w_specs,
        out_specs=pl.BlockSpec((1, 1, CPAD), lambda b: (b, 0, 0)),
        compiler_params=pltpu.CompilerParams(
            dimension_semantics=("parallel",),
            vmem_limit_bytes=32 * 1024 * 1024),
    )(patches, pool, *w_args)


def _prepare_weights(params):
    """Repack canonical (PyTorch-layout) params into TPU-friendly lane-aligned slabs."""
    bf16 = jnp.bfloat16
    # conv: pad patch dim 27 -> 128 (zero rows contribute nothing)
    conv_w = jnp.pad(params["conv_w"], ((0, KPAD - KPATCH), (0, 0))).astype(bf16)

    # qkv: (DMODEL, 3*DMODEL) -> three (DMODEL, NUM_HEADS*128) slabs, per-head dim
    # zero-padded 64 -> 128; softmax scale folded into the q slab.
    qkv_w = params["qkv_w"].reshape(DMODEL, 3, NUM_HEADS, HEAD_DIM)
    qkv_b = params["qkv_b"].reshape(3, NUM_HEADS, HEAD_DIM)
    scale = 1.0 / (HEAD_DIM ** 0.5)

    def pack_w(i, s=1.0):
        wi = qkv_w[:, i] * s                                        # (DMODEL, NH, HEAD_DIM)
        wi = jnp.pad(wi, ((0, 0), (0, 0), (0, HPAD - HEAD_DIM)))
        return wi.reshape(DMODEL, QKVPAD).astype(bf16)

    def pack_b(i, s=1.0):
        bi = qkv_b[i] * s                                           # (NH, HEAD_DIM)
        bi = jnp.pad(bi, ((0, 0), (0, HPAD - HEAD_DIM)))
        return bi.reshape(1, QKVPAD)

    # output projection: (DMODEL, DMODEL) -> (NUM_HEADS*128, DMODEL), padded rows zero.
    wo = params["o_w"].reshape(NUM_HEADS, HEAD_DIM, DMODEL)
    wo = jnp.pad(wo, ((0, 0), (0, HPAD - HEAD_DIM), (0, 0)))
    wo = wo.reshape(QKVPAD, DMODEL).astype(bf16)

    cls_w = jnp.pad(params["cls_w"], ((0, 0), (0, CPAD - NUM_CLASSES))).astype(bf16)
    cls_b = jnp.pad(params["cls_b"], ((0, 0), (0, CPAD - NUM_CLASSES)))
    return {
        "conv_w": conv_w, "conv_b": params["conv_b"],
        "emb_w": params["emb_w"].astype(bf16), "emb_b": params["emb_b"],
        "wq": pack_w(0, scale), "wk": pack_w(1), "wv": pack_w(2),
        "bq": pack_b(0, scale), "bk": pack_b(1), "bv": pack_b(2),
        "wo": wo, "o_b": params["o_b"],
        "ln1_g": params["ln1_g"], "ln1_b": params["ln1_b"],
        "ff1_w": params["ff1_w"].astype(bf16), "ff1_b": params["ff1_b"],
        "ff2_w": params["ff2_w"].astype(bf16), "ff2_b": params["ff2_b"],
        "ln2_g": params["ln2_g"], "ln2_b": params["ln2_b"],
        "cls_w": cls_w, "cls_b": cls_b,
    }


def _im2col(frames_nhwc):
    """frames: (N, H, W, C) -> patches (N, H*W, KH*KW*C); pad=1, stride=1."""
    n = frames_nhwc.shape[0]
    xp = jnp.pad(frames_nhwc, ((0, 0), (1, 1), (1, 1), (0, 0)))
    cols = [xp[:, dy:dy + H, dx:dx + W, :] for dy in range(KH) for dx in range(KW)]
    p = jnp.stack(cols, axis=3)                               # (N, H, W, KH*KW, C)
    return p.reshape(n, H * W, KPATCH)


@jax.jit
def uni_modal_er_forward(x, params):
    """x: (B, T, C, H, W) float32 in [0, 1].  Returns (B, NUM_CLASSES) logits."""
    # __preprocess: per-image ImageNet normalization (EfficientNet-B1 pipeline).
    mean = jnp.array([0.485, 0.456, 0.406], jnp.float32).reshape(1, 1, C, 1, 1)
    std = jnp.array([0.229, 0.224, 0.225], jnp.float32).reshape(1, 1, C, 1, 1)
    x = (x - mean) / std

    b, t = x.shape[0], x.shape[1]
    frames = x.reshape(b * t, C, H, W).transpose(0, 2, 3, 1)       # NCHW -> NHWC
    # NOTE: at real resolution, im2col should move inside the kernel (9 shifted
    # accumulated matmuls) to avoid the 9x HBM blow-up; fine at 16x16 toy size.
    patches = _im2col(frames)                                      # (N, HW, 27)
    patches = jnp.pad(patches, ((0, 0), (0, 0), (0, KPAD - KPATCH)))
    patches = patches.reshape(b, t * HW, KPAD).astype(jnp.bfloat16)

    # per-frame global-average-pool as a block-diagonal matmul (MXU, exact: 1/256)
    pool = jnp.kron(jnp.eye(t, dtype=jnp.float32),
                    jnp.full((1, HW), 1.0 / HW, jnp.float32))       # (T, T*HW)

    w = _prepare_weights(params)
    logits = _fused_forward(patches, pool, w)                       # (B, 1, CPAD)
    return logits.reshape(b, CPAD)[:, :NUM_CLASSES]


def init_params(key):
    ks = jax.random.split(key, 8)
    g = lambda k, shape, s: (jax.random.normal(k, shape, jnp.float32) * s)
    return {
        # static surrogate backbone (conv-as-matmul): (KPATCH, FEAT)
        "conv_w": g(ks[0], (KPATCH, FEAT), 0.1),
        "conv_b": jnp.zeros((1, FEAT), jnp.float32),
        # dynamic head (canonical PyTorch-style layout; repacked in wrapper)
        "emb_w": g(ks[1], (FEAT, DMODEL), 0.05),
        "emb_b": jnp.zeros((1, DMODEL), jnp.float32),
        "qkv_w": g(ks[2], (DMODEL, 3 * DMODEL), 0.05),
        "qkv_b": jnp.zeros((1, 3 * DMODEL), jnp.float32),
        "o_w": g(ks[3], (DMODEL, DMODEL), 0.05),
        "o_b": jnp.zeros((1, DMODEL), jnp.float32),
        "ln1_g": jnp.ones((1, DMODEL), jnp.float32),
        "ln1_b": jnp.zeros((1, DMODEL), jnp.float32),
        "ff1_w": g(ks[4], (DMODEL, DFF), 0.05),
        "ff1_b": jnp.zeros((1, DFF), jnp.float32),
        "ff2_w": g(ks[5], (DFF, DMODEL), 0.05),
        "ff2_b": jnp.zeros((1, DMODEL), jnp.float32),
        "ln2_g": jnp.ones((1, DMODEL), jnp.float32),
        "ln2_b": jnp.zeros((1, DMODEL), jnp.float32),
        "cls_w": g(ks[6], (DMODEL, NUM_CLASSES), 0.05),
        "cls_b": jnp.zeros((1, NUM_CLASSES), jnp.float32),
    }


if __name__ == "__main__":
    key = jax.random.PRNGKey(0)
    k_x, k_p = jax.random.split(key)
    x = jax.random.uniform(k_x, (B, T, C, H, W), jnp.float32)   # "video" batch
    params = init_params(k_p)

    out = uni_modal_er_forward(x, params)
    out = jax.block_until_ready(out)
    assert out.shape == (B, NUM_CLASSES) and out.dtype == jnp.float32
    assert bool(jnp.all(jnp.isfinite(out)))
    print("KERNEL_OK")
</pallas_src>

<mosaic_0001>
module attributes {stable_mosaic.version = 11 : i64} {
  func.func @_fused_er_kernel(%arg0: i32, %arg1: memref<1x2048x128xbf16, #tpu.memory_space<vmem>>, %arg2: memref<8x2048xf32, #tpu.memory_space<vmem>>, %arg3: memref<128x128xbf16, #tpu.memory_space<vmem>>, %arg4: memref<1x128xf32, #tpu.memory_space<vmem>>, %arg5: memref<128x256xbf16, #tpu.memory_space<vmem>>, %arg6: memref<1x256xf32, #tpu.memory_space<vmem>>, %arg7: memref<256x512xbf16, #tpu.memory_space<vmem>>, %arg8: memref<256x512xbf16, #tpu.memory_space<vmem>>, %arg9: memref<256x512xbf16, #tpu.memory_space<vmem>>, %arg10: memref<1x512xf32, #tpu.memory_space<vmem>>, %arg11: memref<1x512xf32, #tpu.memory_space<vmem>>, %arg12: memref<1x512xf32, #tpu.memory_space<vmem>>, %arg13: memref<512x256xbf16, #tpu.memory_space<vmem>>, %arg14: memref<1x256xf32, #tpu.memory_space<vmem>>, %arg15: memref<1x256xf32, #tpu.memory_space<vmem>>, %arg16: memref<1x256xf32, #tpu.memory_space<vmem>>, %arg17: memref<256x256xbf16, #tpu.memory_space<vmem>>, %arg18: memref<1x256xf32, #tpu.memory_space<vmem>>, %arg19: memref<256x256xbf16, #tpu.memory_space<vmem>>, %arg20: memref<1x256xf32, #tpu.memory_space<vmem>>, %arg21: memref<1x256xf32, #tpu.memory_space<vmem>>, %arg22: memref<1x256xf32, #tpu.memory_space<vmem>>, %arg23: memref<256x128xbf16, #tpu.memory_space<vmem>>, %arg24: memref<1x128xf32, #tpu.memory_space<vmem>>, %arg25: memref<1x1x128xf32, #tpu.memory_space<vmem>>) attributes {dimension_semantics = [#tpu.dimension_semantics<parallel>], iteration_bounds = array<i64: 2>, scalar_prefetch = 0 : i64, scratch_operands = 0 : i64, tpu.core_type = #tpu.core_type<tc>, window_params = [{transform_indices = @transform_0, window_bounds = array<i64: 1, 2048, 128>}, {pipeline_mode = #tpu.pipeline_mode<synchronous>, transform_indices = @transform_1, window_bounds = array<i64: 8, 2048>}, {pipeline_mode = #tpu.pipeline_mode<synchronous>, transform_indices = @transform_2, window_bounds = array<i64: 128, 128>}, {pipeline_mode = #tpu.pipeline_mode<synchronous>, transform_indices = @transform_3, window_bounds = array<i64: 1, 128>}, {pipeline_mode = #tpu.pipeline_mode<synchronous>, transform_indices = @transform_4, window_bounds = array<i64: 128, 256>}, {pipeline_mode = #tpu.pipeline_mode<synchronous>, transform_indices = @transform_5, window_bounds = array<i64: 1, 256>}, {pipeline_mode = #tpu.pipeline_mode<synchronous>, transform_indices = @transform_6, window_bounds = array<i64: 256, 512>}, {pipeline_mode = #tpu.pipeline_mode<synchronous>, transform_indices = @transform_7, window_bounds = array<i64: 256, 512>}, {pipeline_mode = #tpu.pipeline_mode<synchronous>, transform_indices = @transform_8, window_bounds = array<i64: 256, 512>}, {pipeline_mode = #tpu.pipeline_mode<synchronous>, transform_indices = @transform_9, window_bounds = array<i64: 1, 512>}, {pipeline_mode = #tpu.pipeline_mode<synchronous>, transform_indices = @transform_10, window_bounds = array<i64: 1, 512>}, {pipeline_mode = #tpu.pipeline_mode<synchronous>, transform_indices = @transform_11, window_bounds = array<i64: 1, 512>}, {pipeline_mode = #tpu.pipeline_mode<synchronous>, transform_indices = @transform_12, window_bounds = array<i64: 512, 256>}, {pipeline_mode = #tpu.pipeline_mode<synchronous>, transform_indices = @transform_13, window_bounds = array<i64: 1, 256>}, {pipeline_mode = #tpu.pipeline_mode<synchronous>, transform_indices = @transform_14, window_bounds = array<i64: 1, 256>}, {pipeline_mode = #tpu.pipeline_mode<synchronous>, transform_indices = @transform_15, window_bounds = array<i64: 1, 256>}, {pipeline_mode = #tpu.pipeline_mode<synchronous>, transform_indices = @transform_16, window_bounds = array<i64: 256, 256>}, {pipeline_mode = #tpu.pipeline_mode<synchronous>, transform_indices = @transform_17, window_bounds = array<i64: 1, 256>}, {pipeline_mode = #tpu.pipeline_mode<synchronous>, transform_indices = @transform_18, window_bounds = array<i64: 256, 256>}, {pipeline_mode = #tpu.pipeline_mode<synchronous>, transform_indices = @transform_19, window_bounds = array<i64: 1, 256>}, {pipeline_mode = #tpu.pipeline_mode<synchronous>, transform_indices = @transform_20, window_bounds = array<i64: 1, 256>}, {pipeline_mode = #tpu.pipeline_mode<synchronous>, transform_indices = @transform_21, window_bounds = array<i64: 1, 256>}, {pipeline_mode = #tpu.pipeline_mode<synchronous>, transform_indices = @transform_22, window_bounds = array<i64: 256, 128>}, {pipeline_mode = #tpu.pipeline_mode<synchronous>, transform_indices = @transform_23, window_bounds = array<i64: 1, 128>}, {transform_indices = @transform_24, window_bounds = array<i64: 1, 1, 128>}]} {
    %c0 = arith.constant 0 : index
    %c0_0 = arith.constant 0 : index
    %c0_1 = arith.constant 0 : index
    %0 = vector.load %arg1[%c0, %c0_0, %c0_1] : memref<1x2048x128xbf16, #tpu.memory_space<vmem>>, vector<1x2048x128xbf16>
    %1 = vector.shape_cast %0 : vector<1x2048x128xbf16> to vector<2048x128xbf16>
    %c0_2 = arith.constant 0 : index
    %c0_3 = arith.constant 0 : index
    %2 = vector.load %arg3[%c0_2, %c0_3] : memref<128x128xbf16, #tpu.memory_space<vmem>>, vector<128x128xbf16>
    %cst = arith.constant dense<0.000000e+00> : vector<2048x128xf32>
    %3 = tpu.matmul %1, %2, %cst {dimension_numbers = #tpu.dot_dimension_numbers<[1], [0], [0], [1], [0, 0, 1, 1], [], []>} : vector<2048x128xbf16>, vector<128x128xbf16>, vector<2048x128xf32> -> vector<2048x128xf32>
    %c0_4 = arith.constant 0 : index
    %c0_5 = arith.constant 0 : index
    %4 = vector.load %arg4[%c0_4, %c0_5] : memref<1x128xf32, #tpu.memory_space<vmem>>, vector<1x128xf32>
    %5 = vector.broadcast %4 : vector<1x128xf32> to vector<2048x128xf32>
    %6 = arith.addf %3, %5 : vector<2048x128xf32>
    %cst_6 = arith.constant 0.000000e+00 : f32
    %7 = vector.broadcast %cst_6 : f32 to vector<2048x128xf32>
    %8 = arith.maximumf %6, %7 : vector<2048x128xf32>
    %c0_7 = arith.constant 0 : index
    %c0_8 = arith.constant 0 : index
    %9 = vector.load %arg2[%c0_7, %c0_8] : memref<8x2048xf32, #tpu.memory_space<vmem>>, vector<8x2048xf32>
    %cst_9 = arith.constant dense<0.000000e+00> : vector<8x128xf32>
    %10 = tpu.matmul %9, %8, %cst_9 {dimension_numbers = #tpu.dot_dimension_numbers<[1], [0], [0], [1], [0, 0, 1, 1], [], []>} : vector<8x2048xf32>, vector<2048x128xf32>, vector<8x128xf32> -> vector<8x128xf32>
    %11 = arith.truncf %10 : vector<8x128xf32> to vector<8x128xbf16>
    %c0_10 = arith.constant 0 : index
    %c0_11 = arith.constant 0 : index
    %12 = vector.load %arg5[%c0_10, %c0_11] : memref<128x256xbf16, #tpu.memory_space<vmem>>, vector<128x256xbf16>
    %cst_12 = arith.constant dense<0.000000e+00> : vector<8x256xf32>
    %13 = tpu.matmul %11, %12, %cst_12 {dimension_numbers = #tpu.dot_dimension_numbers<[1], [0], [0], [1], [0, 0, 1, 1], [], []>} : vector<8x128xbf16>, vector<128x256xbf16>, vector<8x256xf32> -> vector<8x256xf32>
    %c0_13 = arith.constant 0 : index
    %c0_14 = arith.constant 0 : index
    %14 = vector.load %arg6[%c0_13, %c0_14] : memref<1x256xf32, #tpu.memory_space<vmem>>, vector<1x256xf32>
    %15 = vector.broadcast %14 : vector<1x256xf32> to vector<8x256xf32>
    %16 = arith.addf %13, %15 : vector<8x256xf32>
    %17 = math.tanh %16 : vector<8x256xf32>
    %18 = arith.truncf %17 : vector<8x256xf32> to vector<8x256xbf16>
    %c0_15 = arith.constant 0 : index
    %c0_16 = arith.constant 0 : index
    %19 = vector.load %arg7[%c0_15, %c0_16] : memref<256x512xbf16, #tpu.memory_space<vmem>>, vector<256x512xbf16>
    %cst_17 = arith.constant dense<0.000000e+00> : vector<8x512xf32>
    %20 = tpu.matmul %18, %19, %cst_17 {dimension_numbers = #tpu.dot_dimension_numbers<[1], [0], [0], [1], [0, 0, 1, 1], [], []>} : vector<8x256xbf16>, vector<256x512xbf16>, vector<8x512xf32> -> vector<8x512xf32>
    %c0_18 = arith.constant 0 : index
    %c0_19 = arith.constant 0 : index
    %21 = vector.load %arg10[%c0_18, %c0_19] : memref<1x512xf32, #tpu.memory_space<vmem>>, vector<1x512xf32>
    %22 = vector.broadcast %21 : vector<1x512xf32> to vector<8x512xf32>
    %23 = arith.addf %20, %22 : vector<8x512xf32>
    %c0_20 = arith.constant 0 : index
    %c0_21 = arith.constant 0 : index
    %24 = vector.load %arg8[%c0_20, %c0_21] : memref<256x512xbf16, #tpu.memory_space<vmem>>, vector<256x512xbf16>
    %cst_22 = arith.constant dense<0.000000e+00> : vector<8x512xf32>
    %25 = tpu.matmul %18, %24, %cst_22 {dimension_numbers = #tpu.dot_dimension_numbers<[1], [0], [0], [1], [0, 0, 1, 1], [], []>} : vector<8x256xbf16>, vector<256x512xbf16>, vector<8x512xf32> -> vector<8x512xf32>
    %c0_23 = arith.constant 0 : index
    %c0_24 = arith.constant 0 : index
    %26 = vector.load %arg11[%c0_23, %c0_24] : memref<1x512xf32, #tpu.memory_space<vmem>>, vector<1x512xf32>
    %27 = vector.broadcast %26 : vector<1x512xf32> to vector<8x512xf32>
    %28 = arith.addf %25, %27 : vector<8x512xf32>
    %c0_25 = arith.constant 0 : index
    %c0_26 = arith.constant 0 : index
    %29 = vector.load %arg9[%c0_25, %c0_26] : memref<256x512xbf16, #tpu.memory_space<vmem>>, vector<256x512xbf16>
    %cst_27 = arith.constant dense<0.000000e+00> : vector<8x512xf32>
    %30 = tpu.matmul %18, %29, %cst_27 {dimension_numbers = #tpu.dot_dimension_numbers<[1], [0], [0], [1], [0, 0, 1, 1], [], []>} : vector<8x256xbf16>, vector<256x512xbf16>, vector<8x512xf32> -> vector<8x512xf32>
    %c0_28 = arith.constant 0 : index
    %c0_29 = arith.constant 0 : index
    %31 = vector.load %arg12[%c0_28, %c0_29] : memref<1x512xf32, #tpu.memory_space<vmem>>, vector<1x512xf32>
    %32 = vector.broadcast %31 : vector<1x512xf32> to vector<8x512xf32>
    %33 = arith.addf %30, %32 : vector<8x512xf32>
    %34 = vector.extract_strided_slice %23 {offsets = [0, 0], sizes = [8, 128], strides = [1, 1]} : vector<8x512xf32> to vector<8x128xf32>
    %35 = arith.truncf %34 : vector<8x128xf32> to vector<8x128xbf16>
    %36 = vector.extract_strided_slice %28 {offsets = [0, 0], sizes = [8, 128], strides = [1, 1]} : vector<8x512xf32> to vector<8x128xf32>
    %37 = arith.truncf %36 : vector<8x128xf32> to vector<8x128xbf16>
    %38 = vector.extract_strided_slice %33 {offsets = [0, 0], sizes = [8, 128], strides = [1, 1]} : vector<8x512xf32> to vector<8x128xf32>
    %39 = arith.truncf %38 : vector<8x128xf32> to vector<8x128xbf16>
    %cst_30 = arith.constant dense<0.000000e+00> : vector<8x8xf32>
    %40 = tpu.matmul %35, %37, %cst_30 {dimension_numbers = #tpu.dot_dimension_numbers<[1], [1], [0], [0], [0, 0, 1, 0], [], []>} : vector<8x128xbf16>, vector<8x128xbf16>, vector<8x8xf32> -> vector<8x8xf32>
    %cst_31 = arith.constant dense<0xFF800000> : vector<8xf32>
    %41 = vector.multi_reduction <maximumf>, %40, %cst_31 [1] : vector<8x8xf32> to vector<8xf32>
    %42 = vector.shape_cast %41 : vector<8xf32> to vector<8x1xf32>
    %43 = vector.broadcast %42 : vector<8x1xf32> to vector<8x8xf32>
    %44 = arith.subf %40, %43 : vector<8x8xf32>
    %45 = math.exp %44 : vector<8x8xf32>
    %cst_32 = arith.constant dense<0.000000e+00> : vector<8xf32>
    %46 = vector.multi_reduction <add>, %45, %cst_32 [1] : vector<8x8xf32> to vector<8xf32>
    %47 = vector.shape_cast %46 : vector<8xf32> to vector<8x1xf32>
    %48 = tpu.reciprocal %47 {approx = true} : vector<8x1xf32> -> vector<8x1xf32>
    %49 = vector.broadcast %48 : vector<8x1xf32> to vector<8x8xf32>
    %50 = arith.mulf %45, %49 : vector<8x8xf32>
    %51 = arith.truncf %50 : vector<8x8xf32> to vector<8x8xbf16>
    %cst_33 = arith.constant dense<0.000000e+00> : vector<8x128xf32>
    %52 = tpu.matmul %51, %39, %cst_33 {dimension_numbers = #tpu.dot_dimension_numbers<[1], [0], [0], [1], [0, 0, 1, 1], [], []>} : vector<8x8xbf16>, vector<8x128xbf16>, vector<8x128xf32> -> vector<8x128xf32>
    %53 = vector.extract_strided_slice %23 {offsets = [0, 128], sizes = [8, 128], strides = [1, 1]} : vector<8x512xf32> to vector<8x128xf32>
    %54 = arith.truncf %53 : vector<8x128xf32> to vector<8x128xbf16>
    %55 = vector.extract_strided_slice %28 {offsets = [0, 128], sizes = [8, 128], strides = [1, 1]} : vector<8x512xf32> to vector<8x128xf32>
    %56 = arith.truncf %55 : vector<8x128xf32> to vector<8x128xbf16>
    %57 = vector.extract_strided_slice %33 {offsets = [0, 128], sizes = [8, 128], strides = [1, 1]} : vector<8x512xf32> to vector<8x128xf32>
    %58 = arith.truncf %57 : vector<8x128xf32> to vector<8x128xbf16>
    %cst_34 = arith.constant dense<0.000000e+00> : vector<8x8xf32>
    %59 = tpu.matmul %54, %56, %cst_34 {dimension_numbers = #tpu.dot_dimension_numbers<[1], [1], [0], [0], [0, 0, 1, 0], [], []>} : vector<8x128xbf16>, vector<8x128xbf16>, vector<8x8xf32> -> vector<8x8xf32>
    %cst_35 = arith.constant dense<0xFF800000> : vector<8xf32>
    %60 = vector.multi_reduction <maximumf>, %59, %cst_35 [1] : vector<8x8xf32> to vector<8xf32>
    %61 = vector.shape_cast %60 : vector<8xf32> to vector<8x1xf32>
    %62 = vector.broadcast %61 : vector<8x1xf32> to vector<8x8xf32>
    %63 = arith.subf %59, %62 : vector<8x8xf32>
    %64 = math.exp %63 : vector<8x8xf32>
    %cst_36 = arith.constant dense<0.000000e+00> : vector<8xf32>
    %65 = vector.multi_reduction <add>, %64, %cst_36 [1] : vector<8x8xf32> to vector<8xf32>
    %66 = vector.shape_cast %65 : vector<8xf32> to vector<8x1xf32>
    %67 = tpu.reciprocal %66 {approx = true} : vector<8x1xf32> -> vector<8x1xf32>
    %68 = vector.broadcast %67 : vector<8x1xf32> to vector<8x8xf32>
    %69 = arith.mulf %64, %68 : vector<8x8xf32>
    %70 = arith.truncf %69 : vector<8x8xf32> to vector<8x8xbf16>
    %cst_37 = arith.constant dense<0.000000e+00> : vector<8x128xf32>
    %71 = tpu.matmul %70, %58, %cst_37 {dimension_numbers = #tpu.dot_dimension_numbers<[1], [0], [0], [1], [0, 0, 1, 1], [], []>} : vector<8x8xbf16>, vector<8x128xbf16>, vector<8x128xf32> -> vector<8x128xf32>
    %72 = vector.extract_strided_slice %23 {offsets = [0, 256], sizes = [8, 128], strides = [1, 1]} : vector<8x512xf32> to vector<8x128xf32>
    %73 = arith.truncf %72 : vector<8x128xf32> to vector<8x128xbf16>
    %74 = vector.extract_strided_slice %28 {offsets = [0, 256], sizes = [8, 128], strides = [1, 1]} : vector<8x512xf32> to vector<8x128xf32>
    %75 = arith.truncf %74 : vector<8x128xf32> to vector<8x128xbf16>
    %76 = vector.extract_strided_slice %33 {offsets = [0, 256], sizes = [8, 128], strides = [1, 1]} : vector<8x512xf32> to vector<8x128xf32>
    %77 = arith.truncf %76 : vector<8x128xf32> to vector<8x128xbf16>
    %cst_38 = arith.constant dense<0.000000e+00> : vector<8x8xf32>
    %78 = tpu.matmul %73, %75, %cst_38 {dimension_numbers = #tpu.dot_dimension_numbers<[1], [1], [0], [0], [0, 0, 1, 0], [], []>} : vector<8x128xbf16>, vector<8x128xbf16>, vector<8x8xf32> -> vector<8x8xf32>
    %cst_39 = arith.constant dense<0xFF800000> : vector<8xf32>
    %79 = vector.multi_reduction <maximumf>, %78, %cst_39 [1] : vector<8x8xf32> to vector<8xf32>
    %80 = vector.shape_cast %79 : vector<8xf32> to vector<8x1xf32>
    %81 = vector.broadcast %80 : vector<8x1xf32> to vector<8x8xf32>
    %82 = arith.subf %78, %81 : vector<8x8xf32>
    %83 = math.exp %82 : vector<8x8xf32>
    %cst_40 = arith.constant dense<0.000000e+00> : vector<8xf32>
    %84 = vector.multi_reduction <add>, %83, %cst_40 [1] : vector<8x8xf32> to vector<8xf32>
    %85 = vector.shape_cast %84 : vector<8xf32> to vector<8x1xf32>
    %86 = tpu.reciprocal %85 {approx = true} : vector<8x1xf32> -> vector<8x1xf32>
    %87 = vector.broadcast %86 : vector<8x1xf32> to vector<8x8xf32>
    %88 = arith.mulf %83, %87 : vector<8x8xf32>
    %89 = arith.truncf %88 : vector<8x8xf32> to vector<8x8xbf16>
    %cst_41 = arith.constant dense<0.000000e+00> : vector<8x128xf32>
    %90 = tpu.matmul %89, %77, %cst_41 {dimension_numbers = #tpu.dot_dimension_numbers<[1], [0], [0], [1], [0, 0, 1, 1], [], []>} : vector<8x8xbf16>, vector<8x128xbf16>, vector<8x128xf32> -> vector<8x128xf32>
    %91 = vector.extract_strided_slice %23 {offsets = [0, 384], sizes = [8, 128], strides = [1, 1]} : vector<8x512xf32> to vector<8x128xf32>
    %92 = arith.truncf %91 : vector<8x128xf32> to vector<8x128xbf16>
    %93 = vector.extract_strided_slice %28 {offsets = [0, 384], sizes = [8, 128], strides = [1, 1]} : vector<8x512xf32> to vector<8x128xf32>
    %94 = arith.truncf %93 : vector<8x128xf32> to vector<8x128xbf16>
    %95 = vector.extract_strided_slice %33 {offsets = [0, 384], sizes = [8, 128], strides = [1, 1]} : vector<8x512xf32> to vector<8x128xf32>
    %96 = arith.truncf %95 : vector<8x128xf32> to vector<8x128xbf16>
    %cst_42 = arith.constant dense<0.000000e+00> : vector<8x8xf32>
    %97 = tpu.matmul %92, %94, %cst_42 {dimension_numbers = #tpu.dot_dimension_numbers<[1], [1], [0], [0], [0, 0, 1, 0], [], []>} : vector<8x128xbf16>, vector<8x128xbf16>, vector<8x8xf32> -> vector<8x8xf32>
    %cst_43 = arith.constant dense<0xFF800000> : vector<8xf32>
    %98 = vector.multi_reduction <maximumf>, %97, %cst_43 [1] : vector<8x8xf32> to vector<8xf32>
    %99 = vector.shape_cast %98 : vector<8xf32> to vector<8x1xf32>
    %100 = vector.broadcast %99 : vector<8x1xf32> to vector<8x8xf32>
    %101 = arith.subf %97, %100 : vector<8x8xf32>
    %102 = math.exp %101 : vector<8x8xf32>
    %cst_44 = arith.constant dense<0.000000e+00> : vector<8xf32>
    %103 = vector.multi_reduction <add>, %102, %cst_44 [1] : vector<8x8xf32> to vector<8xf32>
    %104 = vector.shape_cast %103 : vector<8xf32> to vector<8x1xf32>
    %105 = tpu.reciprocal %104 {approx = true} : vector<8x1xf32> -> vector<8x1xf32>
    %106 = vector.broadcast %105 : vector<8x1xf32> to vector<8x8xf32>
    %107 = arith.mulf %102, %106 : vector<8x8xf32>
    %108 = arith.truncf %107 : vector<8x8xf32> to vector<8x8xbf16>
    %cst_45 = arith.constant dense<0.000000e+00> : vector<8x128xf32>
    %109 = tpu.matmul %108, %96, %cst_45 {dimension_numbers = #tpu.dot_dimension_numbers<[1], [0], [0], [1], [0, 0, 1, 1], [], []>} : vector<8x8xbf16>, vector<8x128xbf16>, vector<8x128xf32> -> vector<8x128xf32>
    %110 = tpu.concatenate %52, %71, %90, %109 in 1 : vector<8x128xf32>, vector<8x128xf32>, vector<8x128xf32>, vector<8x128xf32> -> vector<8x512xf32>
    %111 = arith.truncf %110 : vector<8x512xf32> to vector<8x512xbf16>
    %c0_46 = arith.constant 0 : index
    %c0_47 = arith.constant 0 : index
    %112 = vector.load %arg13[%c0_46, %c0_47] : memref<512x256xbf16, #tpu.memory_space<vmem>>, vector<512x256xbf16>
    %cst_48 = arith.constant dense<0.000000e+00> : vector<8x256xf32>
    %113 = tpu.matmul %111, %112, %cst_48 {dimension_numbers = #tpu.dot_dimension_numbers<[1], [0], [0], [1], [0, 0, 1, 1], [], []>} : vector<8x512xbf16>, vector<512x256xbf16>, vector<8x256xf32> -> vector<8x256xf32>
    %114 = arith.addf %17, %113 : vector<8x256xf32>
    %c0_49 = arith.constant 0 : index
    %c0_50 = arith.constant 0 : index
    %115 = vector.load %arg14[%c0_49, %c0_50] : memref<1x256xf32, #tpu.memory_space<vmem>>, vector<1x256xf32>
    %116 = vector.broadcast %115 : vector<1x256xf32> to vector<8x256xf32>
    %117 = arith.addf %114, %116 : vector<8x256xf32>
    %c0_51 = arith.constant 0 : index
    %c0_52 = arith.constant 0 : index
    %118 = vector.load %arg15[%c0_51, %c0_52] : memref<1x256xf32, #tpu.memory_space<vmem>>, vector<1x256xf32>
    %c0_53 = arith.constant 0 : index
    %c0_54 = arith.constant 0 : index
    %119 = vector.load %arg16[%c0_53, %c0_54] : memref<1x256xf32, #tpu.memory_space<vmem>>, vector<1x256xf32>
    %cst_55 = arith.constant dense<0.000000e+00> : vector<8xf32>
    %120 = vector.multi_reduction <add>, %117, %cst_55 [1] : vector<8x256xf32> to vector<8xf32>
    %121 = vector.shape_cast %120 : vector<8xf32> to vector<8x1xf32>
    %cst_56 = arith.constant 2.560000e+02 : f32
    %122 = vector.broadcast %cst_56 : f32 to vector<8x1xf32>
    %123 = arith.divf %121, %122 : vector<8x1xf32>
    %124 = vector.broadcast %123 : vector<8x1xf32> to vector<8x256xf32>
    %125 = arith.subf %117, %124 : vector<8x256xf32>
    %126 = arith.mulf %125, %125 : vector<8x256xf32>
    %cst_57 = arith.constant dense<0.000000e+00> : vector<8xf32>
    %127 = vector.multi_reduction <add>, %126, %cst_57 [1] : vector<8x256xf32> to vector<8xf32>
    %128 = vector.shape_cast %127 : vector<8xf32> to vector<8x1xf32>
    %cst_58 = arith.constant 2.560000e+02 : f32
    %129 = vector.broadcast %cst_58 : f32 to vector<8x1xf32>
    %130 = arith.divf %128, %129 : vector<8x1xf32>
    %cst_59 = arith.constant 9.99999974E-6 : f32
    %131 = vector.broadcast %cst_59 : f32 to vector<8x1xf32>
    %132 = arith.addf %130, %131 : vector<8x1xf32>
    %133 = math.rsqrt %132 : vector<8x1xf32>
    %134 = vector.broadcast %133 : vector<8x1xf32> to vector<8x256xf32>
    %135 = arith.mulf %125, %134 : vector<8x256xf32>
    %136 = vector.broadcast %118 : vector<1x256xf32> to vector<8x256xf32>
    %137 = arith.mulf %135, %136 : vector<8x256xf32>
    %138 = vector.broadcast %119 : vector<1x256xf32> to vector<8x256xf32>
    %139 = arith.addf %137, %138 : vector<8x256xf32>
    %140 = arith.truncf %139 : vector<8x256xf32> to vector<8x256xbf16>
    %c0_60 = arith.constant 0 : index
    %c0_61 = arith.constant 0 : index
    %141 = vector.load %arg17[%c0_60, %c0_61] : memref<256x256xbf16, #tpu.memory_space<vmem>>, vector<256x256xbf16>
    %cst_62 = arith.constant dense<0.000000e+00> : vector<8x256xf32>
    %142 = tpu.matmul %140, %141, %cst_62 {dimension_numbers = #tpu.dot_dimension_numbers<[1], [0], [0], [1], [0, 0, 1, 1], [], []>} : vector<8x256xbf16>, vector<256x256xbf16>, vector<8x256xf32> -> vector<8x256xf32>
    %c0_63 = arith.constant 0 : index
    %c0_64 = arith.constant 0 : index
    %143 = vector.load %arg18[%c0_63, %c0_64] : memref<1x256xf32, #tpu.memory_space<vmem>>, vector<1x256xf32>
    %144 = vector.broadcast %143 : vector<1x256xf32> to vector<8x256xf32>
    %145 = arith.addf %142, %144 : vector<8x256xf32>
    %cst_65 = arith.constant 0.000000e+00 : f32
    %146 = vector.broadcast %cst_65 : f32 to vector<8x256xf32>
    %147 = arith.maximumf %145, %146 : vector<8x256xf32>
    %148 = arith.truncf %147 : vector<8x256xf32> to vector<8x256xbf16>
    %c0_66 = arith.constant 0 : index
    %c0_67 = arith.constant 0 : index
    %149 = vector.load %arg19[%c0_66, %c0_67] : memref<256x256xbf16, #tpu.memory_space<vmem>>, vector<256x256xbf16>
    %cst_68 = arith.constant dense<0.000000e+00> : vector<8x256xf32>
    %150 = tpu.matmul %148, %149, %cst_68 {dimension_numbers = #tpu.dot_dimension_numbers<[1], [0], [0], [1], [0, 0, 1, 1], [], []>} : vector<8x256xbf16>, vector<256x256xbf16>, vector<8x256xf32> -> vector<8x256xf32>
    %c0_69 = arith.constant 0 : index
    %c0_70 = arith.constant 0 : index
    %151 = vector.load %arg20[%c0_69, %c0_70] : memref<1x256xf32, #tpu.memory_space<vmem>>, vector<1x256xf32>
    %152 = vector.broadcast %151 : vector<1x256xf32> to vector<8x256xf32>
    %153 = arith.addf %150, %152 : vector<8x256xf32>
    %154 = arith.addf %139, %153 : vector<8x256xf32>
    %c0_71 = arith.constant 0 : index
    %c0_72 = arith.constant 0 : index
    %155 = vector.load %arg21[%c0_71, %c0_72] : memref<1x256xf32, #tpu.memory_space<vmem>>, vector<1x256xf32>
    %c0_73 = arith.constant 0 : index
    %c0_74 = arith.constant 0 : index
    %156 = vector.load %arg22[%c0_73, %c0_74] : memref<1x256xf32, #tpu.memory_space<vmem>>, vector<1x256xf32>
    %cst_75 = arith.constant dense<0.000000e+00> : vector<8xf32>
    %157 = vector.multi_reduction <add>, %154, %cst_75 [1] : vector<8x256xf32> to vector<8xf32>
    %158 = vector.shape_cast %157 : vector<8xf32> to vector<8x1xf32>
    %cst_76 = arith.constant 2.560000e+02 : f32
    %159 = vector.broadcast %cst_76 : f32 to vector<8x1xf32>
    %160 = arith.divf %158, %159 : vector<8x1xf32>
    %161 = vector.broadcast %160 : vector<8x1xf32> to vector<8x256xf32>
    %162 = arith.subf %154, %161 : vector<8x256xf32>
    %163 = arith.mulf %162, %162 : vector<8x256xf32>
    %cst_77 = arith.constant dense<0.000000e+00> : vector<8xf32>
    %164 = vector.multi_reduction <add>, %163, %cst_77 [1] : vector<8x256xf32> to vector<8xf32>
    %165 = vector.shape_cast %164 : vector<8xf32> to vector<8x1xf32>
    %cst_78 = arith.constant 2.560000e+02 : f32
    %166 = vector.broadcast %cst_78 : f32 to vector<8x1xf32>
    %167 = arith.divf %165, %166 : vector<8x1xf32>
    %cst_79 = arith.constant 9.99999974E-6 : f32
    %168 = vector.broadcast %cst_79 : f32 to vector<8x1xf32>
    %169 = arith.addf %167, %168 : vector<8x1xf32>
    %170 = math.rsqrt %169 : vector<8x1xf32>
    %171 = vector.broadcast %170 : vector<8x1xf32> to vector<8x256xf32>
    %172 = arith.mulf %162, %171 : vector<8x256xf32>
    %173 = vector.broadcast %155 : vector<1x256xf32> to vector<8x256xf32>
    %174 = arith.mulf %172, %173 : vector<8x256xf32>
    %175 = vector.broadcast %156 : vector<1x256xf32> to vector<8x256xf32>
    %176 = arith.addf %174, %175 : vector<8x256xf32>
    %cst_80 = arith.constant dense<0.000000e+00> : vector<256xf32>
    %177 = vector.multi_reduction <add>, %176, %cst_80 [0] : vector<8x256xf32> to vector<256xf32>
    %178 = vector.shape_cast %177 : vector<256xf32> to vector<1x256xf32>
    %cst_81 = arith.constant 8.000000e+00 : f32
    %179 = vector.broadcast %cst_81 : f32 to vector<1x256xf32>
    %180 = arith.divf %178, %179 : vector<1x256xf32>
    %181 = arith.truncf %180 : vector<1x256xf32> to vector<1x256xbf16>
    %c0_82 = arith.constant 0 : index
    %c0_83 = arith.constant 0 : index
    %182 = vector.load %arg23[%c0_82, %c0_83] : memref<256x128xbf16, #tpu.memory_space<vmem>>, vector<256x128xbf16>
    %cst_84 = arith.constant dense<0.000000e+00> : vector<1x128xf32>
    %183 = tpu.matmul %181, %182, %cst_84 {dimension_numbers = #tpu.dot_dimension_numbers<[1], [0], [0], [1], [0, 0, 1, 1], [], []>} : vector<1x256xbf16>, vector<256x128xbf16>, vector<1x128xf32> -> vector<1x128xf32>
    %c0_85 = arith.constant 0 : index
    %c0_86 = arith.constant 0 : index
    %184 = vector.load %arg24[%c0_85, %c0_86] : memref<1x128xf32, #tpu.memory_space<vmem>>, vector<1x128xf32>
    %185 = arith.addf %183, %184 : vector<1x128xf32>
    %c0_87 = arith.constant 0 : index
    %c0_88 = arith.constant 0 : index
    %c0_89 = arith.constant 0 : index
    %186 = vector.load %arg25[%c0_87, %c0_88, %c0_89] : memref<1x1x128xf32, #tpu.memory_space<vmem>>, vector<1x1x128xf32>
    %187 = vector.shape_cast %186 : vector<1x1x128xf32> to vector<1x128xf32>
    %188 = vector.shape_cast %185 : vector<1x128xf32> to vector<1x1x128xf32>
    tpu.vector_store %arg25[%c0_87, %c0_88, %c0_89], %188 {strides = array<i32>} : memref<1x1x128xf32, #tpu.memory_space<vmem>>, vector<1x1x128xf32>,
    return
  }
  func.func @transform_0(%arg0: i32) -> (i32, i32, i32) {
    %c0_i32 = arith.constant 0 : i32
    %c0_i32_0 = arith.constant 0 : i32
    %c0_i32_1 = arith.constant 0 : i32
    return %arg0, %c0_i32, %c0_i32_0 : i32, i32, i32
  }
  func.func @transform_1(%arg0: i32) -> (i32, i32) {
    %c0_i32 = arith.constant 0 : i32
    %c0_i32_0 = arith.constant 0 : i32
    %c0_i32_1 = arith.constant 0 : i32
    return %c0_i32, %c0_i32_0 : i32, i32
  }
  func.func @transform_2(%arg0: i32) -> (i32, i32) {
    %c0_i32 = arith.constant 0 : i32
    %c0_i32_0 = arith.constant 0 : i32
    %c0_i32_1 = arith.constant 0 : i32
    return %c0_i32, %c0_i32_0 : i32, i32
  }
  func.func @transform_3(%arg0: i32) -> (i32, i32) {
    %c0_i32 = arith.constant 0 : i32
    %c0_i32_0 = arith.constant 0 : i32
    %c0_i32_1 = arith.constant 0 : i32
    return %c0_i32, %c0_i32_0 : i32, i32
  }
  func.func @transform_4(%arg0: i32) -> (i32, i32) {
    %c0_i32 = arith.constant 0 : i32
    %c0_i32_0 = arith.constant 0 : i32
    %c0_i32_1 = arith.constant 0 : i32
    return %c0_i32, %c0_i32_0 : i32, i32
  }
  func.func @transform_5(%arg0: i32) -> (i32, i32) {
    %c0_i32 = arith.constant 0 : i32
    %c0_i32_0 = arith.constant 0 : i32
    %c0_i32_1 = arith.constant 0 : i32
    return %c0_i32, %c0_i32_0 : i32, i32
  }
  func.func @transform_6(%arg0: i32) -> (i32, i32) {
    %c0_i32 = arith.constant 0 : i32
    %c0_i32_0 = arith.constant 0 : i32
    %c0_i32_1 = arith.constant 0 : i32
    return %c0_i32, %c0_i32_0 : i32, i32
  }
  func.func @transform_7(%arg0: i32) -> (i32, i32) {
    %c0_i32 = arith.constant 0 : i32
    %c0_i32_0 = arith.constant 0 : i32
    %c0_i32_1 = arith.constant 0 : i32
    return %c0_i32, %c0_i32_0 : i32, i32
  }
  func.func @transform_8(%arg0: i32) -> (i32, i32) {
    %c0_i32 = arith.constant 0 : i32
    %c0_i32_0 = arith.constant 0 : i32
    %c0_i32_1 = arith.constant 0 : i32
    return %c0_i32, %c0_i32_0 : i32, i32
  }
  func.func @transform_9(%arg0: i32) -> (i32, i32) {
    %c0_i32 = arith.constant 0 : i32
    %c0_i32_0 = arith.constant 0 : i32
    %c0_i32_1 = arith.constant 0 : i32
    return %c0_i32, %c0_i32_0 : i32, i32
  }
  func.func @transform_10(%arg0: i32) -> (i32, i32) {
    %c0_i32 = arith.constant 0 : i32
    %c0_i32_0 = arith.constant 0 : i32
    %c0_i32_1 = arith.constant 0 : i32
    return %c0_i32, %c0_i32_0 : i32, i32
  }
  func.func @transform_11(%arg0: i32) -> (i32, i32) {
    %c0_i32 = arith.constant 0 : i32
    %c0_i32_0 = arith.constant 0 : i32
    %c0_i32_1 = arith.constant 0 : i32
    return %c0_i32, %c0_i32_0 : i32, i32
  }
  func.func @transform_12(%arg0: i32) -> (i32, i32) {
    %c0_i32 = arith.constant 0 : i32
    %c0_i32_0 = arith.constant 0 : i32
    %c0_i32_1 = arith.constant 0 : i32
    return %c0_i32, %c0_i32_0 : i32, i32
  }
  func.func @transform_13(%arg0: i32) -> (i32, i32) {
    %c0_i32 = arith.constant 0 : i32
    %c0_i32_0 = arith.constant 0 : i32
    %c0_i32_1 = arith.constant 0 : i32
    return %c0_i32, %c0_i32_0 : i32, i32
  }
  func.func @transform_14(%arg0: i32) -> (i32, i32) {
    %c0_i32 = arith.constant 0 : i32
    %c0_i32_0 = arith.constant 0 : i32
    %c0_i32_1 = arith.constant 0 : i32
    return %c0_i32, %c0_i32_0 : i32, i32
  }
  func.func @transform_15(%arg0: i32) -> (i32, i32) {
    %c0_i32 = arith.constant 0 : i32
    %c0_i32_0 = arith.constant 0 : i32
    %c0_i32_1 = arith.constant 0 : i32
    return %c0_i32, %c0_i32_0 : i32, i32
  }
  func.func @transform_16(%arg0: i32) -> (i32, i32) {
    %c0_i32 = arith.constant 0 : i32
    %c0_i32_0 = arith.constant 0 : i32
    %c0_i32_1 = arith.constant 0 : i32
    return %c0_i32, %c0_i32_0 : i32, i32
  }
  func.func @transform_17(%arg0: i32) -> (i32, i32) {
    %c0_i32 = arith.constant 0 : i32
    %c0_i32_0 = arith.constant 0 : i32
    %c0_i32_1 = arith.constant 0 : i32
    return %c0_i32, %c0_i32_0 : i32, i32
  }
  func.func @transform_18(%arg0: i32) -> (i32, i32) {
    %c0_i32 = arith.constant 0 : i32
    %c0_i32_0 = arith.constant 0 : i32
    %c0_i32_1 = arith.constant 0 : i32
    return %c0_i32, %c0_i32_0 : i32, i32
  }
  func.func @transform_19(%arg0: i32) -> (i32, i32) {
    %c0_i32 = arith.constant 0 : i32
    %c0_i32_0 = arith.constant 0 : i32
    %c0_i32_1 = arith.constant 0 : i32
    return %c0_i32, %c0_i32_0 : i32, i32
  }
  func.func @transform_20(%arg0: i32) -> (i32, i32) {
    %c0_i32 = arith.constant 0 : i32
    %c0_i32_0 = arith.constant 0 : i32
    %c0_i32_1 = arith.constant 0 : i32
    return %c0_i32, %c0_i32_0 : i32, i32
  }
  func.func @transform_21(%arg0: i32) -> (i32, i32) {
    %c0_i32 = arith.constant 0 : i32
    %c0_i32_0 = arith.constant 0 : i32
    %c0_i32_1 = arith.constant 0 : i32
    return %c0_i32, %c0_i32_0 : i32, i32
  }
  func.func @transform_22(%arg0: i32) -> (i32, i32) {
    %c0_i32 = arith.constant 0 : i32
    %c0_i32_0 = arith.constant 0 : i32
    %c0_i32_1 = arith.constant 0 : i32
    return %c0_i32, %c0_i32_0 : i32, i32
  }
  func.func @transform_23(%arg0: i32) -> (i32, i32) {
    %c0_i32 = arith.constant 0 : i32
    %c0_i32_0 = arith.constant 0 : i32
    %c0_i32_1 = arith.constant 0 : i32
    return %c0_i32, %c0_i32_0 : i32, i32
  }
  func.func @transform_24(%arg0: i32) -> (i32, i32, i32) {
    %c0_i32 = arith.constant 0 : i32
    %c0_i32_0 = arith.constant 0 : i32
    %c0_i32_1 = arith.constant 0 : i32
    return %arg0, %c0_i32, %c0_i32_0 : i32, i32, i32
  }
}

</mosaic_0001>

<bundles_post_ra>
// kernel: uni_modal_er_forward.1
= control target key start
LH: loop header
LB: loop body
LE: loop exit
PB: predicated region body
PF: predicated region fallthrough
CT: control target
= control target key end

     0   :  { %s11553_s0 = inlined_call_operand.vmem [shape: bf16[2,2048,128], index: 0, kind: input, shape index: {}]   ;;  %s11554_s1 = inlined_call_operand.vmem [shape: f32[8,2048], index: 1, kind: input, shape index: {}]   ;;  %s11555_s2 = inlined_call_operand.vmem [shape: bf16[128,128], index: 2, kind: input, shape index: {}]   ;;  %s11556_s3 = inlined_call_operand.vmem [shape: f32[1,128], index: 3, kind: input, shape index: {}]   ;;  %s11557_s4 = inlined_call_operand.vmem [shape: bf16[128,256], index: 4, kind: input, shape index: {}]   ;;  %s11558_s5 = inlined_call_operand.vmem [shape: f32[1,256], index: 5, kind: input, shape index: {}]   ;;  %s11559_s6 = inlined_call_operand.vmem [shape: bf16[256,512], index: 6, kind: input, shape index: {}]   ;;  %s11560_s7 = inlined_call_operand.vmem [shape: bf16[256,512], index: 7, kind: input, shape index: {}]   ;;  %s11561_s8 = inlined_call_operand.vmem [shape: bf16[256,512], index: 8, kind: input, shape index: {}]   ;;  %s11562_s9 = inlined_call_operand.vmem [shape: f32[1,512], index: 9, kind: input, shape index: {}]   ;;  %s11563_s10 = inlined_call_operand.vmem [shape: f32[1,512], index: 10, kind: input, shape index: {}]   ;;  %s11564_s11 = inlined_call_operand.vmem [shape: f32[1,512], index: 11, kind: input, shape index: {}]   ;;  %s11565_s12 = inlined_call_operand.vmem [shape: bf16[512,256], index: 12, kind: input, shape index: {}]   ;;  %s11566_s13 = inlined_call_operand.vmem [shape: f32[1,256], index: 13, kind: input, shape index: {}]   ;;  %s11567_s14 = inlined_call_operand.vmem [shape: f32[1,256], index: 14, kind: input, shape index: {}]   ;;  %s11568_s15 = inlined_call_operand.vmem [shape: f32[1,256], index: 15, kind: input, shape index: {}]   ;;  %s11569_s16 = inlined_call_operand.vmem [shape: bf16[256,256], index: 16, kind: input, shape index: {}]   ;;  %s11570_s17 = inlined_call_operand.vmem [shape: f32[1,256], index: 17, kind: input, shape index: {}]   ;;  %s11571_s18 = inlined_call_operand.vmem [shape: bf16[256,256], index: 18, kind: input, shape index: {}]   ;;  %s11572_s19 = inlined_call_operand.vmem [shape: f32[1,256], index: 19, kind: input, shape index: {}]   ;;  %s11573_s20 = inlined_call_operand.vmem [shape: f32[1,256], index: 20, kind: input, shape index: {}]   ;;  %s11574_s21 = inlined_call_operand.vmem [shape: f32[1,256], index: 21, kind: input, shape index: {}]   ;;  %s11575_s22 = inlined_call_operand.vmem [shape: bf16[256,128], index: 22, kind: input, shape index: {}]   ;;  %s11576_s23 = inlined_call_operand.vmem [shape: f32[1,128], index: 23, kind: input, shape index: {}]   ;;  %s11577_s24 = inlined_call_operand.hbm [shape: f32[2,1,128], index: 24, kind: output, shape index: {}]  }
   0x1   :  { %11598 = sst [smem:[#allocation11_spill]] %s11553_s0 }
   0x2   :  { %11599 = sst [smem:[#allocation12_spill]] %s11554_s1 }
   0x3   :  { %11600 = sst [smem:[#allocation13_spill]] %s11555_s2 }
   0x4   :  { %11601 = sst [smem:[#allocation14_spill]] %s11556_s3 }
   0x5   :  { %11602 = sst [smem:[#allocation15_spill]] %s11557_s4 }
   0x6   :  { %11603 = sst [smem:[#allocation16_spill]] %s11558_s5 }
   0x7   :  { %11604 = sst [smem:[#allocation17_spill]] %s11559_s6 }
   0x8   :  { %11605 = sst [smem:[#allocation18_spill]] %s11560_s7 }
   0x9   :  { %11606 = sst [smem:[#allocation19_spill]] %s11561_s8 }
   0xa   :  { %11607 = sst [smem:[#allocation20_spill]] %s11577_s24 }
   0xb   :  { %29 = vsyncpa [#allocation3], 0 }
   0xc   :  { %31 = vsyncpa [#allocation3 + $0x1], 0  ;;  %s9522_s5 = smov 0   ;;  %s9524_s26 = smov 0  }
   0xd   :  { %s9526_s27 = smov 0   ;;  %s9528_s28 = smov 0  }
   0xe LB: > { %11608 = sst [smem:[#allocation5_spill]] %s9379_s5  ;;  %s9543_s6 = sadd.s32 4294967295, %s9391_s28   ;;  %s9391_s28 = sphi %s9528_s28, %s11631_s28   ;;  %s9387_s27 = sphi %s9526_s27, %s11636_s27   ;;  %s9383_s26 = sphi %s9524_s26, %s11635_s26   ;;  %s9379_s5 = sphi %s9522_s5, %s11634_s5  }
   0xf   : > { %11609 = sst [smem:[#allocation6_spill]] %s9387_s27  ;;  %s7072_s2 = sadd.s32 4294967294, %s9391_s28  }
  0x10   : > { %11610 = sst [smem:[#allocation7_spill]] %s9391_s28  ;;  %s9547_s29 = sadd.s32 1, %s9391_s28  }
  0x11   : > { %11611 = sst [smem:[#allocation8_spill]] %s9547_s29  ;;  %s553_s0 = sadd.s32 1, %s9387_s27 }
  0x12   : > { %s550_s7 = ssub.s32 %s9391_s28, %s9547_s29  ;;  %p563_p0 = scmp.ne.s32.totalorder %s9387_s27, %s9383_s26 }
  0x13   : > { %p551_p1 = scmp.eq.s32.totalorder %s550_s7, 0  ;;  %p564_p2 = scmp.eq.s32.totalorder %s9543_s6, 1 }
  0x14   : > { %p569_p3 = scmp.ne.s32.totalorder %s9383_s26, %s9379_s5  ;;  %p570_p4 = scmp.eq.s32.totalorder %s7072_s2, 1 }
  0x15   : > { %s9558_s30 = scalar_select %p551_p1, %s9387_s27, %s553_s0  }
  0x16   : > { %p9560_p5 = por %p564_p2, %p563_p0  ;;  %p9564_p6 = por %p570_p4, %p569_p3 }
  0x17   : > { %11612 = sst [smem:[#allocation9_spill]] %s9558_s30  ;;  %p7075_p7 = scmp.ge.s32.totalorder %s9391_s28, 1 }
  0x18   : > { %s11614_s25 = scalar_select %p9564_p6, 1, 0 }
  0x19   : > { %p665_p8 = scmp.lt.s32.totalorder %s9391_s28, 3 }
  0x1a   : > { %11615 = sst [smem:[#allocation10_spill]] %s11614_s25 }
  0x1b   : > { %p666_p9 = pnand %p7075_p7, %p665_p8 }
  0x1c   : > { %s11616_s1 = sld [smem:[#allocation13_spill]] (!%p666_p9)  ;;  %p730_p10 = scmp.lt.s32.totalorder (!%p666_p9), %s9543_s6, 1  ;;  %vm9395_vm0 = vmmov (!%p666_p9), 0   ;;  %vm5397_vm1 = vcmask (!%p666_p9), 1043456   ;;  %vm5381_vm2 = vcmask (!%p666_p9), 64512  }
  0x1d   : > { %669 = sbr.rel (%p666_p9) target bundleno = 5487 (0x156f), region = 116  ;;  %s11617_s8 = sld [smem:[#allocation11_spill]] (!%p666_p9) }
  0x1e   : > { %s11619_s5 = sld [smem:[#allocation14_spill]] (!%p666_p9)  ;;  %s11621_s30 = sld [smem:[#allocation15_spill]] (!%p666_p9) }
  0x1f   : > { %s11622_s24 = sld [smem:[#allocation17_spill]] (!%p666_p9)  ;;  %s11623_s2 = sld [smem:[#allocation18_spill]] (!%p666_p9) }
  0x20   : > { %s11624_s28 = sld [smem:[#allocation19_spill]] (!%p666_p9)  ;;  %s11626_s0 = sld [smem:[#allocation16_spill]] (!%p666_p9) }
  0x21   : > { %s728_s27 = sand.u32 (!%p666_p9), 1, %s9383_s26  }
  0x22   : > { %v8647_v0 = vld [vmem:[%s11616_s1] sm:$0xff] (!%p666_p9)   ;;  %v8648_v1 = vld [vmem:[%s11616_s1 + $0x8] sm:$0xff] (!%p666_p9)   ;;  %v8649_v2 = vld [vmem:[%s11616_s1 + $0x10] sm:$0xff] (!%p666_p9)  }
  0x23   : > { %8029 = vmatprep.subr.bf16.mxu0 (!%p666_p9), %v8647_v0  ;;  %v8650_v3 = vld [vmem:[%s11616_s1 + $0x18] sm:$0xff] (!%p666_p9)   ;;  %v8651_v5 = vld [vmem:[%s11616_s1 + $0x20] sm:$0xff] (!%p666_p9)   ;;  %v8652_v6 = vld [vmem:[%s11616_s1 + $0x28] sm:$0xff] (!%p666_p9)  }
  0x24   : > { %s731_s7 = scalar_select %p730_p10, %s9543_s6, 1  ;;  %8030 = vmatpush3.bf16.msra.mxu0 %v8647_v0  ;;  %v8653_v7 = vld [vmem:[%s11616_s1 + $0x30] sm:$0xff]   ;;  %v8654_v8 = vld [vmem:[%s11616_s1 + $0x38] sm:$0xff]   ;;  %v9662_v0 = vld [vmem:[%s11619_s5] ss:$0 sm:$0xff] }
  0x25   : > { %8031 = vmatprep.subr.bf16.mxu0 %v8648_v1 }
  0x26   : > { %s7574_s29 = sshll.u32 %s731_s7, 10  ;;  %s11627_s7 = sld [smem:[#allocation20_spill]] }
  0x27   : > { %s9584_s4 = scalar_lea.vmem %s11617_s8, %s7574_s29  ;;  %s11618_s8 = sld [smem:[#allocation12_spill]] }
  0x28   : > { %8032 = vmatpush3.bf16.msra.mxu0 %v8648_v1  ;;  %v8655_v4 = vld [vmem:[%s9584_s4] sm:$0xff]   ;;  %v8656_v9 = vld [vmem:[%s9584_s4 + $0x8] sm:$0xff]   ;;  %v8657_v10 = vld [vmem:[%s9584_s4 + $0x10] sm:$0xff]   ;;  %s11620_s29 = smov %s11619_s5  ;;  %s7005_s5 = scalar_lea.sflag [#allocation3], %s728_s27 }
  0x29   : > { %8033 = vmatprep.subr.bf16.mxu0 %v8649_v2  ;;  %8045 = vmatprep.mubr.bf16.mxu0 %v8655_v4  ;;  %v8658_v11 = vld [vmem:[%s9584_s4 + $0x18] sm:$0xff]   ;;  %v8659_v12 = vld [vmem:[%s9584_s4 + $0x20] sm:$0xff]   ;;  %v8660_v13 = vld [vmem:[%s9584_s4 + $0x28] sm:$0xff]  }
  0x2a   : > { %v8661_v14 = vld [vmem:[%s9584_s4 + $0x30] sm:$0xff]   ;;  %v8662_v15 = vld [vmem:[%s9584_s4 + $0x38] sm:$0xff]   ;;  %v8663_v16 = vld [vmem:[%s9584_s4 + $0x40] sm:$0xff]  }
  0x2b   : > { %v8664_v17 = vld [vmem:[%s9584_s4 + $0x48] sm:$0xff]   ;;  %v8665_v18 = vld [vmem:[%s9584_s4 + $0x50] sm:$0xff]   ;;  %v8666_v19 = vld [vmem:[%s9584_s4 + $0x58] sm:$0xff]  }
  0x2c   : > { %8034 = vmatpush3.bf16.msra.mxu0 %v8649_v2  ;;  %v8667_v20 = vld [vmem:[%s9584_s4 + $0x60] sm:$0xff]   ;;  %v8668_v21 = vld [vmem:[%s9584_s4 + $0x68] sm:$0xff]   ;;  %v8669_v22 = vld [vmem:[%s9584_s4 + $0x70] sm:$0xff]  }
  0x2d   : > { %8035 = vmatprep.subr.bf16.mxu0 %v8650_v3  ;;  %v8670_v23 = vld [vmem:[%s9584_s4 + $0x78] sm:$0xff]   ;;  %v8671_v24 = vld [vmem:[%s9584_s4 + $0x80] sm:$0xff]   ;;  %v8672_v25 = vld [vmem:[%s9584_s4 + $0x88] sm:$0xff]  }
  0x2e   : > { %v8673_v26 = vld [vmem:[%s9584_s4 + $0x90] sm:$0xff]   ;;  %v8674_v27 = vld [vmem:[%s9584_s4 + $0x98] sm:$0xff]   ;;  %v8675_v28 = vld [vmem:[%s9584_s4 + $0xa0] sm:$0xff]  }
  0x2f   : > { %v8676_v29 = vld [vmem:[%s9584_s4 + $0xa8] sm:$0xff]   ;;  %v8677_v30 = vld [vmem:[%s9584_s4 + $0xb0] sm:$0xff]   ;;  %v8678_v31 = vld [vmem:[%s9584_s4 + $0xb8] sm:$0xff]  }
  0x30   : > { %8036 = vmatpush3.bf16.msra.mxu0 %v8650_v3  ;;  %v8679_v32 = vld [vmem:[%s9584_s4 + $0xc0] sm:$0xff]   ;;  %v8680_v33 = vld [vmem:[%s9584_s4 + $0xc8] sm:$0xff]   ;;  %v8681_v34 = vld [vmem:[%s9584_s4 + $0xd0] sm:$0xff]  }
  0x31   : > { %8037 = vmatprep.subr.bf16.mxu0 %v8651_v5  ;;  %v8682_v35 = vld [vmem:[%s9584_s4 + $0xd8] sm:$0xff]   ;;  %v8683_v36 = vld [vmem:[%s9584_s4 + $0xe0] sm:$0xff]   ;;  %v8684_v37 = vld [vmem:[%s9584_s4 + $0xe8] sm:$0xff]  }
  0x32   : > { %v8685_v38 = vld [vmem:[%s9584_s4 + $0xf0] sm:$0xff]   ;;  %v8686_v39 = vld [vmem:[%s9584_s4 + $0xf8] sm:$0xff]   ;;  %v8687_v40 = vld [vmem:[%s9584_s4 + $0x100] sm:$0xff]  }
  0x33   : > { %v8688_v41 = vld [vmem:[%s9584_s4 + $0x108] sm:$0xff]   ;;  %v8689_v42 = vld [vmem:[%s9584_s4 + $0x110] sm:$0xff]   ;;  %v8690_v43 = vld [vmem:[%s9584_s4 + $0x118] sm:$0xff]  }
  0x34   : > { %8038 = vmatpush3.bf16.msra.mxu0 %v8651_v5  ;;  %v8691_v44 = vld [vmem:[%s9584_s4 + $0x120] sm:$0xff]   ;;  %v8692_v45 = vld [vmem:[%s9584_s4 + $0x128] sm:$0xff]   ;;  %v8693_v46 = vld [vmem:[%s9584_s4 + $0x130] sm:$0xff]  }
  0x35   : > { %8039 = vmatprep.subr.bf16.mxu0 %v8652_v6  ;;  %v8694_v47 = vld [vmem:[%s9584_s4 + $0x138] sm:$0xff]   ;;  %v8695_v48 = vld [vmem:[%s9584_s4 + $0x140] sm:$0xff]   ;;  %v8696_v49 = vld [vmem:[%s9584_s4 + $0x148] sm:$0xff]  }
  0x36   : > { %v8697_v50 = vld [vmem:[%s9584_s4 + $0x150] sm:$0xff]   ;;  %v8698_v51 = vld [vmem:[%s9584_s4 + $0x158] sm:$0xff]   ;;  %v8699_v52 = vld [vmem:[%s9584_s4 + $0x160] sm:$0xff]  }
  0x37   : > { %v8700_v53 = vld [vmem:[%s9584_s4 + $0x168] sm:$0xff]   ;;  %v8701_v54 = vld [vmem:[%s9584_s4 + $0x170] sm:$0xff]   ;;  %v8702_v55 = vld [vmem:[%s9584_s4 + $0x178] sm:$0xff]  }
  0x38   : > { %8040 = vmatpush3.bf16.msra.mxu0 %v8652_v6  ;;  %v8703_v56 = vld [vmem:[%s9584_s4 + $0x180] sm:$0xff]   ;;  %v8704_v57 = vld [vmem:[%s9584_s4 + $0x188] sm:$0xff]   ;;  %v8705_v59 = vld [vmem:[%s9584_s4 + $0x190] sm:$0xff]  }
  0x39   : > { %8041 = vmatprep.subr.bf16.mxu0 %v8653_v7  ;;  %v3145_v58 = vld [vmem:[%s11618_s8 + $0x8] sm:$0xff]  ;;  %v8706_v60 = vld [vmem:[%s9584_s4 + $0x198] sm:$0xff]   ;;  %v8707_v61 = vld [vmem:[%s9584_s4 + $0x1a0] sm:$0xff]  }
  0x3a   : > { %3224 = vmatprep.mubr.f32.mxu1 %v3145_v58  ;;  %v8708_v62 = vld [vmem:[%s9584_s4 + $0x1a8] sm:$0xff]   ;;  %v8709_v63 = vld [vmem:[%s9584_s4 + $0x1b0] sm:$0xff]   ;;  %v8710_v4 = vld [vmem:[%s9584_s4 + $0x1b8] sm:$0xff]  }
  0x3c   : > { %8042 = vmatpush3.bf16.msra.mxu0 %v8653_v7  ;;  %v8711_v7 = vld [vmem:[%s9584_s4 + $0x1c0] sm:$0xff]  }
  0x3d   : > { %8043 = vmatprep.subr.bf16.mxu0 %v8654_v8 }
  0x40   : > { %8044 = vmatpush3.bf16.msra.mxu0 %v8654_v8 }
  0x43   : > { %8046 = vmatmul.mubr.bf16.vlgmr.msra.gmra.mrb[0].mxu0 %v8656_v9 }
  0x44   : > { %8049 = vmatprep.mubr.bf16.mxu0 %v8657_v10 }
  0x4b   : > { %8050 = vmatmul.mubr.bf16.gmra.mrb[4].mxu0 %v8658_v11 }
  0x4c   : > { %8053 = vmatprep.mubr.bf16.mxu0 %v8659_v12 }
  0x53   : > { %8054 = vmatmul.mubr.bf16.gmra.mrb[8].mxu0 %v8660_v13 }
  0x54   : > { %8057 = vmatprep.mubr.bf16.mxu0 %v8661_v14 }
  0x5b   : > { %8058 = vmatmul.mubr.bf16.gmra.mrb[12].mxu0 %v8662_v15 }
  0x5c   : > { %8061 = vmatprep.mubr.bf16.mxu0 %v8663_v16 }
  0x63   : > { %8062 = vmatmul.mubr.bf16.gmra.mrb[16].mxu0 %v8664_v17 }
  0x64   : > { %8065 = vmatprep.mubr.bf16.mxu0 %v8665_v18 }
  0x6b   : > { %8066 = vmatmul.mubr.bf16.gmra.mrb[20].mxu0 %v8666_v19 }
  0x6c   : > { %8069 = vmatprep.mubr.bf16.mxu0 %v8667_v20  ;;  %v8712_v20 = vld [vmem:[%s9584_s4 + $0x1c8] sm:$0xff]  }
  0x73   : > { %8070 = vmatmul.mubr.bf16.gmra.mrb[24].mxu0 %v8668_v21 }
  0x74   : > { %8073 = vmatprep.mubr.bf16.mxu0 %v8669_v22 }
  0x7b   : > { %8074 = vmatmul.mubr.bf16.gmra.mrb[28].mxu0 %v8670_v23  ;;  %v8713_v23 = vld [vmem:[%s9584_s4 + $0x1d0] sm:$0xff]  }
  0x7c   : > { %8077 = vmatprep.mubr.bf16.mxu0 %v8671_v24 }
  0x83   : > { %8078 = vmatmul.mubr.bf16.gmra.mrb[32].mxu0 %v8672_v25 }
  0x84   : > { %8081 = vmatprep.mubr.bf16.mxu0 %v8673_v26 }
  0x8b   : > { %8082 = vmatmul.mubr.bf16.gmra.mrb[36].mxu0 %v8674_v27 }
  0x8c   : > { %8085 = vmatprep.mubr.bf16.mxu0 %v8675_v28 }
  0x93   : > { %8086 = vmatmul.mubr.bf16.gmra.mrb[40].mxu0 %v8676_v29 }
  0x94   : > { %8089 = vmatprep.mubr.bf16.mxu0 %v8677_v30 }
  0x9b   : > { %8090 = vmatmul.mubr.bf16.gmra.mrb[44].mxu0 %v8678_v31 }
  0x9c   : > { %8093 = vmatprep.mubr.bf16.mxu0 %v8679_v32 }
  0xa3   : > { %8094 = vmatmul.mubr.bf16.gmra.mrb[48].mxu0 %v8680_v33 }
  0xa4   : > { %8097 = vmatprep.mubr.bf16.mxu0 %v8681_v34 }
  0xab   : > { %8098 = vmatmul.mubr.bf16.gmra.mrb[52].mxu0 %v8682_v35 }
  0xac   : > { %8101 = vmatprep.mubr.bf16.mxu0 %v8683_v36  ;;  %v8714_v36 = vld [vmem:[%s9584_s4 + $0x1d8] sm:$0xff]  }
  0xb3   : > { %8102 = vmatmul.mubr.bf16.gmra.mrb[56].mxu0 %v8684_v37 }
  0xb4   : > { %8105 = vmatprep.mubr.bf16.mxu0 %v8685_v38 }
  0xbb   : > { %8106 = vmatmul.mubr.bf16.gmra.mrb[60].mxu0 %v8686_v39  ;;  %v8715_v39 = vld [vmem:[%s9584_s4 + $0x1e0] sm:$0xff]  }
  0xbc   : > { %8109 = vmatprep.mubr.bf16.mxu0 %v8687_v40 }
  0xc3   : > { %8110 = vmatmul.mubr.bf16.gmra.mrb[64].mxu0 %v8688_v41 }
  0xc4   : > { %8113 = vmatprep.mubr.bf16.mxu0 %v8689_v42 }
  0xcb   : > { %8114 = vmatmul.mubr.bf16.gmra.mrb[68].mxu0 %v8690_v43 }
  0xcc   : > { %8117 = vmatprep.mubr.bf16.mxu0 %v8691_v44 }
  0xd3   : > { %8118 = vmatmul.mubr.bf16.gmra.mrb[72].mxu0 %v8692_v45 }
  0xd4   : > { %8121 = vmatprep.mubr.bf16.mxu0 %v8693_v46 }
  0xdb   : > { %8122 = vmatmul.mubr.bf16.gmra.mrb[76].mxu0 %v8694_v47 }
  0xdc   : > { %8125 = vmatprep.mubr.bf16.mxu0 %v8695_v48 }
  0xe3   : > { %8126 = vmatmul.mubr.bf16.gmra.mrb[80].mxu0 %v8696_v49 }
  0xe4   : > { %8129 = vmatprep.mubr.bf16.mxu0 %v8697_v50 }
  0xeb   : > { %8130 = vmatmul.mubr.bf16.gmra.mrb[84].mxu0 %v8698_v51 }
  0xec   : > { %8133 = vmatprep.mubr.bf16.mxu0 %v8699_v52  ;;  %v8716_v52 = vld [vmem:[%s9584_s4 + $0x1e8] sm:$0xff]  }
  0xf3   : > { %8134 = vmatmul.mubr.bf16.gmra.mrb[88].mxu0 %v8700_v53 }
  0xf4   : > { %8137 = vmatprep.mubr.bf16.mxu0 %v8701_v54 }
  0xfb   : > { %8138 = vmatmul.mubr.bf16.gmra.mrb[92].mxu0 %v8702_v55  ;;  %v8717_v55 = vld [vmem:[%s9584_s4 + $0x1f0] sm:$0xff]  }
  0xfc   : > { %8141 = vmatprep.mubr.bf16.mxu0 %v8703_v56 }
 0x103   : > { %8142 = vmatmul.mubr.bf16.gmra.mrb[96].mxu0 %v8704_v57 }
 0x104   : > { %8145 = vmatprep.mubr.bf16.mxu0 %v8705_v59 }
 0x10b   : > { %8146 = vmatmul.mubr.bf16.gmra.mrb[100].mxu0 %v8706_v60 }
 0x10c   : > { %8149 = vmatprep.mubr.bf16.mxu0 %v8707_v61 }
 0x113   : > { %8150 = vmatmul.mubr.bf16.gmra.mrb[104].mxu0 %v8708_v62 }
 0x114   : > { %8153 = vmatprep.mubr.bf16.mxu0 %v8709_v63 }
 0x116   : > { %v8047_v1 = vpop.f32.mrb[0].mxu0 }
 0x117   : > { %v1874_v2 = vadd.f32 %v8047_v1, %v9662_v0  ;;  %v1865_v3 = vpop.f32.mrb[1].mxu0 }
 0x118   : > { %v1866_v5 = vadd.f32 %v9662_v0, %v1865_v3  ;;  %v8048_v6 = vpop.f32.mrb[2].mxu0 }
 0x119   : > { %v1877_v8 = vadd.f32 %v8048_v6, %v9662_v0  ;;  %v1868_v9 = vpop.f32.mrb[3].mxu0  ;;  %v2890_v11 = vmax.f32 %v1874_v2, 0.0 }
 0x11a   : > { %v1869_v10 = vadd.f32 %v9662_v0, %v1868_v9  ;;  %v2888_v13 = vmax.f32 %v1866_v5, 0.0  ;;  %v8718_v5 = vld [vmem:[%s9584_s4 + $0x1f8] sm:$0xff]  }
 0x11b   : > { %v2891_v12 = vmax.f32 %v1877_v8, 0.0  ;;  %8154 = vmatmul.mubr.bf16.gmra.mrb[108].mxu0 %v8710_v4  ;;  %v8719_v8 = vld [vmem:[%s9584_s4 + $0x200] sm:$0xff]  }
 0x11c   : > { %8157 = vmatprep.mubr.bf16.mxu0 %v8711_v7  ;;  %v2889_v14 = vmax.f32 %v1869_v10, 0.0 }
 0x11d   : > { %v9670_v15 = vpack.c.bf16 %v2891_v12, %v2890_v11 }
 0x11e   : > { %v8051_v16 = vpop.f32.mrb[4].mxu0  ;;  %v9672_v17 = vpack.c.bf16 %v2889_v14, %v2888_v13 }
 0x11f   : > { %v1890_v18 = vadd.f32 %v8051_v16, %v9662_v0  ;;  %v1881_v19 = vpop.f32.mrb[5].mxu0 }
 0x120   : > { %v1882_v21 = vadd.f32 %v9662_v0, %v1881_v19  ;;  %v8052_v22 = vpop.f32.mrb[6].mxu0 }
 0x121   : > { %v1893_v24 = vadd.f32 %v8052_v22, %v9662_v0  ;;  %v1884_v25 = vpop.f32.mrb[7].mxu0  ;;  %v2894_v27 = vmax.f32 %v1890_v18, 0.0 }
 0x122   : > { %v1885_v26 = vadd.f32 %v9662_v0, %v1884_v25  ;;  %v2892_v29 = vmax.f32 %v1882_v21, 0.0 }
 0x123   : > { %v2895_v28 = vmax.f32 %v1893_v24, 0.0  ;;  %8158 = vmatmul.mubr.bf16.gmra.mrb[112].mxu0 %v8712_v20 }
 0x124   : > { %v2893_v30 = vmax.f32 %v1885_v26, 0.0  ;;  %8161 = vmatprep.mubr.bf16.mxu0 %v8713_v23  ;;  %v8720_v23 = vld [vmem:[%s9584_s4 + $0x208] sm:$0xff]   ;;  %v8721_v26 = vld [vmem:[%s9584_s4 + $0x210] sm:$0xff]  }
 0x125   : > { %v9680_v31 = vpack.c.bf16 %v2895_v28, %v2894_v27 }
 0x126   : > { %v8055_v32 = vpop.f32.mrb[8].mxu0  ;;  %v9682_v33 = vpack.c.bf16 %v2893_v30, %v2892_v29 }
 0x127   : > { %v1906_v34 = vadd.f32 %v8055_v32, %v9662_v0  ;;  %v1897_v35 = vpop.f32.mrb[9].mxu0 }
 0x128   : > { %v1898_v37 = vadd.f32 %v9662_v0, %v1897_v35  ;;  %v8056_v38 = vpop.f32.mrb[10].mxu0 }
 0x129   : > { %v1909_v40 = vadd.f32 %v8056_v38, %v9662_v0  ;;  %v1900_v41 = vpop.f32.mrb[11].mxu0  ;;  %v2898_v43 = vmax.f32 %v1906_v34, 0.0 }
 0x12a   : > { %v1901_v42 = vadd.f32 %v9662_v0, %v1900_v41  ;;  %v2896_v45 = vmax.f32 %v1898_v37, 0.0  ;;  %v8722_v41 = vld [vmem:[%s9584_s4 + $0x218] sm:$0xff]  }
 0x12b   : > { %v2899_v44 = vmax.f32 %v1909_v40, 0.0  ;;  %8162 = vmatmul.mubr.bf16.gmra.mrb[116].mxu0 %v8714_v36 }
 0x12c   : > { %v2897_v46 = vmax.f32 %v1901_v42, 0.0  ;;  %8165 = vmatprep.mubr.bf16.mxu0 %v8715_v39 }
 0x12d   : > { %v9690_v47 = vpack.c.bf16 %v2899_v44, %v2898_v43  ;;  %v8723_v43 = vld [vmem:[%s9584_s4 + $0x220] sm:$0xff]  }
 0x12e   : > { %v8059_v48 = vpop.f32.mrb[12].mxu0  ;;  %v9692_v49 = vpack.c.bf16 %v2897_v46, %v2896_v45 }
 0x12f   : > { %v1922_v50 = vadd.f32 %v8059_v48, %v9662_v0  ;;  %v1913_v51 = vpop.f32.mrb[13].mxu0 }
 0x130   : > { %v1914_v53 = vadd.f32 %v9662_v0, %v1913_v51  ;;  %v8060_v54 = vpop.f32.mrb[14].mxu0 }
 0x131   : > { %v1925_v56 = vadd.f32 %v8060_v54, %v9662_v0  ;;  %v1916_v57 = vpop.f32.mrb[15].mxu0  ;;  %v2902_v59 = vmax.f32 %v1922_v50, 0.0 }
 0x132   : > { %v1917_v58 = vadd.f32 %v9662_v0, %v1916_v57  ;;  %v2900_v61 = vmax.f32 %v1914_v53, 0.0  ;;  %v8724_v57 = vld [vmem:[%s9584_s4 + $0x228] sm:$0xff]  }
 0x133   : > { %v2903_v60 = vmax.f32 %v1925_v56, 0.0  ;;  %8166 = vmatmul.mubr.bf16.gmra.mrb[120].mxu0 %v8716_v52 }
 0x134   : > { %v2901_v62 = vmax.f32 %v1917_v58, 0.0  ;;  %8169 = vmatprep.mubr.bf16.mxu0 %v8717_v55 }
 0x135   : > { %v9700_v63 = vpack.c.bf16 %v2903_v60, %v2902_v59  ;;  %v8725_v59 = vld [vmem:[%s9584_s4 + $0x230] sm:$0xff]  }
 0x136   : > { %v8063_v1 = vpop.f32.mrb[16].mxu0  ;;  %v9702_v2 = vpack.c.bf16 %v2901_v62, %v2900_v61 }
 0x137   : > { %v1938_v3 = vadd.f32 %v8063_v1, %v9662_v0  ;;  %v1929_v4 = vpop.f32.mrb[17].mxu0 }
 0x138   : > { %v8064_v6 = vpop.f32.mrb[18].mxu0  ;;  %v1930_v7 = vadd.f32 %v9662_v0, %v1929_v4 }
 0x139   : > { %v1941_v9 = vadd.f32 %v8064_v6, %v9662_v0  ;;  %v1932_v10 = vpop.f32.mrb[19].mxu0  ;;  %v2906_v12 = vmax.f32 %v1938_v3, 0.0 }
 0x13a   : > { %v1933_v11 = vadd.f32 %v9662_v0, %v1932_v10  ;;  %v2904_v14 = vmax.f32 %v1930_v7, 0.0  ;;  %v8726_v10 = vld [vmem:[%s9584_s4 + $0x238] sm:$0xff]  }
 0x13b   : > { %v2907_v13 = vmax.f32 %v1941_v9, 0.0  ;;  %8170 = vmatmul.mubr.bf16.gmra.mrb[124].mxu0 %v8718_v5 }
 0x13c   : > { %v2905_v16 = vmax.f32 %v1933_v11, 0.0  ;;  %8173 = vmatprep.mubr.bf16.mxu0 %v8719_v8 }
 0x13d   : > { %v8353_v18 = vpack.c.bf16 %v2907_v13, %v2906_v12  ;;  %v8727_v12 = vld [vmem:[%s9584_s4 + $0x240] sm:$0xff]  }
 0x13e   : > { %v8067_v19 = vpop.f32.mrb[20].mxu0  ;;  %v8349_v20 = vpack.c.bf16 %v2905_v16, %v2904_v14 }
 0x13f   : > { %v1954_v21 = vadd.f32 %v8067_v19, %v9662_v0  ;;  %v1945_v22 = vpop.f32.mrb[21].mxu0 }
 0x140   : > { %v1946_v24 = vadd.f32 %v9662_v0, %v1945_v22  ;;  %v8068_v25 = vpop.f32.mrb[22].mxu0  ;;  %8350 = vmatprep.subr.bf16.mxu1 %v8349_v20  ;;  %v3144_v22 = vld [vmem:[%s11618_s8] sm:$0xff] }
 0x141   : > { %v1957_v27 = vadd.f32 %v8068_v25, %v9662_v0  ;;  %v1948_v28 = vpop.f32.mrb[23].mxu0  ;;  %8352 = vmatpush3.bf16.msra.mxu1 %v9672_v17  ;;  %v2910_v30 = vmax.f32 %v1954_v21, 0.0 }
 0x142   : > { %v1949_v29 = vadd.f32 %v9662_v0, %v1948_v28  ;;  %8354 = vmatprep.subr.bf16.mxu1 %v8353_v18  ;;  %v2908_v34 = vmax.f32 %v1946_v24, 0.0  ;;  %v3147_v24 = vld [vmem:[%s11618_s8 + $0x18] sm:$0xff] }
 0x143   : > { %v2911_v32 = vmax.f32 %v1957_v27, 0.0  ;;  %8174 = vmatmul.mubr.bf16.gmra.mrb[128].mxu0 %v8720_v23  ;;  %v8728_v27 = vld [vmem:[%s9584_s4 + $0x248] sm:$0xff]  }
 0x144   : > { %v2909_v35 = vmax.f32 %v1949_v29, 0.0  ;;  %8177 = vmatprep.mubr.bf16.mxu0 %v8721_v26 }
 0x145   : > { %v8361_v36 = vpack.c.bf16 %v2911_v32, %v2910_v30  ;;  %8356 = vmatpush3.bf16.msra.mxu1 %v9670_v15  ;;  %v8729_v30 = vld [vmem:[%s9584_s4 + $0x250] sm:$0xff]  }
 0x146   : > { %v8357_v37 = vpack.c.bf16 %v2909_v35, %v2908_v34  ;;  %v8071_v38 = vpop.f32.mrb[24].mxu0 }
 0x147   : > { %v1970_v39 = vadd.f32 %v8071_v38, %v9662_v0  ;;  %v1961_v40 = vpop.f32.mrb[25].mxu0 }
 0x148   : > { %v1962_v17 = vadd.f32 %v9662_v0, %v1961_v40  ;;  %v8072_v42 = vpop.f32.mrb[26].mxu0  ;;  %8358 = vmatprep.subr.bf16.mxu1 %v8357_v37 }
 0x149   : > { %v1973_v44 = vadd.f32 %v8072_v42, %v9662_v0  ;;  %v1964_v45 = vpop.f32.mrb[27].mxu0  ;;  %8360 = vmatpush3.bf16.msra.mxu1 %v9682_v33  ;;  %v2914_v15 = vmax.f32 %v1970_v39, 0.0 }
 0x14a   : > { %v1965_v46 = vadd.f32 %v9662_v0, %v1964_v45  ;;  %8362 = vmatprep.subr.bf16.mxu1 %v8361_v36  ;;  %v2912_v50 = vmax.f32 %v1962_v17, 0.0 }
 0x14b   : > { %v2915_v48 = vmax.f32 %v1973_v44, 0.0  ;;  %8178 = vmatmul.mubr.bf16.gmra.mrb[132].mxu0 %v8722_v41 }
 0x14c   : > { %v2913_v51 = vmax.f32 %v1965_v46, 0.0  ;;  %8181 = vmatprep.mubr.bf16.mxu0 %v8723_v43  ;;  %v8730_v43 = vld [vmem:[%s9584_s4 + $0x258] sm:$0xff]   ;;  %v8731_v46 = vld [vmem:[%s9584_s4 + $0x260] sm:$0xff]  }
 0x14d   : > { %v8369_v52 = vpack.c.bf16 %v2915_v48, %v2914_v15  ;;  %8364 = vmatpush3.bf16.msra.mxu1 %v9680_v31 }
 0x14e   : > { %v8365_v53 = vpack.c.bf16 %v2913_v51, %v2912_v50  ;;  %v8075_v54 = vpop.f32.mrb[28].mxu0 }
 0x14f   : > { %v1986_v55 = vadd.f32 %v8075_v54, %v9662_v0  ;;  %v1977_v56 = vpop.f32.mrb[29].mxu0 }
 0x150   : > { %v1978_v33 = vadd.f32 %v9662_v0, %v1977_v56  ;;  %v8076_v58 = vpop.f32.mrb[30].mxu0  ;;  %8366 = vmatprep.subr.bf16.mxu1 %v8365_v53 }
 0x151   : > { %v1989_v60 = vadd.f32 %v8076_v58, %v9662_v0  ;;  %v1980_v61 = vpop.f32.mrb[31].mxu0  ;;  %8368 = vmatpush3.bf16.msra.mxu1 %v9692_v49  ;;  %v2918_v31 = vmax.f32 %v1986_v55, 0.0 }
 0x152   : > { %v1981_v62 = vadd.f32 %v9662_v0, %v1980_v61  ;;  %8370 = vmatprep.subr.bf16.mxu1 %v8369_v52  ;;  %v2916_v3 = vmax.f32 %v1978_v33, 0.0 }
 0x153   : > { %v2919_v1 = vmax.f32 %v1989_v60, 0.0  ;;  %8182 = vmatmul.mubr.bf16.gmra.mrb[136].mxu0 %v8724_v57 }
 0x154   : > { %v2917_v4 = vmax.f32 %v1981_v62, 0.0  ;;  %8185 = vmatprep.mubr.bf16.mxu0 %v8725_v59  ;;  %v8732_v59 = vld [vmem:[%s9584_s4 + $0x268] sm:$0xff]   ;;  %v8733_v62 = vld [vmem:[%s9584_s4 + $0x270] sm:$0xff]  }
 0x155   : > { %v8377_v5 = vpack.c.bf16 %v2919_v1, %v2918_v31  ;;  %8372 = vmatpush3.bf16.msra.mxu1 %v9690_v47 }
 0x156   : > { %v8373_v6 = vpack.c.bf16 %v2917_v4, %v2916_v3  ;;  %v8079_v7 = vpop.f32.mrb[32].mxu0 }
 0x157   : > { %v2002_v8 = vadd.f32 %v8079_v7, %v9662_v0  ;;  %v1993_v9 = vpop.f32.mrb[33].mxu0 }
 0x158   : > { %v1994_v49 = vadd.f32 %v9662_v0, %v1993_v9  ;;  %v8080_v11 = vpop.f32.mrb[34].mxu0  ;;  %8374 = vmatprep.subr.bf16.mxu1 %v8373_v6 }
 0x159   : > { %v2005_v13 = vadd.f32 %v8080_v11, %v9662_v0  ;;  %v1996_v14 = vpop.f32.mrb[35].mxu0  ;;  %8376 = vmatpush3.bf16.msra.mxu1 %v9702_v2  ;;  %v2922_v47 = vmax.f32 %v2002_v8, 0.0 }
 0x15a   : > { %v1997_v16 = vadd.f32 %v9662_v0, %v1996_v14  ;;  %8378 = vmatprep.subr.bf16.mxu1 %v8377_v5  ;;  %v2920_v19 = vmax.f32 %v1994_v49, 0.0 }
 0x15b   : > { %v2923_v18 = vmax.f32 %v2005_v13, 0.0  ;;  %8186 = vmatmul.mubr.bf16.gmra.mrb[140].mxu0 %v8726_v10 }
 0x15c   : > { %v2921_v20 = vmax.f32 %v1997_v16, 0.0  ;;  %8189 = vmatprep.mubr.bf16.mxu0 %v8727_v12  ;;  %v8734_v12 = vld [vmem:[%s9584_s4 + $0x278] sm:$0xff]   ;;  %v8735_v16 = vld [vmem:[%s9584_s4 + $0x280] sm:$0xff]  }
 0x15d   : > { %v9741_v21 = vpack.c.bf16 %v2923_v18, %v2922_v47  ;;  %8380 = vmatpush3.bf16.msra.mxu1 %v9700_v63 }
 0x15e   : > { %v9747_v2 = vpack.c.bf16 %v2921_v20, %v2920_v19  ;;  %v8083_v23 = vpop.f32.mrb[36].mxu0 }
 0x15f   : > { %v2018_v25 = vadd.f32 %v8083_v23, %v9662_v0  ;;  %v2009_v26 = vpop.f32.mrb[37].mxu0 }
 0x160   : > { %v2010_v28 = vadd.f32 %v9662_v0, %v2009_v26  ;;  %v8084_v29 = vpop.f32.mrb[38].mxu0  ;;  %3225 = vmatmul.mubr.f32.vlgmr.msra.gmra.mrb[0].mxu1 %v3144_v22 }
 0x161   : > { %v2021_v63 = vadd.f32 %v8084_v29, %v9662_v0  ;;  %v2012_v32 = vpop.f32.mrb[39].mxu0  ;;  %3294 = vmatprep.mubr.f32.mxu1 %v3147_v24  ;;  %v2926_v35 = vmax.f32 %v2018_v25, 0.0 }
 0x162   : > { %v2013_v34 = vadd.f32 %v9662_v0, %v2012_v32  ;;  %v2924_v37 = vmax.f32 %v2010_v28, 0.0 }
 0x163   : > { %v2927_v36 = vmax.f32 %v2021_v63, 0.0  ;;  %8190 = vmatmul.mubr.bf16.gmra.mrb[144].mxu0 %v8728_v27 }
 0x164   : > { %v2925_v38 = vmax.f32 %v2013_v34, 0.0  ;;  %8193 = vmatprep.mubr.bf16.mxu0 %v8729_v30  ;;  %v8736_v30 = vld [vmem:[%s9584_s4 + $0x288] sm:$0xff]   ;;  %v8737_v34 = vld [vmem:[%s9584_s4 + $0x290] sm:$0xff]  }
 0x165   : > { %v9758_v39 = vpack.c.bf16 %v2927_v36, %v2926_v35 }
 0x166   : > { %v9760_v40 = vpack.c.bf16 %v2925_v38, %v2924_v37  ;;  %v8087_v41 = vpop.f32.mrb[40].mxu0 }
 0x167   : > { %v2034_v17 = vadd.f32 %v8087_v41, %v9662_v0  ;;  %v2025_v42 = vpop.f32.mrb[41].mxu0 }
 0x168   : > { %v2026_v44 = vadd.f32 %v9662_v0, %v2025_v42  ;;  %v8088_v45 = vpop.f32.mrb[42].mxu0 }
 0x169   : > { %v2037_v15 = vadd.f32 %v8088_v45, %v9662_v0  ;;  %v2028_v48 = vpop.f32.mrb[43].mxu0  ;;  %v2930_v51 = vmax.f32 %v2034_v17, 0.0 }
 0x16a   : > { %v2029_v50 = vadd.f32 %v9662_v0, %v2028_v48  ;;  %v2928_v53 = vmax.f32 %v2026_v44, 0.0  ;;  %v8738_v48 = vld [vmem:[%s9584_s4 + $0x298] sm:$0xff]  }
 0x16b   : > { %v2931_v52 = vmax.f32 %v2037_v15, 0.0  ;;  %8194 = vmatmul.mubr.bf16.gmra.mrb[148].mxu0 %v8730_v43 }
 0x16c   : > { %v2929_v54 = vmax.f32 %v2029_v50, 0.0  ;;  %8197 = vmatprep.mubr.bf16.mxu0 %v8731_v46 }
 0x16d   : > { %v9768_v55 = vpack.c.bf16 %v2931_v52, %v2930_v51  ;;  %v8739_v51 = vld [vmem:[%s9584_s4 + $0x2a0] sm:$0xff]  }
 0x16e   : > { %v9770_v56 = vpack.c.bf16 %v2929_v54, %v2928_v53  ;;  %v8091_v57 = vpop.f32.mrb[44].mxu0 }
 0x16f   : > { %v2050_v33 = vadd.f32 %v8091_v57, %v9662_v0  ;;  %v2041_v58 = vpop.f32.mrb[45].mxu0 }
 0x170   : > { %v2042_v60 = vadd.f32 %v9662_v0, %v2041_v58  ;;  %v8092_v61 = vpop.f32.mrb[46].mxu0 }
 0x171   : > { %v2053_v31 = vadd.f32 %v8092_v61, %v9662_v0  ;;  %v2044_v1 = vpop.f32.mrb[47].mxu0  ;;  %v2934_v4 = vmax.f32 %v2050_v33, 0.0 }
 0x172   : > { %v2045_v3 = vadd.f32 %v9662_v0, %v2044_v1  ;;  %v2932_v6 = vmax.f32 %v2042_v60, 0.0  ;;  %v8740_v1 = vld [vmem:[%s9584_s4 + $0x2a8] sm:$0xff]  }
 0x173   : > { %v2935_v5 = vmax.f32 %v2053_v31, 0.0  ;;  %8198 = vmatmul.mubr.bf16.gmra.mrb[152].mxu0 %v8732_v59 }
 0x174   : > { %v2933_v7 = vmax.f32 %v2045_v3, 0.0  ;;  %8201 = vmatprep.mubr.bf16.mxu0 %v8733_v62 }
 0x175   : > { %v9778_v8 = vpack.c.bf16 %v2935_v5, %v2934_v4  ;;  %v8741_v4 = vld [vmem:[%s9584_s4 + $0x2b0] sm:$0xff]  }
 0x176   : > { %v9780_v9 = vpack.c.bf16 %v2933_v7, %v2932_v6  ;;  %v8095_v10 = vpop.f32.mrb[48].mxu0 }
 0x177   : > { %v2066_v49 = vadd.f32 %v8095_v10, %v9662_v0  ;;  %v2057_v11 = vpop.f32.mrb[49].mxu0 }
 0x178   : > { %v2058_v13 = vadd.f32 %v9662_v0, %v2057_v11  ;;  %v8096_v14 = vpop.f32.mrb[50].mxu0 }
 0x179   : > { %v2069_v47 = vadd.f32 %v8096_v14, %v9662_v0  ;;  %v2060_v18 = vpop.f32.mrb[51].mxu0  ;;  %v2938_v20 = vmax.f32 %v2066_v49, 0.0 }
 0x17a   : > { %v2061_v19 = vadd.f32 %v9662_v0, %v2060_v18  ;;  %v2936_v23 = vmax.f32 %v2058_v13, 0.0  ;;  %v8742_v18 = vld [vmem:[%s9584_s4 + $0x2b8] sm:$0xff]  }
 0x17b   : > { %v2939_v22 = vmax.f32 %v2069_v47, 0.0  ;;  %8202 = vmatmul.mubr.bf16.gmra.mrb[156].mxu0 %v8734_v12 }
 0x17c   : > { %v2937_v24 = vmax.f32 %v2061_v19, 0.0  ;;  %8205 = vmatprep.mubr.bf16.mxu0 %v8735_v16 }
 0x17d   : > { %v8385_v25 = vpack.c.bf16 %v2939_v22, %v2938_v20  ;;  %v8743_v20 = vld [vmem:[%s9584_s4 + $0x2c0] sm:$0xff]  }
 0x17e   : > { %v8381_v26 = vpack.c.bf16 %v2937_v24, %v2936_v23  ;;  %v8099_v27 = vpop.f32.mrb[52].mxu0 }
 0x17f   : > { %v2082_v28 = vadd.f32 %v8099_v27, %v9662_v0  ;;  %v2073_v29 = vpop.f32.mrb[53].mxu0 }
 0x180   : > { %v2074_v63 = vadd.f32 %v9662_v0, %v2073_v29  ;;  %v8100_v32 = vpop.f32.mrb[54].mxu0  ;;  %8382 = vmatprep.subr.bf16.mxu1 %v8381_v26  ;;  %v3146_v29 = vld [vmem:[%s11618_s8 + $0x10] sm:$0xff] }
 0x181   : > { %v2085_v35 = vadd.f32 %v8100_v32, %v9662_v0  ;;  %v2076_v36 = vpop.f32.mrb[55].mxu0  ;;  %8384 = vmatpush3.bf16.msra.mxu1 %v9747_v2  ;;  %v2942_v38 = vmax.f32 %v2082_v28, 0.0 }
 0x182   : > { %v2077_v37 = vadd.f32 %v9662_v0, %v2076_v36  ;;  %8386 = vmatprep.subr.bf16.mxu1 %v8385_v25  ;;  %v2940_v17 = vmax.f32 %v2074_v63, 0.0  ;;  %v3149_v63 = vld [vmem:[%s11618_s8 + $0x28] sm:$0xff] }
 0x183   : > { %v2943_v41 = vmax.f32 %v2085_v35, 0.0  ;;  %8206 = vmatmul.mubr.bf16.gmra.mrb[160].mxu0 %v8736_v30  ;;  %v8744_v35 = vld [vmem:[%s9584_s4 + $0x2c8] sm:$0xff]  }
 0x184   : > { %v2941_v42 = vmax.f32 %v2077_v37, 0.0  ;;  %8209 = vmatprep.mubr.bf16.mxu0 %v8737_v34 }
 0x185   : > { %v8393_v43 = vpack.c.bf16 %v2943_v41, %v2942_v38  ;;  %8388 = vmatpush3.bf16.msra.mxu1 %v9741_v21  ;;  %v8745_v38 = vld [vmem:[%s9584_s4 + $0x2d0] sm:$0xff]  }
 0x186   : > { %v8389_v44 = vpack.c.bf16 %v2941_v42, %v2940_v17  ;;  %v8103_v45 = vpop.f32.mrb[56].mxu0 }
 0x187   : > { %v2098_v46 = vadd.f32 %v8103_v45, %v9662_v0  ;;  %v2089_v15 = vpop.f32.mrb[57].mxu0 }
 0x188   : > { %v2090_v2 = vadd.f32 %v9662_v0, %v2089_v15  ;;  %v8104_v50 = vpop.f32.mrb[58].mxu0  ;;  %8390 = vmatprep.subr.bf16.mxu1 %v8389_v44 }
 0x189   : > { %v2101_v52 = vadd.f32 %v8104_v50, %v9662_v0  ;;  %v2092_v53 = vpop.f32.mrb[59].mxu0  ;;  %8392 = vmatpush3.bf16.msra.mxu1 %v9760_v40  ;;  %v2946_v21 = vmax.f32 %v2098_v46, 0.0 }
 0x18a   : > { %v2093_v54 = vadd.f32 %v9662_v0, %v2092_v53  ;;  %8394 = vmatprep.subr.bf16.mxu1 %v8393_v43  ;;  %v2944_v33 = vmax.f32 %v2090_v2, 0.0 }
 0x18b   : > { %v2947_v57 = vmax.f32 %v2101_v52, 0.0  ;;  %8210 = vmatmul.mubr.bf16.gmra.mrb[164].mxu0 %v8738_v48 }
 0x18c   : > { %v2945_v58 = vmax.f32 %v2093_v54, 0.0  ;;  %8213 = vmatprep.mubr.bf16.mxu0 %v8739_v51  ;;  %v8746_v51 = vld [vmem:[%s9584_s4 + $0x2d8] sm:$0xff]   ;;  %v8747_v54 = vld [vmem:[%s9584_s4 + $0x2e0] sm:$0xff]  }
 0x18d   : > { %v8401_v59 = vpack.c.bf16 %v2947_v57, %v2946_v21  ;;  %8396 = vmatpush3.bf16.msra.mxu1 %v9758_v39 }
 0x18e   : > { %v8397_v60 = vpack.c.bf16 %v2945_v58, %v2944_v33  ;;  %v8107_v61 = vpop.f32.mrb[60].mxu0 }
 0x18f   : > { %v2114_v62 = vadd.f32 %v8107_v61, %v9662_v0  ;;  %v2105_v31 = vpop.f32.mrb[61].mxu0 }
 0x190   : > { %v2106_v40 = vadd.f32 %v9662_v0, %v2105_v31  ;;  %v8108_v3 = vpop.f32.mrb[62].mxu0  ;;  %8398 = vmatprep.subr.bf16.mxu1 %v8397_v60 }
 0x191   : > { %v2117_v5 = vadd.f32 %v8108_v3, %v9662_v0  ;;  %v2108_v6 = vpop.f32.mrb[63].mxu0  ;;  %8400 = vmatpush3.bf16.msra.mxu1 %v9770_v56  ;;  %v2950_v39 = vmax.f32 %v2114_v62, 0.0 }
 0x192   : > { %v2109_v7 = vadd.f32 %v9662_v0, %v2108_v6  ;;  %8402 = vmatprep.subr.bf16.mxu1 %v8401_v59  ;;  %v2948_v49 = vmax.f32 %v2106_v40, 0.0 }
 0x193   : > { %v2951_v10 = vmax.f32 %v2117_v5, 0.0  ;;  %8214 = vmatmul.mubr.bf16.gmra.mrb[168].mxu0 %v8740_v1 }
 0x194   : > { %v2949_v11 = vmax.f32 %v2109_v7, 0.0  ;;  %8217 = vmatprep.mubr.bf16.mxu0 %v8741_v4  ;;  %v8748_v4 = vld [vmem:[%s9584_s4 + $0x2e8] sm:$0xff]   ;;  %v8749_v7 = vld [vmem:[%s9584_s4 + $0x2f0] sm:$0xff]  }
 0x195   : > { %v8409_v12 = vpack.c.bf16 %v2951_v10, %v2950_v39  ;;  %8404 = vmatpush3.bf16.msra.mxu1 %v9768_v55 }
 0x196   : > { %v8405_v13 = vpack.c.bf16 %v2949_v11, %v2948_v49  ;;  %v8111_v14 = vpop.f32.mrb[64].mxu0 }
 0x197   : > { %v2130_v16 = vadd.f32 %v8111_v14, %v9662_v0  ;;  %v2121_v47 = vpop.f32.mrb[65].mxu0 }
 0x198   : > { %v2122_v56 = vadd.f32 %v9662_v0, %v2121_v47  ;;  %v8112_v19 = vpop.f32.mrb[66].mxu0  ;;  %8406 = vmatprep.subr.bf16.mxu1 %v8405_v13 }
 0x199   : > { %v2133_v22 = vadd.f32 %v8112_v19, %v9662_v0  ;;  %v2124_v23 = vpop.f32.mrb[67].mxu0  ;;  %8408 = vmatpush3.bf16.msra.mxu1 %v9780_v9  ;;  %v2954_v55 = vmax.f32 %v2130_v16, 0.0 }
 0x19a   : > { %v2125_v24 = vadd.f32 %v9662_v0, %v2124_v23  ;;  %8410 = vmatprep.subr.bf16.mxu1 %v8409_v12  ;;  %v2952_v26 = vmax.f32 %v2122_v56, 0.0 }
 0x19b   : > { %v2955_v25 = vmax.f32 %v2133_v22, 0.0  ;;  %8218 = vmatmul.mubr.bf16.gmra.mrb[172].mxu0 %v8742_v18 }
 0x19c   : > { %v2953_v27 = vmax.f32 %v2125_v24, 0.0  ;;  %8221 = vmatprep.mubr.bf16.mxu0 %v8743_v20  ;;  %v8750_v20 = vld [vmem:[%s9584_s4 + $0x2f8] sm:$0xff]   ;;  %v8751_v24 = vld [vmem:[%s9584_s4 + $0x300] sm:$0xff]  }
 0x19d   : > { %v9819_v28 = vpack.c.bf16 %v2955_v25, %v2954_v55  ;;  %8412 = vmatpush3.bf16.msra.mxu1 %v9778_v8 }
 0x19e   : > { %v9825_v9 = vpack.c.bf16 %v2953_v27, %v2952_v26  ;;  %v8115_v30 = vpop.f32.mrb[68].mxu0 }
 0x19f   : > { %v2146_v32 = vadd.f32 %v8115_v30, %v9662_v0  ;;  %v2137_v34 = vpop.f32.mrb[69].mxu0 }
 0x1a0   : > { %v2138_v36 = vadd.f32 %v9662_v0, %v2137_v34  ;;  %v8116_v37 = vpop.f32.mrb[70].mxu0  ;;  %3295 = vmatmul.mubr.f32.vlgmr.msra.gmra.mrb[2].mxu1 %v3146_v29 }
 0x1a1   : > { %v2149_v8 = vadd.f32 %v8116_v37, %v9662_v0  ;;  %v2140_v41 = vpop.f32.mrb[71].mxu0  ;;  %3364 = vmatprep.mubr.f32.mxu1 %v3149_v63  ;;  %v2958_v42 = vmax.f32 %v2146_v32, 0.0 }
 0x1a2   : > { %v2141_v17 = vadd.f32 %v9662_v0, %v2140_v41  ;;  %v2956_v44 = vmax.f32 %v2138_v36, 0.0 }
 0x1a3   : > { %v2959_v43 = vmax.f32 %v2149_v8, 0.0  ;;  %8222 = vmatmul.mubr.bf16.gmra.mrb[176].mxu0 %v8744_v35 }
 0x1a4   : > { %v2957_v45 = vmax.f32 %v2141_v17, 0.0  ;;  %8225 = vmatprep.mubr.bf16.mxu0 %v8745_v38  ;;  %v8752_v38 = vld [vmem:[%s9584_s4 + $0x308] sm:$0xff]   ;;  %v8753_v17 = vld [vmem:[%s9584_s4 + $0x310] sm:$0xff]  }
 0x1a5   : > { %v9836_v46 = vpack.c.bf16 %v2959_v43, %v2958_v42 }
 0x1a6   : > { %v9838_v15 = vpack.c.bf16 %v2957_v45, %v2956_v44  ;;  %v8119_v48 = vpop.f32.mrb[72].mxu0 }
 0x1a7   : > { %v2162_v2 = vadd.f32 %v8119_v48, %v9662_v0  ;;  %v2153_v50 = vpop.f32.mrb[73].mxu0 }
 0x1a8   : > { %v2154_v52 = vadd.f32 %v9662_v0, %v2153_v50  ;;  %v8120_v53 = vpop.f32.mrb[74].mxu0 }
 0x1a9   : > { %v2165_v21 = vadd.f32 %v8120_v53, %v9662_v0  ;;  %v2156_v57 = vpop.f32.mrb[75].mxu0  ;;  %v2962_v58 = vmax.f32 %v2162_v2, 0.0 }
 0x1aa   : > { %v2157_v33 = vadd.f32 %v9662_v0, %v2156_v57  ;;  %v2960_v60 = vmax.f32 %v2154_v52, 0.0  ;;  %v8754_v57 = vld [vmem:[%s9584_s4 + $0x318] sm:$0xff]  }
 0x1ab   : > { %v2963_v59 = vmax.f32 %v2165_v21, 0.0  ;;  %8226 = vmatmul.mubr.bf16.gmra.mrb[180].mxu0 %v8746_v51 }
 0x1ac   : > { %v2961_v61 = vmax.f32 %v2157_v33, 0.0  ;;  %8229 = vmatprep.mubr.bf16.mxu0 %v8747_v54 }
 0x1ad   : > { %v9846_v62 = vpack.c.bf16 %v2963_v59, %v2962_v58  ;;  %v8755_v58 = vld [vmem:[%s9584_s4 + $0x320] sm:$0xff]  }
 0x1ae   : > { %v9848_v31 = vpack.c.bf16 %v2961_v61, %v2960_v60  ;;  %v8123_v1 = vpop.f32.mrb[76].mxu0 }
 0x1af   : > { %v2178_v40 = vadd.f32 %v8123_v1, %v9662_v0  ;;  %v2169_v3 = vpop.f32.mrb[77].mxu0 }
 0x1b0   : > { %v2170_v5 = vadd.f32 %v9662_v0, %v2169_v3  ;;  %v8124_v6 = vpop.f32.mrb[78].mxu0 }
 0x1b1   : > { %v2181_v39 = vadd.f32 %v8124_v6, %v9662_v0  ;;  %v2172_v10 = vpop.f32.mrb[79].mxu0  ;;  %v2966_v11 = vmax.f32 %v2178_v40, 0.0 }
 0x1b2   : > { %v2173_v49 = vadd.f32 %v9662_v0, %v2172_v10  ;;  %v2964_v13 = vmax.f32 %v2170_v5, 0.0  ;;  %v8756_v10 = vld [vmem:[%s9584_s4 + $0x328] sm:$0xff]  }
 0x1b3   : > { %v2967_v12 = vmax.f32 %v2181_v39, 0.0  ;;  %8230 = vmatmul.mubr.bf16.gmra.mrb[184].mxu0 %v8748_v4 }
 0x1b4   : > { %v2965_v14 = vmax.f32 %v2173_v49, 0.0  ;;  %8233 = vmatprep.mubr.bf16.mxu0 %v8749_v7 }
 0x1b5   : > { %v9856_v16 = vpack.c.bf16 %v2967_v12, %v2966_v11  ;;  %v8757_v11 = vld [vmem:[%s9584_s4 + $0x330] sm:$0xff]  }
 0x1b6   : > { %v9858_v47 = vpack.c.bf16 %v2965_v14, %v2964_v13  ;;  %v8127_v18 = vpop.f32.mrb[80].mxu0 }
 0x1b7   : > { %v2194_v56 = vadd.f32 %v8127_v18, %v9662_v0  ;;  %v2185_v19 = vpop.f32.mrb[81].mxu0 }
 0x1b8   : > { %v2186_v22 = vadd.f32 %v9662_v0, %v2185_v19  ;;  %v8128_v23 = vpop.f32.mrb[82].mxu0 }
 0x1b9   : > { %v2197_v55 = vadd.f32 %v8128_v23, %v9662_v0  ;;  %v2188_v25 = vpop.f32.mrb[83].mxu0  ;;  %v2970_v27 = vmax.f32 %v2194_v56, 0.0 }
 0x1ba   : > { %v2189_v26 = vadd.f32 %v9662_v0, %v2188_v25  ;;  %v2968_v30 = vmax.f32 %v2186_v22, 0.0  ;;  %v8758_v25 = vld [vmem:[%s9584_s4 + $0x338] sm:$0xff]  }
 0x1bb   : > { %v2971_v29 = vmax.f32 %v2197_v55, 0.0  ;;  %8234 = vmatmul.mubr.bf16.gmra.mrb[188].mxu0 %v8750_v20 }
 0x1bc   : > { %v2969_v63 = vmax.f32 %v2189_v26, 0.0  ;;  %8237 = vmatprep.mubr.bf16.mxu0 %v8751_v24 }
 0x1bd   : > { %v8417_v32 = vpack.c.bf16 %v2971_v29, %v2970_v27  ;;  %v8759_v27 = vld [vmem:[%s9584_s4 + $0x340] sm:$0xff]  }
 0x1be   : > { %v8413_v34 = vpack.c.bf16 %v2969_v63, %v2968_v30  ;;  %v8131_v35 = vpop.f32.mrb[84].mxu0 }
 0x1bf   : > { %v2210_v36 = vadd.f32 %v8131_v35, %v9662_v0  ;;  %v2201_v37 = vpop.f32.mrb[85].mxu0 }
 0x1c0   : > { %v2202_v8 = vadd.f32 %v9662_v0, %v2201_v37  ;;  %v8132_v41 = vpop.f32.mrb[86].mxu0  ;;  %8414 = vmatprep.subr.bf16.mxu1 %v8413_v34 }
 0x1c1   : > { %v2213_v42 = vadd.f32 %v8132_v41, %v9662_v0  ;;  %v2204_v43 = vpop.f32.mrb[87].mxu0  ;;  %8416 = vmatpush3.bf16.msra.mxu1 %v9825_v9  ;;  %v2974_v45 = vmax.f32 %v2210_v36, 0.0 }
 0x1c2   : > { %v2205_v44 = vadd.f32 %v9662_v0, %v2204_v43  ;;  %8418 = vmatprep.subr.bf16.mxu1 %v8417_v32  ;;  %v2972_v2 = vmax.f32 %v2202_v8, 0.0  ;;  %v3151_v8 = vld [vmem:[%s11618_s8 + $0x38] sm:$0xff] }
 0x1c3   : > { %v2975_v48 = vmax.f32 %v2213_v42, 0.0  ;;  %8238 = vmatmul.mubr.bf16.gmra.mrb[192].mxu0 %v8752_v38  ;;  %v8760_v42 = vld [vmem:[%s9584_s4 + $0x348] sm:$0xff]  }
 0x1c4   : > { %v2973_v50 = vmax.f32 %v2205_v44, 0.0  ;;  %8241 = vmatprep.mubr.bf16.mxu0 %v8753_v17 }
 0x1c5   : > { %v8425_v51 = vpack.c.bf16 %v2975_v48, %v2974_v45  ;;  %8420 = vmatpush3.bf16.msra.mxu1 %v9819_v28  ;;  %v8761_v45 = vld [vmem:[%s9584_s4 + $0x350] sm:$0xff]  }
 0x1c6   : > { %v8421_v52 = vpack.c.bf16 %v2973_v50, %v2972_v2  ;;  %v8135_v53 = vpop.f32.mrb[88].mxu0 }
 0x1c7   : > { %v2226_v54 = vadd.f32 %v8135_v53, %v9662_v0  ;;  %v2217_v21 = vpop.f32.mrb[89].mxu0 }
 0x1c8   : > { %v2218_v9 = vadd.f32 %v9662_v0, %v2217_v21  ;;  %v8136_v33 = vpop.f32.mrb[90].mxu0  ;;  %8422 = vmatprep.subr.bf16.mxu1 %v8421_v52 }
 0x1c9   : > { %v2229_v59 = vadd.f32 %v8136_v33, %v9662_v0  ;;  %v2220_v60 = vpop.f32.mrb[91].mxu0  ;;  %8424 = vmatpush3.bf16.msra.mxu1 %v9838_v15  ;;  %v2978_v28 = vmax.f32 %v2226_v54, 0.0 }
 0x1ca   : > { %v2221_v61 = vadd.f32 %v9662_v0, %v2220_v60  ;;  %8426 = vmatprep.subr.bf16.mxu1 %v8425_v51  ;;  %v2976_v40 = vmax.f32 %v2218_v9, 0.0 }
 0x1cb   : > { %v2979_v1 = vmax.f32 %v2229_v59, 0.0  ;;  %8242 = vmatmul.mubr.bf16.gmra.mrb[196].mxu0 %v8754_v57 }
 0x1cc   : > { %v2977_v3 = vmax.f32 %v2221_v61, 0.0  ;;  %8245 = vmatprep.mubr.bf16.mxu0 %v8755_v58  ;;  %v8762_v58 = vld [vmem:[%s9584_s4 + $0x358] sm:$0xff]   ;;  %v8763_v61 = vld [vmem:[%s9584_s4 + $0x360] sm:$0xff]  }
 0x1cd   : > { %v8433_v4 = vpack.c.bf16 %v2979_v1, %v2978_v28  ;;  %8428 = vmatpush3.bf16.msra.mxu1 %v9836_v46 }
 0x1ce   : > { %v8429_v5 = vpack.c.bf16 %v2977_v3, %v2976_v40  ;;  %v8139_v6 = vpop.f32.mrb[92].mxu0 }
 0x1cf   : > { %v2242_v7 = vadd.f32 %v8139_v6, %v9662_v0  ;;  %v2233_v39 = vpop.f32.mrb[93].mxu0 }
 0x1d0   : > { %v2234_v15 = vadd.f32 %v9662_v0, %v2233_v39  ;;  %v8140_v49 = vpop.f32.mrb[94].mxu0  ;;  %8430 = vmatprep.subr.bf16.mxu1 %v8429_v5 }
 0x1d1   : > { %v2245_v12 = vadd.f32 %v8140_v49, %v9662_v0  ;;  %v2236_v13 = vpop.f32.mrb[95].mxu0  ;;  %8432 = vmatpush3.bf16.msra.mxu1 %v9848_v31  ;;  %v2982_v46 = vmax.f32 %v2242_v7, 0.0 }
 0x1d2   : > { %v2237_v14 = vadd.f32 %v9662_v0, %v2236_v13  ;;  %8434 = vmatprep.subr.bf16.mxu1 %v8433_v4  ;;  %v2980_v56 = vmax.f32 %v2234_v15, 0.0 }
 0x1d3   : > { %v2983_v18 = vmax.f32 %v2245_v12, 0.0  ;;  %8246 = vmatmul.mubr.bf16.gmra.mrb[200].mxu0 %v8756_v10 }
 0x1d4   : > { %v2981_v19 = vmax.f32 %v2237_v14, 0.0  ;;  %8249 = vmatprep.mubr.bf16.mxu0 %v8757_v11  ;;  %v8764_v11 = vld [vmem:[%s9584_s4 + $0x368] sm:$0xff]   ;;  %v8765_v14 = vld [vmem:[%s9584_s4 + $0x370] sm:$0xff]  }
 0x1d5   : > { %v8441_v20 = vpack.c.bf16 %v2983_v18, %v2982_v46  ;;  %8436 = vmatpush3.bf16.msra.mxu1 %v9846_v62  ;;  %v9899_v62 = vld [vmem:[%s11620_s29] ss:$0 sm:$0xff] }
 0x1d6   : > { %v8437_v22 = vpack.c.bf16 %v2981_v19, %v2980_v56  ;;  %v8143_v23 = vpop.f32.mrb[96].mxu0 }
 0x1d7   : > { %v2258_v24 = vadd.f32 %v8143_v23, %v9662_v0  ;;  %v2249_v55 = vpop.f32.mrb[97].mxu0 }
 0x1d8   : > { %v2250_v31 = vadd.f32 %v9662_v0, %v2249_v55  ;;  %v8144_v26 = vpop.f32.mrb[98].mxu0  ;;  %8438 = vmatprep.subr.bf16.mxu1 %v8437_v22 }
 0x1d9   : > { %v2261_v29 = vadd.f32 %v8144_v26, %v9662_v0  ;;  %v2252_v30 = vpop.f32.mrb[99].mxu0  ;;  %8440 = vmatpush3.bf16.msra.mxu1 %v9858_v47  ;;  %v2986_v32 = vmax.f32 %v2258_v24, 0.0  ;;  %v3148_v47 = vld [vmem:[%s11618_s8 + $0x20] sm:$0xff] }
 0x1da   : > { %v2253_v63 = vadd.f32 %v9899_v62, %v2252_v30  ;;  %8442 = vmatprep.subr.bf16.mxu1 %v8441_v20  ;;  %v2984_v35 = vmax.f32 %v2250_v31, 0.0 }
 0x1db   : > { %v2987_v34 = vmax.f32 %v2261_v29, 0.0  ;;  %8250 = vmatmul.mubr.bf16.gmra.mrb[204].mxu0 %v8758_v25 }
 0x1dc   : > { %v2985_v36 = vmax.f32 %v2253_v63, 0.0  ;;  %8253 = vmatprep.mubr.bf16.mxu0 %v8759_v27  ;;  %v8766_v27 = vld [vmem:[%s9584_s4 + $0x378] sm:$0xff]   ;;  %v8767_v63 = vld [vmem:[%s9584_s4 + $0x380] sm:$0xff]  }
 0x1dd   : > { %v9902_v0 = vpack.c.bf16 %v2987_v34, %v2986_v32  ;;  %8444 = vmatpush3.bf16.msra.mxu1 %v9856_v16 }
 0x1de   : > { %v9908_v37 = vpack.c.bf16 %v2985_v36, %v2984_v35  ;;  %v8147_v38 = vpop.f32.mrb[100].mxu0 }
 0x1df   : > { %v2274_v41 = vadd.f32 %v9899_v62, %v8147_v38  ;;  %v2265_v17 = vpop.f32.mrb[101].mxu0 }
 0x1e0   : > { %v2266_v43 = vadd.f32 %v9899_v62, %v2265_v17  ;;  %v8148_v44 = vpop.f32.mrb[102].mxu0  ;;  %3365 = vmatmul.mubr.f32.vlgmr.msra.gmra.mrb[4].mxu1 %v3148_v47 }
 0x1e1   : > { %v2277_v16 = vadd.f32 %v9899_v62, %v8148_v44  ;;  %v2268_v48 = vpop.f32.mrb[103].mxu0  ;;  %3434 = vmatprep.mubr.f32.mxu1 %v3151_v8  ;;  %v2990_v50 = vmax.f32 %v2274_v41, 0.0 }
 0x1e2   : > { %v2269_v2 = vadd.f32 %v9899_v62, %v2268_v48  ;;  %v2988_v52 = vmax.f32 %v2266_v43, 0.0 }
 0x1e3   : > { %v2991_v51 = vmax.f32 %v2277_v16, 0.0  ;;  %8254 = vmatmul.mubr.bf16.gmra.mrb[208].mxu0 %v8760_v42 }
 0x1e4   : > { %v2989_v53 = vmax.f32 %v2269_v2, 0.0  ;;  %8257 = vmatprep.mubr.bf16.mxu0 %v8761_v45  ;;  %v8768_v45 = vld [vmem:[%s9584_s4 + $0x388] sm:$0xff]   ;;  %v8769_v2 = vld [vmem:[%s9584_s4 + $0x390] sm:$0xff]  }
 0x1e5   : > { %v9919_v54 = vpack.c.bf16 %v2991_v51, %v2990_v50 }
 0x1e6   : > { %v9921_v21 = vpack.c.bf16 %v2989_v53, %v2988_v52  ;;  %v8151_v57 = vpop.f32.mrb[104].mxu0 }
 0x1e7   : > { %v2290_v9 = vadd.f32 %v9899_v62, %v8151_v57  ;;  %v2281_v33 = vpop.f32.mrb[105].mxu0 }
 0x1e8   : > { %v2282_v59 = vadd.f32 %v9899_v62, %v2281_v33  ;;  %v8152_v60 = vpop.f32.mrb[106].mxu0 }
 0x1e9   : > { %v2293_v28 = vadd.f32 %v9899_v62, %v8152_v60  ;;  %v2284_v1 = vpop.f32.mrb[107].mxu0  ;;  %v2994_v3 = vmax.f32 %v2290_v9, 0.0 }
 0x1ea   : > { %v2285_v40 = vadd.f32 %v9899_v62, %v2284_v1  ;;  %v2992_v5 = vmax.f32 %v2282_v59, 0.0  ;;  %v8770_v1 = vld [vmem:[%s9584_s4 + $0x398] sm:$0xff]  }
 0x1eb   : > { %v2995_v4 = vmax.f32 %v2293_v28, 0.0  ;;  %8258 = vmatmul.mubr.bf16.gmra.mrb[212].mxu0 %v8762_v58 }
 0x1ec   : > { %v2993_v6 = vmax.f32 %v2285_v40, 0.0  ;;  %8261 = vmatprep.mubr.bf16.mxu0 %v8763_v61 }
 0x1ed   : > { %v9929_v7 = vpack.c.bf16 %v2995_v4, %v2994_v3  ;;  %v8771_v3 = vld [vmem:[%s9584_s4 + $0x3a0] sm:$0xff]  }
 0x1ee   : > { %v9931_v39 = vpack.c.bf16 %v2993_v6, %v2992_v5  ;;  %v8155_v10 = vpop.f32.mrb[108].mxu0 }
 0x1ef   : > { %v2306_v15 = vadd.f32 %v9899_v62, %v8155_v10  ;;  %v2297_v49 = vpop.f32.mrb[109].mxu0 }
 0x1f0   : > { %v2298_v12 = vadd.f32 %v9899_v62, %v2297_v49  ;;  %v8156_v13 = vpop.f32.mrb[110].mxu0 }
 0x1f1   : > { %v2309_v46 = vadd.f32 %v9899_v62, %v8156_v13  ;;  %v2300_v18 = vpop.f32.mrb[111].mxu0  ;;  %v2998_v19 = vmax.f32 %v2306_v15, 0.0 }
 0x1f2   : > { %v2301_v56 = vadd.f32 %v9899_v62, %v2300_v18  ;;  %v2996_v22 = vmax.f32 %v2298_v12, 0.0  ;;  %v8772_v18 = vld [vmem:[%s9584_s4 + $0x3a8] sm:$0xff]  }
 0x1f3   : > { %v2999_v20 = vmax.f32 %v2309_v46, 0.0  ;;  %8262 = vmatmul.mubr.bf16.gmra.mrb[216].mxu0 %v8764_v11 }
 0x1f4   : > { %v2997_v23 = vmax.f32 %v2301_v56, 0.0  ;;  %8265 = vmatprep.mubr.bf16.mxu0 %v8765_v14 }
 0x1f5   : > { %v9939_v24 = vpack.c.bf16 %v2999_v20, %v2998_v19  ;;  %v8773_v19 = vld [vmem:[%s9584_s4 + $0x3b0] sm:$0xff]  }
 0x1f6   : > { %v9941_v55 = vpack.c.bf16 %v2997_v23, %v2996_v22  ;;  %v8159_v25 = vpop.f32.mrb[112].mxu0 }
 0x1f7   : > { %v2322_v31 = vadd.f32 %v9899_v62, %v8159_v25  ;;  %v2313_v26 = vpop.f32.mrb[113].mxu0 }
 0x1f8   : > { %v2314_v29 = vadd.f32 %v9899_v62, %v2313_v26  ;;  %v8160_v30 = vpop.f32.mrb[114].mxu0 }
 0x1f9   : > { %v2325_v32 = vadd.f32 %v9899_v62, %v8160_v30  ;;  %v2316_v34 = vpop.f32.mrb[115].mxu0  ;;  %v3002_v36 = vmax.f32 %v2322_v31, 0.0 }
 0x1fa   : > { %v2317_v35 = vadd.f32 %v9899_v62, %v2316_v34  ;;  %v3000_v38 = vmax.f32 %v2314_v29, 0.0  ;;  %v8774_v34 = vld [vmem:[%s9584_s4 + $0x3b8] sm:$0xff]  }
 0x1fb   : > { %v3003_v47 = vmax.f32 %v2325_v32, 0.0  ;;  %8266 = vmatmul.mubr.bf16.gmra.mrb[220].mxu0 %v8766_v27 }
 0x1fc   : > { %v3001_v8 = vmax.f32 %v2317_v35, 0.0  ;;  %8269 = vmatprep.mubr.bf16.mxu0 %v8767_v63 }
 0x1fd   : > { %v8449_v41 = vpack.c.bf16 %v3003_v47, %v3002_v36  ;;  %v8775_v36 = vld [vmem:[%s9584_s4 + $0x3c0] sm:$0xff]  }
 0x1fe   : > { %v8445_v17 = vpack.c.bf16 %v3001_v8, %v3000_v38  ;;  %v8163_v42 = vpop.f32.mrb[116].mxu0 }
 0x1ff   : > { %v2338_v43 = vadd.f32 %v9899_v62, %v8163_v42  ;;  %v2329_v44 = vpop.f32.mrb[117].mxu0 }
 0x200   : > { %v2330_v16 = vadd.f32 %v9899_v62, %v2329_v44  ;;  %v8164_v48 = vpop.f32.mrb[118].mxu0  ;;  %8446 = vmatprep.subr.bf16.mxu1 %v8445_v17  ;;  %v3150_v44 = vld [vmem:[%s11618_s8 + $0x30] sm:$0xff] }
 0x201   : > { %v2341_v50 = vadd.f32 %v9899_v62, %v8164_v48  ;;  %v2332_v51 = vpop.f32.mrb[119].mxu0  ;;  %8448 = vmatpush3.bf16.msra.mxu1 %v9908_v37  ;;  %v3006_v53 = vmax.f32 %v2338_v43, 0.0 }
 0x202   : > { %v2333_v52 = vadd.f32 %v9899_v62, %v2332_v51  ;;  %8450 = vmatprep.subr.bf16.mxu1 %v8449_v41  ;;  %v3004_v9 = vmax.f32 %v2330_v16, 0.0  ;;  %v3153_v16 = vld [vmem:[%s11618_s8 + $0x48] sm:$0xff] }
 0x203   : > { %v3007_v57 = vmax.f32 %v2341_v50, 0.0  ;;  %8270 = vmatmul.mubr.bf16.gmra.mrb[224].mxu0 %v8768_v45  ;;  %v8776_v50 = vld [vmem:[%s9584_s4 + $0x3c8] sm:$0xff]  }
 0x204   : > { %v3005_v33 = vmax.f32 %v2333_v52, 0.0  ;;  %8273 = vmatprep.mubr.bf16.mxu0 %v8769_v2 }
 0x205   : > { %v8457_v58 = vpack.c.bf16 %v3007_v57, %v3006_v53  ;;  %8452 = vmatpush3.bf16.msra.mxu1 %v9902_v0  ;;  %v8777_v53 = vld [vmem:[%s9584_s4 + $0x3d0] sm:$0xff]  }
 0x206   : > { %v8453_v59 = vpack.c.bf16 %v3005_v33, %v3004_v9  ;;  %v8167_v60 = vpop.f32.mrb[120].mxu0 }
 0x207   : > { %v2354_v61 = vadd.f32 %v9899_v62, %v8167_v60  ;;  %v2345_v28 = vpop.f32.mrb[121].mxu0 }
 0x208   : > { %v2346_v37 = vadd.f32 %v9899_v62, %v2345_v28  ;;  %v8168_v40 = vpop.f32.mrb[122].mxu0  ;;  %8454 = vmatprep.subr.bf16.mxu1 %v8453_v59 }
 0x209   : > { %v2357_v4 = vadd.f32 %v9899_v62, %v8168_v40  ;;  %v2348_v5 = vpop.f32.mrb[123].mxu0  ;;  %8456 = vmatpush3.bf16.msra.mxu1 %v9921_v21  ;;  %v3010_v0 = vmax.f32 %v2354_v61, 0.0 }
 0x20a   : > { %v2349_v6 = vadd.f32 %v9899_v62, %v2348_v5  ;;  %8458 = vmatprep.subr.bf16.mxu1 %v8457_v58  ;;  %v3008_v15 = vmax.f32 %v2346_v37, 0.0 }
 0x20b   : > { %v3011_v10 = vmax.f32 %v2357_v4, 0.0  ;;  %8274 = vmatmul.mubr.bf16.gmra.mrb[228].mxu0 %v8770_v1 }
 0x20c   : > { %v3009_v49 = vmax.f32 %v2349_v6, 0.0  ;;  %8277 = vmatprep.mubr.bf16.mxu0 %v8771_v3  ;;  %v8778_v3 = vld [vmem:[%s9584_s4 + $0x3d8] sm:$0xff]   ;;  %v8779_v6 = vld [vmem:[%s9584_s4 + $0x3e0] sm:$0xff]  }
 0x20d   : > { %v8465_v11 = vpack.c.bf16 %v3011_v10, %v3010_v0  ;;  %8460 = vmatpush3.bf16.msra.mxu1 %v9919_v54 }
 0x20e   : > { %v8461_v12 = vpack.c.bf16 %v3009_v49, %v3008_v15  ;;  %v8171_v13 = vpop.f32.mrb[124].mxu0 }
 0x20f   : > { %v2370_v14 = vadd.f32 %v9899_v62, %v8171_v13  ;;  %v2361_v46 = vpop.f32.mrb[125].mxu0 }
 0x210   : > { %v2362_v21 = vadd.f32 %v9899_v62, %v2361_v46  ;;  %v8172_v56 = vpop.f32.mrb[126].mxu0  ;;  %8462 = vmatprep.subr.bf16.mxu1 %v8461_v12 }
 0x211   : > { %v2373_v20 = vadd.f32 %v9899_v62, %v8172_v56  ;;  %v2364_v22 = vpop.f32.mrb[127].mxu0  ;;  %8464 = vmatpush3.bf16.msra.mxu1 %v9931_v39  ;;  %v3014_v54 = vmax.f32 %v2370_v14, 0.0 }
 0x212   : > { %v2365_v23 = vadd.f32 %v9899_v62, %v2364_v22  ;;  %8466 = vmatprep.subr.bf16.mxu1 %v8465_v11  ;;  %v3012_v31 = vmax.f32 %v2362_v21, 0.0 }
 0x213   : > { %v3015_v25 = vmax.f32 %v2373_v20, 0.0  ;;  %8278 = vmatmul.mubr.bf16.gmra.mrb[232].mxu0 %v8772_v18 }
 0x214   : > { %v3013_v26 = vmax.f32 %v2365_v23, 0.0  ;;  %8281 = vmatprep.mubr.bf16.mxu0 %v8773_v19  ;;  %v8780_v19 = vld [vmem:[%s9584_s4 + $0x3e8] sm:$0xff]   ;;  %v8781_v23 = vld [vmem:[%s9584_s4 + $0x3f0] sm:$0xff]  }
 0x215   : > { %v8473_v27 = vpack.c.bf16 %v3015_v25, %v3014_v54  ;;  %8468 = vmatpush3.bf16.msra.mxu1 %v9929_v7 }
 0x216   : > { %v8469_v29 = vpack.c.bf16 %v3013_v26, %v3012_v31  ;;  %v8175_v30 = vpop.f32.mrb[128].mxu0 }
 0x217   : > { %v2386_v63 = vadd.f32 %v9899_v62, %v8175_v30  ;;  %v2377_v32 = vpop.f32.mrb[129].mxu0 }
 0x218   : > { %v2378_v39 = vadd.f32 %v9899_v62, %v2377_v32  ;;  %v8176_v35 = vpop.f32.mrb[130].mxu0  ;;  %8470 = vmatprep.subr.bf16.mxu1 %v8469_v29 }
 0x219   : > { %v2389_v47 = vadd.f32 %v9899_v62, %v8176_v35  ;;  %v2380_v38 = vpop.f32.mrb[131].mxu0  ;;  %8472 = vmatpush3.bf16.msra.mxu1 %v9941_v55  ;;  %v3018_v7 = vmax.f32 %v2386_v63, 0.0 }
 0x21a   : > { %v2381_v8 = vadd.f32 %v9899_v62, %v2380_v38  ;;  %8474 = vmatprep.subr.bf16.mxu1 %v8473_v27  ;;  %v3016_v17 = vmax.f32 %v2378_v39, 0.0 }
 0x21b   : > { %v3019_v41 = vmax.f32 %v2389_v47, 0.0  ;;  %8282 = vmatmul.mubr.bf16.gmra.mrb[236].mxu0 %v8774_v34 }
 0x21c   : > { %v3017_v42 = vmax.f32 %v2381_v8, 0.0  ;;  %8285 = vmatprep.mubr.bf16.mxu0 %v8775_v36  ;;  %v8782_v36 = vld [vmem:[%s9584_s4 + $0x3f8] sm:$0xff]  }
 0x21d   : > { %v9980_v43 = vpack.c.bf16 %v3019_v41, %v3018_v7  ;;  %8476 = vmatpush3.bf16.msra.mxu1 %v9939_v24 }
 0x21e   : > { %v9986_v55 = vpack.c.bf16 %v3017_v42, %v3016_v17  ;;  %v8179_v45 = vpop.f32.mrb[132].mxu0 }
 0x21f   : > { %v2402_v48 = vadd.f32 %v9899_v62, %v8179_v45  ;;  %v2393_v2 = vpop.f32.mrb[133].mxu0 }
 0x220   : > { %v2394_v51 = vadd.f32 %v9899_v62, %v2393_v2  ;;  %v8180_v52 = vpop.f32.mrb[134].mxu0  ;;  %3435 = vmatmul.mubr.f32.vlgmr.msra.gmra.mrb[6].mxu1 %v3150_v44 }
 0x221   : > { %v2405_v24 = vadd.f32 %v9899_v62, %v8180_v52  ;;  %v2396_v57 = vpop.f32.mrb[135].mxu0  ;;  %3504 = vmatprep.mubr.f32.mxu1 %v3153_v16  ;;  %v3022_v33 = vmax.f32 %v2402_v48, 0.0 }
 0x222   : > { %v2397_v9 = vadd.f32 %v9899_v62, %v2396_v57  ;;  %v3020_v59 = vmax.f32 %v2394_v51, 0.0 }
 0x223   : > { %v3023_v58 = vmax.f32 %v2405_v24, 0.0  ;;  %8286 = vmatmul.mubr.bf16.gmra.mrb[240].mxu0 %v8776_v50 }
 0x224   : > { %v3021_v60 = vmax.f32 %v2397_v9, 0.0  ;;  %8289 = vmatprep.mubr.bf16.mxu0 %v8777_v53 }
 0x225   : > { %v9997_v61 = vpack.c.bf16 %v3023_v58, %v3022_v33 }
 0x226   : > { %v9999_v28 = vpack.c.bf16 %v3021_v60, %v3020_v59  ;;  %v8183_v1 = vpop.f32.mrb[136].mxu0 }
 0x227   : > { %v2418_v37 = vadd.f32 %v9899_v62, %v8183_v1  ;;  %v2409_v40 = vpop.f32.mrb[137].mxu0 }
 0x228   : > { %v2410_v4 = vadd.f32 %v9899_v62, %v2409_v40  ;;  %v8184_v5 = vpop.f32.mrb[138].mxu0 }
 0x229   : > { %v2421_v0 = vadd.f32 %v9899_v62, %v8184_v5  ;;  %v2412_v10 = vpop.f32.mrb[139].mxu0  ;;  %v3026_v49 = vmax.f32 %v2418_v37, 0.0 }
 0x22a   : > { %v2413_v15 = vadd.f32 %v9899_v62, %v2412_v10  ;;  %v3024_v12 = vmax.f32 %v2410_v4, 0.0 }
 0x22b   : > { %v3027_v11 = vmax.f32 %v2421_v0, 0.0  ;;  %8290 = vmatmul.mubr.bf16.gmra.mrb[244].mxu0 %v8778_v3 }
 0x22c   : > { %v3025_v13 = vmax.f32 %v2413_v15, 0.0  ;;  %8293 = vmatprep.mubr.bf16.mxu0 %v8779_v6 }
 0x22d   : > { %v10007_v14 = vpack.c.bf16 %v3027_v11, %v3026_v49 }
 0x22e   : > { %v10009_v46 = vpack.c.bf16 %v3025_v13, %v3024_v12  ;;  %v8187_v18 = vpop.f32.mrb[140].mxu0 }
 0x22f   : > { %v2434_v21 = vadd.f32 %v9899_v62, %v8187_v18  ;;  %v2425_v56 = vpop.f32.mrb[141].mxu0 }
 0x230   : > { %v2426_v20 = vadd.f32 %v9899_v62, %v2425_v56  ;;  %v8188_v22 = vpop.f32.mrb[142].mxu0 }
 0x231   : > { %v2437_v54 = vadd.f32 %v9899_v62, %v8188_v22  ;;  %v2428_v25 = vpop.f32.mrb[143].mxu0  ;;  %v3030_v26 = vmax.f32 %v2434_v21, 0.0 }
 0x232   : > { %v2429_v31 = vadd.f32 %v9899_v62, %v2428_v25  ;;  %v3028_v29 = vmax.f32 %v2426_v20, 0.0 }
 0x233   : > { %v3031_v27 = vmax.f32 %v2437_v54, 0.0  ;;  %8294 = vmatmul.mubr.bf16.gmra.mrb[248].mxu0 %v8780_v19 }
 0x234   : > { %v3029_v30 = vmax.f32 %v2429_v31, 0.0  ;;  %8297 = vmatprep.mubr.bf16.mxu0 %v8781_v23 }
 0x235   : > { %v10017_v63 = vpack.c.bf16 %v3031_v27, %v3030_v26 }
 0x236   : > { %v10019_v32 = vpack.c.bf16 %v3029_v30, %v3028_v29  ;;  %v8191_v34 = vpop.f32.mrb[144].mxu0 }
 0x237   : > { %v2450_v39 = vadd.f32 %v9899_v62, %v8191_v34  ;;  %v2441_v35 = vpop.f32.mrb[145].mxu0 }
 0x238   : > { %v2442_v47 = vadd.f32 %v9899_v62, %v2441_v35  ;;  %v8192_v38 = vpop.f32.mrb[146].mxu0 }
 0x239   : > { %v2453_v8 = vadd.f32 %v9899_v62, %v8192_v38  ;;  %v2444_v7 = vpop.f32.mrb[147].mxu0  ;;  %v3034_v17 = vmax.f32 %v2450_v39, 0.0 }
 0x23a   : > { %v2445_v41 = vadd.f32 %v9899_v62, %v2444_v7  ;;  %v3032_v44 = vmax.f32 %v2442_v47, 0.0 }
 0x23b   : > { %v3035_v42 = vmax.f32 %v2453_v8, 0.0  ;;  %8298 = vmatmul.mubr.bf16.gmra.mrb[252].mxu0 %v8782_v36 }
 0x23c   : > { %v3033_v45 = vmax.f32 %v2445_v41, 0.0 }
 0x23d   : > { %v8481_v16 = vpack.c.bf16 %v3035_v42, %v3034_v17  ;;  %v3152_v17 = vld [vmem:[%s11618_s8 + $0x40] sm:$0xff] }
 0x23e   : > { %v8477_v48 = vpack.c.bf16 %v3033_v45, %v3032_v44  ;;  %v8195_v2 = vpop.f32.mrb[148].mxu0 }
 0x23f   : > { %v2466_v50 = vadd.f32 %v9899_v62, %v8195_v2  ;;  %v2457_v51 = vpop.f32.mrb[149].mxu0 }
 0x240   : > { %v2458_v52 = vadd.f32 %v9899_v62, %v2457_v51  ;;  %v8196_v53 = vpop.f32.mrb[150].mxu0  ;;  %8478 = vmatprep.subr.bf16.mxu1 %v8477_v48 }
 0x241   : > { %v2469_v24 = vadd.f32 %v9899_v62, %v8196_v53  ;;  %v2460_v57 = vpop.f32.mrb[151].mxu0  ;;  %8480 = vmatpush3.bf16.msra.mxu1 %v9986_v55  ;;  %v3038_v33 = vmax.f32 %v2466_v50, 0.0 }
 0x242   : > { %v2461_v9 = vadd.f32 %v9899_v62, %v2460_v57  ;;  %8482 = vmatprep.subr.bf16.mxu1 %v8481_v16  ;;  %v3036_v59 = vmax.f32 %v2458_v52, 0.0 }
 0x243   : > { %v3039_v58 = vmax.f32 %v2469_v24, 0.0 }
 0x244   : > { %v3037_v60 = vmax.f32 %v2461_v9, 0.0 }
 0x245   : > { %v8489_v1 = vpack.c.bf16 %v3039_v58, %v3038_v33  ;;  %8484 = vmatpush3.bf16.msra.mxu1 %v9980_v43 }
 0x246   : > { %v8485_v37 = vpack.c.bf16 %v3037_v60, %v3036_v59  ;;  %v8199_v40 = vpop.f32.mrb[152].mxu0 }
 0x247   : > { %v2482_v3 = vadd.f32 %v9899_v62, %v8199_v40  ;;  %v2473_v4 = vpop.f32.mrb[153].mxu0 }
 0x248   : > { %v2474_v5 = vadd.f32 %v9899_v62, %v2473_v4  ;;  %v8200_v6 = vpop.f32.mrb[154].mxu0  ;;  %8486 = vmatprep.subr.bf16.mxu1 %v8485_v37 }
 0x249   : > { %v2485_v55 = vadd.f32 %v9899_v62, %v8200_v6  ;;  %v2476_v0 = vpop.f32.mrb[155].mxu0  ;;  %8488 = vmatpush3.bf16.msra.mxu1 %v9999_v28  ;;  %v3042_v15 = vmax.f32 %v2482_v3, 0.0 }
 0x24a   : > { %v2477_v10 = vadd.f32 %v9899_v62, %v2476_v0  ;;  %8490 = vmatprep.subr.bf16.mxu1 %v8489_v1  ;;  %v3040_v43 = vmax.f32 %v2474_v5, 0.0 }
 0x24b   : > { %v3043_v49 = vmax.f32 %v2485_v55, 0.0 }
 0x24c   : > { %v3041_v11 = vmax.f32 %v2477_v10, 0.0 }
 0x24d   : > { %v8497_v12 = vpack.c.bf16 %v3043_v49, %v3042_v15  ;;  %8492 = vmatpush3.bf16.msra.mxu1 %v9997_v61 }
 0x24e   : > { %v8493_v13 = vpack.c.bf16 %v3041_v11, %v3040_v43  ;;  %v8203_v18 = vpop.f32.mrb[156].mxu0 }
 0x24f   : > { %v2498_v21 = vadd.f32 %v9899_v62, %v8203_v18  ;;  %v2489_v56 = vpop.f32.mrb[157].mxu0 }
 0x250   : > { %v2490_v19 = vadd.f32 %v9899_v62, %v2489_v56  ;;  %v8204_v20 = vpop.f32.mrb[158].mxu0  ;;  %8494 = vmatprep.subr.bf16.mxu1 %v8493_v13 }
 0x251   : > { %v2501_v28 = vadd.f32 %v9899_v62, %v8204_v20  ;;  %v2492_v22 = vpop.f32.mrb[159].mxu0  ;;  %8496 = vmatpush3.bf16.msra.mxu1 %v10009_v46  ;;  %v3046_v54 = vmax.f32 %v2498_v21, 0.0 }
 0x252   : > { %v2493_v23 = vadd.f32 %v9899_v62, %v2492_v22  ;;  %8498 = vmatprep.subr.bf16.mxu1 %v8497_v12  ;;  %v3044_v61 = vmax.f32 %v2490_v19, 0.0 }
 0x253   : > { %v3047_v25 = vmax.f32 %v2501_v28, 0.0 }
 0x254   : > { %v3045_v31 = vmax.f32 %v2493_v23, 0.0 }
 0x255   : > { %v8505_v26 = vpack.c.bf16 %v3047_v25, %v3046_v54  ;;  %8500 = vmatpush3.bf16.msra.mxu1 %v10007_v14 }
 0x256   : > { %v8501_v27 = vpack.c.bf16 %v3045_v31, %v3044_v61  ;;  %v8207_v29 = vpop.f32.mrb[160].mxu0 }
 0x257   : > { %v2514_v30 = vadd.f32 %v9899_v62, %v8207_v29  ;;  %v2505_v34 = vpop.f32.mrb[161].mxu0 }
 0x258   : > { %v2506_v39 = vadd.f32 %v9899_v62, %v2505_v34  ;;  %v8208_v35 = vpop.f32.mrb[162].mxu0  ;;  %8502 = vmatprep.subr.bf16.mxu1 %v8501_v27 }
 0x259   : > { %v2517_v46 = vadd.f32 %v9899_v62, %v8208_v35  ;;  %v2508_v36 = vpop.f32.mrb[163].mxu0  ;;  %8504 = vmatpush3.bf16.msra.mxu1 %v10019_v32  ;;  %v3050_v38 = vmax.f32 %v2514_v30, 0.0  ;;  %v3155_v32 = vld [vmem:[%s11618_s8 + $0x58] sm:$0xff] }
 0x25a   : > { %v2509_v47 = vadd.f32 %v9899_v62, %v2508_v36  ;;  %8506 = vmatprep.subr.bf16.mxu1 %v8505_v26  ;;  %v3048_v14 = vmax.f32 %v2506_v39, 0.0 }
 0x25b   : > { %v3051_v8 = vmax.f32 %v2517_v46, 0.0 }
 0x25c   : > { %v3049_v7 = vmax.f32 %v2509_v47, 0.0 }
 0x25d   : > { %v10049_v41 = vpack.c.bf16 %v3051_v8, %v3050_v38  ;;  %8508 = vmatpush3.bf16.msra.mxu1 %v10017_v63 }
 0x25e   : > { %v10055_v42 = vpack.c.bf16 %v3049_v7, %v3048_v14  ;;  %v8211_v44 = vpop.f32.mrb[164].mxu0 }
 0x25f   : > { %v2530_v45 = vadd.f32 %v9899_v62, %v8211_v44  ;;  %v2521_v16 = vpop.f32.mrb[165].mxu0 }
 0x260   : > { %v2522_v48 = vadd.f32 %v9899_v62, %v2521_v16  ;;  %v8212_v2 = vpop.f32.mrb[166].mxu0  ;;  %3505 = vmatmul.mubr.f32.vlgmr.msra.gmra.mrb[8].mxu1 %v3152_v17 }
 0x261   : > { %v2533_v63 = vadd.f32 %v9899_v62, %v8212_v2  ;;  %v2524_v50 = vpop.f32.mrb[167].mxu0  ;;  %3574 = vmatprep.mubr.f32.mxu1 %v3155_v32  ;;  %v3054_v52 = vmax.f32 %v2530_v45, 0.0 }
 0x262   : > { %v2525_v51 = vadd.f32 %v9899_v62, %v2524_v50  ;;  %v3052_v24 = vmax.f32 %v2522_v48, 0.0 }
 0x263   : > { %v3055_v53 = vmax.f32 %v2533_v63, 0.0 }
 0x264   : > { %v3053_v57 = vmax.f32 %v2525_v51, 0.0 }
 0x265   : > { %v10064_v9 = vpack.c.bf16 %v3055_v53, %v3054_v52 }
 0x266   : > { %v10066_v33 = vpack.c.bf16 %v3053_v57, %v3052_v24  ;;  %v8215_v58 = vpop.f32.mrb[168].mxu0 }
 0x267   : > { %v2546_v59 = vadd.f32 %v9899_v62, %v8215_v58  ;;  %v2537_v60 = vpop.f32.mrb[169].mxu0 }
 0x268   : > { %v2538_v1 = vadd.f32 %v9899_v62, %v2537_v60  ;;  %v8216_v37 = vpop.f32.mrb[170].mxu0 }
 0x269   : > { %v2549_v40 = vadd.f32 %v9899_v62, %v8216_v37  ;;  %v2540_v3 = vpop.f32.mrb[171].mxu0  ;;  %v3058_v5 = vmax.f32 %v2546_v59, 0.0 }
 0x26a   : > { %v2541_v4 = vadd.f32 %v9899_v62, %v2540_v3  ;;  %v3056_v55 = vmax.f32 %v2538_v1, 0.0 }
 0x26b   : > { %v3059_v6 = vmax.f32 %v2549_v40, 0.0 }
 0x26c   : > { %v3057_v0 = vmax.f32 %v2541_v4, 0.0 }
 0x26d   : > { %v10072_v10 = vpack.c.bf16 %v3059_v6, %v3058_v5 }
 0x26e   : > { %v10074_v15 = vpack.c.bf16 %v3057_v0, %v3056_v55  ;;  %v8219_v49 = vpop.f32.mrb[172].mxu0 }
 0x26f   : > { %v2562_v43 = vadd.f32 %v9899_v62, %v8219_v49  ;;  %v2553_v11 = vpop.f32.mrb[173].mxu0 }
 0x270   : > { %v2554_v12 = vadd.f32 %v9899_v62, %v2553_v11  ;;  %v8220_v13 = vpop.f32.mrb[174].mxu0 }
 0x271   : > { %v2565_v18 = vadd.f32 %v9899_v62, %v8220_v13  ;;  %v2556_v21 = vpop.f32.mrb[175].mxu0  ;;  %v3062_v19 = vmax.f32 %v2562_v43, 0.0 }
 0x272   : > { %v2557_v56 = vadd.f32 %v9899_v62, %v2556_v21  ;;  %v3060_v28 = vmax.f32 %v2554_v12, 0.0  ;;  %v7743_v12 = vpop.f32.mrb[0].mxu1 }
 0x273   : > { %v3063_v20 = vmax.f32 %v2565_v18, 0.0  ;;  %v7744_v18 = vpop.f32.mrb[1].mxu1 }
 0x274   : > { %v3061_v22 = vmax.f32 %v2557_v56, 0.0  ;;  %v7778_v56 = vpop.f32.mrb[2].mxu1 }
 0x275   : > { %v10080_v23 = vpack.c.bf16 %v3063_v20, %v3062_v19 }
 0x276   : > { %v10082_v54 = vpack.c.bf16 %v3061_v22, %v3060_v28  ;;  %v8223_v25 = vpop.f32.mrb[176].mxu0  ;;  %v7779_v28 = vpop.f32.mrb[3].mxu1 }
 0x277   : > { %v2578_v61 = vadd.f32 %v9899_v62, %v8223_v25  ;;  %v2569_v31 = vpop.f32.mrb[177].mxu0  ;;  %v7745_v25 = vadd.f32 %v7744_v18, %v7743_v12 }
 0x278   : > { %v2570_v26 = vadd.f32 %v9899_v62, %v2569_v31  ;;  %v8224_v27 = vpop.f32.mrb[178].mxu0 }
 0x279   : > { %v2581_v29 = vadd.f32 %v9899_v62, %v8224_v27  ;;  %v2572_v30 = vpop.f32.mrb[179].mxu0  ;;  %v3066_v39 = vmax.f32 %v2578_v61, 0.0  ;;  %v7780_v61 = vadd.f32 %v7779_v28, %v7778_v56 }
 0x27a   : > { %v2573_v34 = vadd.f32 %v9899_v62, %v2572_v30  ;;  %v3064_v46 = vmax.f32 %v2570_v26, 0.0 }
 0x27b   : > { %v3067_v35 = vmax.f32 %v2581_v29, 0.0  ;;  %v10107_v29 = vadd.f32 %v7780_v61, %v7745_v25 }
 0x27c   : > { %v3065_v36 = vmax.f32 %v2573_v34, 0.0 }
 0x27d   : > { %v8513_v47 = vpack.c.bf16 %v3067_v35, %v3066_v39 }
 0x27e   : > { %v8509_v38 = vpack.c.bf16 %v3065_v36, %v3064_v46  ;;  %v8227_v8 = vpop.f32.mrb[180].mxu0 }
 0x27f   : > { %v2594_v14 = vadd.f32 %v9899_v62, %v8227_v8  ;;  %v2585_v7 = vpop.f32.mrb[181].mxu0 }
 0x280   : > { %v2586_v17 = vadd.f32 %v9899_v62, %v2585_v7  ;;  %v8228_v44 = vpop.f32.mrb[182].mxu0  ;;  %8510 = vmatprep.subr.bf16.mxu1 %v8509_v38 }
 0x281   : > { %v2597_v32 = vadd.f32 %v9899_v62, %v8228_v44  ;;  %v2588_v45 = vpop.f32.mrb[183].mxu0  ;;  %8512 = vmatpush3.bf16.msra.mxu1 %v10055_v42  ;;  %v3070_v48 = vmax.f32 %v2594_v14, 0.0  ;;  %v3154_v14 = vld [vmem:[%s11618_s8 + $0x50] sm:$0xff] }
 0x282   : > { %v2589_v16 = vadd.f32 %v9899_v62, %v2588_v45  ;;  %8514 = vmatprep.subr.bf16.mxu1 %v8513_v47  ;;  %v3068_v63 = vmax.f32 %v2586_v17, 0.0 }
 0x283   : > { %v3071_v2 = vmax.f32 %v2597_v32, 0.0 }
 0x284   : > { %v3069_v50 = vmax.f32 %v2589_v16, 0.0 }
 0x285   : > { %v8521_v51 = vpack.c.bf16 %v3071_v2, %v3070_v48  ;;  %8516 = vmatpush3.bf16.msra.mxu1 %v10049_v41 }
 0x286   : > { %v8517_v52 = vpack.c.bf16 %v3069_v50, %v3068_v63  ;;  %v8231_v53 = vpop.f32.mrb[184].mxu0 }
 0x287   : > { %v2610_v24 = vadd.f32 %v9899_v62, %v8231_v53  ;;  %v2601_v57 = vpop.f32.mrb[185].mxu0 }
 0x288   : > { %v2602_v58 = vadd.f32 %v9899_v62, %v2601_v57  ;;  %v8232_v59 = vpop.f32.mrb[186].mxu0  ;;  %8518 = vmatprep.subr.bf16.mxu1 %v8517_v52 }
 0x289   : > { %v2613_v42 = vadd.f32 %v9899_v62, %v8232_v59  ;;  %v2604_v60 = vpop.f32.mrb[187].mxu0  ;;  %8520 = vmatpush3.bf16.msra.mxu1 %v10066_v33  ;;  %v3074_v37 = vmax.f32 %v2610_v24, 0.0 }
 0x28a   : > { %v2605_v1 = vadd.f32 %v9899_v62, %v2604_v60  ;;  %8522 = vmatprep.subr.bf16.mxu1 %v8521_v51  ;;  %v3072_v41 = vmax.f32 %v2602_v58, 0.0 }
 0x28b   : > { %v3075_v40 = vmax.f32 %v2613_v42, 0.0 }
 0x28c   : > { %v3073_v3 = vmax.f32 %v2605_v1, 0.0 }
 0x28d   : > { %v8529_v4 = vpack.c.bf16 %v3075_v40, %v3074_v37  ;;  %8524 = vmatpush3.bf16.msra.mxu1 %v10064_v9 }
 0x28e   : > { %v8525_v5 = vpack.c.bf16 %v3073_v3, %v3072_v41  ;;  %v8235_v6 = vpop.f32.mrb[188].mxu0 }
 0x28f   : > { %v2626_v55 = vadd.f32 %v9899_v62, %v8235_v6  ;;  %v2617_v0 = vpop.f32.mrb[189].mxu0 }
 0x290   : > { %v2618_v49 = vadd.f32 %v9899_v62, %v2617_v0  ;;  %v8236_v43 = vpop.f32.mrb[190].mxu0  ;;  %8526 = vmatprep.subr.bf16.mxu1 %v8525_v5 }
 0x291   : > { %v2629_v33 = vadd.f32 %v9899_v62, %v8236_v43  ;;  %v2620_v11 = vpop.f32.mrb[191].mxu0  ;;  %8528 = vmatpush3.bf16.msra.mxu1 %v10074_v15  ;;  %v3078_v9 = vmax.f32 %v2626_v55, 0.0 }
 0x292   : > { %v2621_v13 = vadd.f32 %v9899_v62, %v2620_v11  ;;  %8530 = vmatprep.subr.bf16.mxu1 %v8529_v4  ;;  %v3076_v19 = vmax.f32 %v2618_v49, 0.0 }
 0x293   : > { %v3079_v21 = vmax.f32 %v2629_v33, 0.0 }
 0x294   : > { %v3077_v20 = vmax.f32 %v2621_v13, 0.0 }
 0x295   : > { %v8537_v22 = vpack.c.bf16 %v3079_v21, %v3078_v9  ;;  %8532 = vmatpush3.bf16.msra.mxu1 %v10072_v10 }
 0x296   : > { %v8533_v31 = vpack.c.bf16 %v3077_v20, %v3076_v19  ;;  %v8239_v26 = vpop.f32.mrb[192].mxu0 }
 0x297   : > { %v2642_v15 = vadd.f32 %v9899_v62, %v8239_v26  ;;  %v2633_v27 = vpop.f32.mrb[193].mxu0 }
 0x298   : > { %v2634_v30 = vadd.f32 %v9899_v62, %v2633_v27  ;;  %v8240_v34 = vpop.f32.mrb[194].mxu0  ;;  %8534 = vmatprep.subr.bf16.mxu1 %v8533_v31 }
 0x299   : > { %v2645_v39 = vadd.f32 %v9899_v62, %v8240_v34  ;;  %v2636_v35 = vpop.f32.mrb[195].mxu0  ;;  %8536 = vmatpush3.bf16.msra.mxu1 %v10082_v54  ;;  %v3082_v46 = vmax.f32 %v2642_v15, 0.0  ;;  %v3157_v54 = vld [vmem:[%s11618_s8 + $0x68] sm:$0xff] }
 0x29a   : > { %v2637_v10 = vadd.f32 %v9899_v62, %v2636_v35  ;;  %8538 = vmatprep.subr.bf16.mxu1 %v8537_v22  ;;  %v3080_v47 = vmax.f32 %v2634_v30, 0.0  ;;  %v10155_v30 = vld [vmem:[%s11620_s29] ss:$0 sm:$0xff] }
 0x29b   : > { %v3083_v36 = vmax.f32 %v2645_v39, 0.0 }
 0x29c   : > { %v3081_v38 = vmax.f32 %v2637_v10, 0.0 }
 0x29d   : > { %v10113_v8 = vpack.c.bf16 %v3083_v36, %v3082_v46  ;;  %8540 = vmatpush3.bf16.msra.mxu1 %v10080_v23 }
 0x29e   : > { %v10119_v7 = vpack.c.bf16 %v3081_v38, %v3080_v47  ;;  %v8243_v17 = vpop.f32.mrb[196].mxu0 }
 0x29f   : > { %v2658_v44 = vadd.f32 %v9899_v62, %v8243_v17  ;;  %v2649_v32 = vpop.f32.mrb[197].mxu0 }
 0x2a0   : > { %v2650_v45 = vadd.f32 %v9899_v62, %v2649_v32  ;;  %v8244_v16 = vpop.f32.mrb[198].mxu0  ;;  %3575 = vmatmul.mubr.f32.vlgmr.msra.gmra.mrb[10].mxu1 %v3154_v14 }
 0x2a1   : > { %v2661_v23 = vadd.f32 %v9899_v62, %v8244_v16  ;;  %v2652_v48 = vpop.f32.mrb[199].mxu0  ;;  %3644 = vmatprep.mubr.f32.mxu1 %v3157_v54  ;;  %v3086_v63 = vmax.f32 %v2658_v44, 0.0 }
 0x2a2   : > { %v2653_v2 = vadd.f32 %v9899_v62, %v2652_v48  ;;  %v3084_v51 = vmax.f32 %v2650_v45, 0.0 }
 0x2a3   : > { %v3087_v50 = vmax.f32 %v2661_v23, 0.0 }
 0x2a4   : > { %v3085_v52 = vmax.f32 %v2653_v2, 0.0 }
 0x2a5   : > { %v10128_v53 = vpack.c.bf16 %v3087_v50, %v3086_v63 }
 0x2a6   : > { %v10130_v24 = vpack.c.bf16 %v3085_v52, %v3084_v51  ;;  %v8247_v57 = vpop.f32.mrb[200].mxu0 }
 0x2a7   : > { %v2674_v58 = vadd.f32 %v9899_v62, %v8247_v57  ;;  %v2665_v59 = vpop.f32.mrb[201].mxu0 }
 0x2a8   : > { %v2666_v42 = vadd.f32 %v9899_v62, %v2665_v59  ;;  %v8248_v60 = vpop.f32.mrb[202].mxu0 }
 0x2a9   : > { %v2677_v1 = vadd.f32 %v9899_v62, %v8248_v60  ;;  %v2668_v37 = vpop.f32.mrb[203].mxu0  ;;  %v3090_v41 = vmax.f32 %v2674_v58, 0.0 }
 0x2aa   : > { %v2669_v40 = vadd.f32 %v9899_v62, %v2668_v37  ;;  %v3088_v4 = vmax.f32 %v2666_v42, 0.0 }
 0x2ab   : > { %v3091_v3 = vmax.f32 %v2677_v1, 0.0 }
 0x2ac   : > { %v3089_v5 = vmax.f32 %v2669_v40, 0.0 }
 0x2ad   : > { %v10136_v6 = vpack.c.bf16 %v3091_v3, %v3090_v41 }
 0x2ae   : > { %v10138_v55 = vpack.c.bf16 %v3089_v5, %v3088_v4  ;;  %v8251_v0 = vpop.f32.mrb[204].mxu0 }
 0x2af   : > { %v2690_v49 = vadd.f32 %v9899_v62, %v8251_v0  ;;  %v2681_v43 = vpop.f32.mrb[205].mxu0 }
 0x2b0   : > { %v2682_v33 = vadd.f32 %v9899_v62, %v2681_v43  ;;  %v8252_v11 = vpop.f32.mrb[206].mxu0 }
 0x2b1   : > { %v2693_v12 = vadd.f32 %v9899_v62, %v8252_v11  ;;  %v2684_v13 = vpop.f32.mrb[207].mxu0  ;;  %v3094_v9 = vmax.f32 %v2690_v49, 0.0 }
 0x2b2   : > { %v2685_v18 = vadd.f32 %v9899_v62, %v2684_v13  ;;  %v3092_v19 = vmax.f32 %v2682_v33, 0.0 }
 0x2b3   : > { %v3095_v21 = vmax.f32 %v2693_v12, 0.0  ;;  %v7813_v56 = vpop.f32.mrb[4].mxu1 }
 0x2b4   : > { %v3093_v20 = vmax.f32 %v2685_v18, 0.0  ;;  %v7814_v28 = vpop.f32.mrb[5].mxu1 }
 0x2b5   : > { %v10144_v22 = vpack.c.bf16 %v3095_v21, %v3094_v9  ;;  %v7815_v25 = vadd.f32 %v7814_v28, %v7813_v56 }
 0x2b6   : > { %v10146_v61 = vpack.c.bf16 %v3093_v20, %v3092_v19  ;;  %v8255_v31 = vpop.f32.mrb[208].mxu0 }
 0x2b7   : > { %v2706_v26 = vadd.f32 %v9899_v62, %v8255_v31  ;;  %v2697_v15 = vpop.f32.mrb[209].mxu0  ;;  %v10150_v27 = vadd.f32 %v7815_v25, %v10107_v29 }
 0x2b8   : > { %v2698_v34 = vadd.f32 %v10155_v30, %v2697_v15  ;;  %v8256_v39 = vpop.f32.mrb[210].mxu0 }
 0x2b9   : > { %v2709_v35 = vadd.f32 %v10155_v30, %v8256_v39  ;;  %v2700_v10 = vpop.f32.mrb[211].mxu0  ;;  %v3098_v36 = vmax.f32 %v2706_v26, 0.0 }
 0x2ba   : > { %v2701_v46 = vadd.f32 %v10155_v30, %v2700_v10  ;;  %v3096_v62 = vmax.f32 %v2698_v34, 0.0 }
 0x2bb   : > { %v3099_v47 = vmax.f32 %v2709_v35, 0.0 }
 0x2bc   : > { %v3097_v38 = vmax.f32 %v2701_v46, 0.0 }
 0x2bd   : > { %v8545_v14 = vpack.c.bf16 %v3099_v47, %v3098_v36  ;;  %v3156_v47 = vld [vmem:[%s11618_s8 + $0x60] sm:$0xff] }
 0x2be   : > { %v8541_v29 = vpack.c.bf16 %v3097_v38, %v3096_v62  ;;  %v8259_v17 = vpop.f32.mrb[212].mxu0 }
 0x2bf   : > { %v2722_v54 = vadd.f32 %v10155_v30, %v8259_v17  ;;  %v2713_v44 = vpop.f32.mrb[213].mxu0 }
 0x2c0   : > { %v2714_v32 = vadd.f32 %v10155_v30, %v2713_v44  ;;  %v8260_v45 = vpop.f32.mrb[214].mxu0  ;;  %8542 = vmatprep.subr.bf16.mxu1 %v8541_v29 }
 0x2c1   : > { %v2725_v16 = vadd.f32 %v10155_v30, %v8260_v45  ;;  %v2716_v23 = vpop.f32.mrb[215].mxu0  ;;  %8544 = vmatpush3.bf16.msra.mxu1 %v10119_v7  ;;  %v3102_v2 = vmax.f32 %v2722_v54, 0.0 }
 0x2c2   : > { %v2717_v48 = vadd.f32 %v10155_v30, %v2716_v23  ;;  %8546 = vmatprep.subr.bf16.mxu1 %v8545_v14  ;;  %v3100_v50 = vmax.f32 %v2714_v32, 0.0 }
 0x2c3   : > { %v3103_v63 = vmax.f32 %v2725_v16, 0.0 }
 0x2c4   : > { %v3101_v51 = vmax.f32 %v2717_v48, 0.0 }
 0x2c5   : > { %v8553_v52 = vpack.c.bf16 %v3103_v63, %v3102_v2  ;;  %8548 = vmatpush3.bf16.msra.mxu1 %v10113_v8 }
 0x2c6   : > { %v8549_v57 = vpack.c.bf16 %v3101_v51, %v3100_v50  ;;  %v8263_v58 = vpop.f32.mrb[216].mxu0 }
 0x2c7   : > { %v2738_v59 = vadd.f32 %v10155_v30, %v8263_v58  ;;  %v2729_v42 = vpop.f32.mrb[217].mxu0 }
 0x2c8   : > { %v2730_v60 = vadd.f32 %v10155_v30, %v2729_v42  ;;  %v8264_v1 = vpop.f32.mrb[218].mxu0  ;;  %8550 = vmatprep.subr.bf16.mxu1 %v8549_v57 }
 0x2c9   : > { %v2741_v7 = vadd.f32 %v10155_v30, %v8264_v1  ;;  %v2732_v37 = vpop.f32.mrb[219].mxu0  ;;  %8552 = vmatpush3.bf16.msra.mxu1 %v10130_v24  ;;  %v3106_v41 = vmax.f32 %v2738_v59, 0.0 }
 0x2ca   : > { %v2733_v40 = vadd.f32 %v10155_v30, %v2732_v37  ;;  %8554 = vmatprep.subr.bf16.mxu1 %v8553_v52  ;;  %v3104_v8 = vmax.f32 %v2730_v60, 0.0 }
 0x2cb   : > { %v3107_v3 = vmax.f32 %v2741_v7, 0.0 }
 0x2cc   : > { %v3105_v4 = vmax.f32 %v2733_v40, 0.0 }
 0x2cd   : > { %v8561_v5 = vpack.c.bf16 %v3107_v3, %v3106_v41  ;;  %8556 = vmatpush3.bf16.msra.mxu1 %v10128_v53 }
 0x2ce   : > { %v8557_v0 = vpack.c.bf16 %v3105_v4, %v3104_v8  ;;  %v8267_v49 = vpop.f32.mrb[220].mxu0 }
 0x2cf   : > { %v2754_v43 = vadd.f32 %v10155_v30, %v8267_v49  ;;  %v2745_v33 = vpop.f32.mrb[221].mxu0 }
 0x2d0   : > { %v2746_v11 = vadd.f32 %v10155_v30, %v2745_v33  ;;  %v8268_v12 = vpop.f32.mrb[222].mxu0  ;;  %8558 = vmatprep.subr.bf16.mxu1 %v8557_v0 }
 0x2d1   : > { %v2757_v24 = vadd.f32 %v10155_v30, %v8268_v12  ;;  %v2748_v13 = vpop.f32.mrb[223].mxu0  ;;  %8560 = vmatpush3.bf16.msra.mxu1 %v10138_v55  ;;  %v3110_v9 = vmax.f32 %v2754_v43, 0.0 }
 0x2d2   : > { %v2749_v18 = vadd.f32 %v10155_v30, %v2748_v13  ;;  %8562 = vmatprep.subr.bf16.mxu1 %v8561_v5  ;;  %v3108_v53 = vmax.f32 %v2746_v11, 0.0 }
 0x2d3   : > { %v3111_v21 = vmax.f32 %v2757_v24, 0.0 }
 0x2d4   : > { %v3109_v56 = vmax.f32 %v2749_v18, 0.0 }
 0x2d5   : > { %v8569_v19 = vpack.c.bf16 %v3111_v21, %v3110_v9  ;;  %8564 = vmatpush3.bf16.msra.mxu1 %v10136_v6 }
 0x2d6   : > { %v8565_v20 = vpack.c.bf16 %v3109_v56, %v3108_v53  ;;  %v8271_v28 = vpop.f32.mrb[224].mxu0 }
 0x2d7   : > { %v2770_v25 = vadd.f32 %v10155_v30, %v8271_v28  ;;  %v2761_v31 = vpop.f32.mrb[225].mxu0 }
 0x2d8   : > { %v2762_v26 = vadd.f32 %v10155_v30, %v2761_v31  ;;  %v8272_v15 = vpop.f32.mrb[226].mxu0  ;;  %8566 = vmatprep.subr.bf16.mxu1 %v8565_v20 }
 0x2d9   : > { %v2773_v55 = vadd.f32 %v10155_v30, %v8272_v15  ;;  %v2764_v34 = vpop.f32.mrb[227].mxu0  ;;  %8568 = vmatpush3.bf16.msra.mxu1 %v10146_v61  ;;  %v3114_v35 = vmax.f32 %v2770_v25, 0.0  ;;  %v3159_v61 = vld [vmem:[%s11618_s8 + $0x78] sm:$0xff] }
 0x2da   : > { %v2765_v39 = vadd.f32 %v10155_v30, %v2764_v34  ;;  %8570 = vmatprep.subr.bf16.mxu1 %v8569_v19  ;;  %v3112_v6 = vmax.f32 %v2762_v26, 0.0 }
 0x2db   : > { %v3115_v10 = vmax.f32 %v2773_v55, 0.0 }
 0x2dc   : > { %v3113_v46 = vmax.f32 %v2765_v39, 0.0 }
 0x2dd   : > { %v10183_v36 = vpack.c.bf16 %v3115_v10, %v3114_v35  ;;  %8572 = vmatpush3.bf16.msra.mxu1 %v10144_v22 }
 0x2de   : > { %v10189_v62 = vpack.c.bf16 %v3113_v46, %v3112_v6  ;;  %v8275_v38 = vpop.f32.mrb[228].mxu0 }
 0x2df   : > { %v2786_v14 = vadd.f32 %v10155_v30, %v8275_v38  ;;  %v2777_v29 = vpop.f32.mrb[229].mxu0 }
 0x2e0   : > { %v2778_v17 = vadd.f32 %v10155_v30, %v2777_v29  ;;  %v8276_v54 = vpop.f32.mrb[230].mxu0  ;;  %3645 = vmatmul.mubr.f32.vlgmr.msra.gmra.mrb[12].mxu1 %v3156_v47 }
 0x2e1   : > { %v2789_v22 = vadd.f32 %v10155_v30, %v8276_v54  ;;  %v2780_v44 = vpop.f32.mrb[231].mxu0  ;;  %3714 = vmatprep.mubr.f32.mxu1 %v3159_v61  ;;  %v3118_v45 = vmax.f32 %v2786_v14, 0.0 }
 0x2e2   : > { %v2781_v32 = vadd.f32 %v10155_v30, %v2780_v44  ;;  %v3116_v23 = vmax.f32 %v2778_v17, 0.0 }
 0x2e3   : > { %v3119_v16 = vmax.f32 %v2789_v22, 0.0 }
 0x2e4   : > { %v3117_v48 = vmax.f32 %v2781_v32, 0.0 }
 0x2e5   : > { %v10198_v2 = vpack.c.bf16 %v3119_v16, %v3118_v45 }
 0x2e6   : > { %v10200_v63 = vpack.c.bf16 %v3117_v48, %v3116_v23  ;;  %v8279_v50 = vpop.f32.mrb[232].mxu0 }
 0x2e7   : > { %v2802_v51 = vadd.f32 %v10155_v30, %v8279_v50  ;;  %v2793_v52 = vpop.f32.mrb[233].mxu0 }
 0x2e8   : > { %v2794_v57 = vadd.f32 %v10155_v30, %v2793_v52  ;;  %v8280_v58 = vpop.f32.mrb[234].mxu0 }
 0x2e9   : > { %v2805_v59 = vadd.f32 %v10155_v30, %v8280_v58  ;;  %v2796_v42 = vpop.f32.mrb[235].mxu0  ;;  %v3122_v1 = vmax.f32 %v2802_v51, 0.0 }
 0x2ea   : > { %v2797_v60 = vadd.f32 %v10155_v30, %v2796_v42  ;;  %v3120_v37 = vmax.f32 %v2794_v57, 0.0 }
 0x2eb   : > { %v3123_v7 = vmax.f32 %v2805_v59, 0.0 }
 0x2ec   : > { %v3121_v40 = vmax.f32 %v2797_v60, 0.0 }
 0x2ed   : > { %v10206_v41 = vpack.c.bf16 %v3123_v7, %v3122_v1 }
 0x2ee   : > { %v10208_v3 = vpack.c.bf16 %v3121_v40, %v3120_v37  ;;  %v8283_v8 = vpop.f32.mrb[236].mxu0 }
 0x2ef   : > { %v2818_v4 = vadd.f32 %v10155_v30, %v8283_v8  ;;  %v2809_v5 = vpop.f32.mrb[237].mxu0 }
 0x2f0   : > { %v2810_v0 = vadd.f32 %v10155_v30, %v2809_v5  ;;  %v8284_v49 = vpop.f32.mrb[238].mxu0 }
 0x2f1   : > { %v2821_v43 = vadd.f32 %v10155_v30, %v8284_v49  ;;  %v2812_v33 = vpop.f32.mrb[239].mxu0  ;;  %v3126_v12 = vmax.f32 %v2818_v4, 0.0 }
 0x2f2   : > { %v2813_v11 = vadd.f32 %v10155_v30, %v2812_v33  ;;  %v3124_v18 = vmax.f32 %v2810_v0, 0.0 }
 0x2f3   : > { %v3127_v24 = vmax.f32 %v2821_v43, 0.0  ;;  %v7848_v13 = vpop.f32.mrb[6].mxu1 }
 0x2f4   : > { %v3125_v9 = vmax.f32 %v2813_v11, 0.0  ;;  %v7849_v21 = vpop.f32.mrb[7].mxu1 }
 0x2f5   : > { %v10214_v53 = vpack.c.bf16 %v3127_v24, %v3126_v12  ;;  %v7850_v56 = vadd.f32 %v7849_v21, %v7848_v13 }
 0x2f6   : > { %v10216_v19 = vpack.c.bf16 %v3125_v9, %v3124_v18  ;;  %v8287_v20 = vpop.f32.mrb[240].mxu0 }
 0x2f7   : > { %v2834_v28 = vadd.f32 %v10155_v30, %v8287_v20  ;;  %v2825_v25 = vpop.f32.mrb[241].mxu0  ;;  %v10220_v31 = vadd.f32 %v7850_v56, %v10150_v27 }
 0x2f8   : > { %v2826_v26 = vadd.f32 %v10155_v30, %v2825_v25  ;;  %v8288_v15 = vpop.f32.mrb[242].mxu0  ;;  %v8791_v25 = vld [vmem:[%s11621_s30 + $0x24] ss:$8 sps:$4 sm:$0xff]  }
 0x2f9   : > { %v2837_v55 = vadd.f32 %v10155_v30, %v8288_v15  ;;  %v2828_v34 = vpop.f32.mrb[243].mxu0  ;;  %v3130_v35 = vmax.f32 %v2834_v28, 0.0  ;;  %v8786_v28 = vld [vmem:[%s11621_s30 + $0x10] ss:$8 sps:$4 sm:$0xff]  }
 0x2fa   : > { %v2829_v39 = vadd.f32 %v10155_v30, %v2828_v34  ;;  %v3128_v6 = vmax.f32 %v2826_v26, 0.0  ;;  %v8794_v26 = vld [vmem:[%s11621_s30 + $0x34] ss:$8 sps:$4 sm:$0xff]   ;;  %v8792_v15 = vld [vmem:[%s11621_s30 + $0x30] ss:$8 sps:$4 sm:$0xff]  }
 0x2fb   : > { %v3131_v10 = vmax.f32 %v2837_v55, 0.0  ;;  %v8797_v55 = vld [vmem:[%s11621_s30 + $0x44] ss:$8 sps:$4 sm:$0xff]   ;;  %v8795_v34 = vld [vmem:[%s11621_s30 + $0x40] ss:$8 sps:$4 sm:$0xff]  }
 0x2fc   : > { %v3129_v46 = vmax.f32 %v2829_v39, 0.0  ;;  %v8800_v39 = vld [vmem:[%s11621_s30 + $0x54] ss:$8 sps:$4 sm:$0xff]  }
 0x2fd   : > { %v8577_v47 = vpack.c.bf16 %v3131_v10, %v3130_v35  ;;  %v8798_v35 = vld [vmem:[%s11621_s30 + $0x50] ss:$8 sps:$4 sm:$0xff]   ;;  %v8803_v10 = vld [vmem:[%s11621_s30 + $0x64] ss:$8 sps:$4 sm:$0xff]  }
 0x2fe   : > { %v8573_v38 = vpack.c.bf16 %v3129_v46, %v3128_v6  ;;  %v8291_v61 = vpop.f32.mrb[244].mxu0  ;;  %v8801_v6 = vld [vmem:[%s11621_s30 + $0x60] ss:$8 sps:$4 sm:$0xff]  }
 0x2ff   : > { %v2850_v14 = vadd.f32 %v10155_v30, %v8291_v61  ;;  %v2841_v29 = vpop.f32.mrb[245].mxu0  ;;  %v8806_v61 = vld [vmem:[%s11621_s30 + $0x74] ss:$8 sps:$4 sm:$0xff]  }
 0x300   : > { %v2842_v27 = vadd.f32 %v10155_v30, %v2841_v29  ;;  %v8292_v17 = vpop.f32.mrb[246].mxu0  ;;  %8574 = vmatprep.subr.bf16.mxu1 %v8573_v38 }
 0x301   : > { %v2853_v54 = vadd.f32 %v10155_v30, %v8292_v17  ;;  %v2844_v22 = vpop.f32.mrb[247].mxu0  ;;  %8576 = vmatpush3.bf16.msra.mxu1 %v10189_v62  ;;  %v3134_v32 = vmax.f32 %v2850_v14, 0.0  ;;  %v8804_v14 = vld [vmem:[%s11621_s30 + $0x70] ss:$8 sps:$4 sm:$0xff]   ;;  %v8809_v17 = vld [vmem:[%s11622_s24 + $0x4] ss:$16 sps:$4 sm:$0xff]  }
 0x302   : > { %v2845_v44 = vadd.f32 %v10155_v30, %v2844_v22  ;;  %8578 = vmatprep.subr.bf16.mxu1 %v8577_v47  ;;  %v3132_v16 = vmax.f32 %v2842_v27, 0.0  ;;  %v9393_v27 = vmov 0   ;;  %v8812_v22 = vld [vmem:[%s11623_s2 + $0xc] ss:$16 sps:$4 sm:$0xff]  }
 0x303   : > { %v3135_v45 = vmax.f32 %v2853_v54, 0.0  ;;  %v8810_v54 = vld [vmem:[%s11623_s2 + $0x8] ss:$16 sps:$4 sm:$0xff]   ;;  %4809 = vmatprep.subr.bf16.mxu0 %v8812_v22  ;;  %v8896_v22 = vld [vmem:[%s11623_s2 + $0x1cc] ss:$16 sps:$4 sm:$0xff]  }
 0x304   : > { %v3133_v23 = vmax.f32 %v2845_v44, 0.0  ;;  %v8818_v44 = vld [vmem:[%s11623_s2 + $0x2c] ss:$16 sps:$4 sm:$0xff]   ;;  %4810 = vmatpush1.bf16.msra.mxu0 %v8810_v54  ;;  %v8893_v54 = vld [vmem:[%s11622_s24 + $0x1c4] ss:$16 sps:$4 sm:$0xff]  }
 0x305   : > { %v8585_v48 = vpack.c.bf16 %v3135_v45, %v3134_v32  ;;  %8580 = vmatpush3.bf16.msra.mxu1 %v10183_v36  ;;  %v8816_v32 = vld [vmem:[%s11623_s2 + $0x28] ss:$16 sps:$4 sm:$0xff]   ;;  %4811 = vmatprep.subr.bf16.mxu0 %v8818_v44  ;;  %v8824_v45 = vld [vmem:[%s11623_s2 + $0x4c] ss:$16 sps:$4 sm:$0xff]   ;;  %v8891_v44 = vld [vmem:[%s11622_s24 + $0x1c0] ss:$16 sps:$4 sm:$0xff]  }
 0x306   : > { %v8581_v50 = vpack.c.bf16 %v3133_v23, %v3132_v16  ;;  %v8295_v51 = vpop.f32.mrb[248].mxu0  ;;  %v8822_v16 = vld [vmem:[%s11623_s2 + $0x48] ss:$16 sps:$4 sm:$0xff]   ;;  %v8830_v23 = vld [vmem:[%s11623_s2 + $0x6c] ss:$16 sps:$4 sm:$0xff]  }
 0x307   : > { %v2866_v52 = vadd.f32 %v10155_v30, %v8295_v51  ;;  %v2857_v57 = vpop.f32.mrb[249].mxu0  ;;  %v8834_v51 = vld [vmem:[%s11623_s2 + $0x88] ss:$16 sps:$4 sm:$0xff]  }
 0x308   : > { %v2858_v58 = vadd.f32 %v10155_v30, %v2857_v57  ;;  %v8296_v59 = vpop.f32.mrb[250].mxu0  ;;  %8582 = vmatprep.subr.bf16.mxu1 %v8581_v50  ;;  %4812 = vmatpush1.bf16.msra.mxu0 %v8816_v32  ;;  %v8836_v50 = vld [vmem:[%s11623_s2 + $0x8c] ss:$16 sps:$4 sm:$0xff]   ;;  %v8840_v57 = vld [vmem:[%s11623_s2 + $0xa8] ss:$16 sps:$4 sm:$0xff]  }
 0x309   : > { %v2869_v62 = vadd.f32 %v10155_v30, %v8296_v59  ;;  %v2860_v42 = vpop.f32.mrb[251].mxu0  ;;  %8584 = vmatpush3.bf16.msra.mxu1 %v10200_v63  ;;  %v3138_v1 = vmax.f32 %v2866_v52, 0.0  ;;  %4813 = vmatprep.subr.bf16.mxu0 %v8824_v45  ;;  %v8842_v52 = vld [vmem:[%s11623_s2 + $0xac] ss:$16 sps:$4 sm:$0xff]   ;;  %v8846_v59 = vld [vmem:[%s11623_s2 + $0xc8] ss:$16 sps:$4 sm:$0xff]  }
 0x30a   : > { %v2861_v60 = vadd.f32 %v10155_v30, %v2860_v42  ;;  %8586 = vmatprep.subr.bf16.mxu1 %v8585_v48  ;;  %v3136_v36 = vmax.f32 %v2858_v58, 0.0  ;;  %v8828_v48 = vld [vmem:[%s11623_s2 + $0x68] ss:$16 sps:$4 sm:$0xff]   ;;  %v8848_v58 = vld [vmem:[%s11623_s2 + $0xcc] ss:$16 sps:$4 sm:$0xff]  }
 0x30b   : > { %v3139_v7 = vmax.f32 %v2869_v62, 0.0  ;;  %v8854_v62 = vld [vmem:[%s11623_s2 + $0xec] ss:$16 sps:$4 sm:$0xff]   ;;  %v8852_v42 = vld [vmem:[%s11623_s2 + $0xe8] ss:$16 sps:$4 sm:$0xff]  }
 0x30c   : > { %v3137_v37 = vmax.f32 %v2861_v60, 0.0  ;;  %4814 = vmatpush1.bf16.msra.mxu0 %v8822_v16  ;;  %v8860_v60 = vld [vmem:[%s11623_s2 + $0x10c] ss:$16 sps:$4 sm:$0xff]   ;;  %v8894_v32 = vld [vmem:[%s11623_s2 + $0x1c8] ss:$16 sps:$4 sm:$0xff]  }
 0x30d   : > { %v8593_v40 = vpack.c.bf16 %v3139_v7, %v3138_v1  ;;  %8588 = vmatpush3.bf16.msra.mxu1 %v10198_v2  ;;  %4815 = vmatprep.subr.bf16.mxu0 %v8830_v23  ;;  %v8858_v1 = vld [vmem:[%s11623_s2 + $0x108] ss:$16 sps:$4 sm:$0xff]   ;;  %v8866_v7 = vld [vmem:[%s11623_s2 + $0x12c] ss:$16 sps:$4 sm:$0xff]   ;;  %v8899_v45 = vld [vmem:[%s11622_s24 + $0x1e4] ss:$16 sps:$4 sm:$0xff]  }
 0x30e   : > { %v8589_v8 = vpack.c.bf16 %v3137_v37, %v3136_v36  ;;  %v8299_v4 = vpop.f32.mrb[252].mxu0  ;;  %v8864_v36 = vld [vmem:[%s11623_s2 + $0x128] ss:$16 sps:$4 sm:$0xff]   ;;  %v8872_v37 = vld [vmem:[%s11623_s2 + $0x14c] ss:$16 sps:$4 sm:$0xff]  }
 0x30f   : > { %v2882_v5 = vadd.f32 %v10155_v30, %v8299_v4  ;;  %v2873_v0 = vpop.f32.mrb[253].mxu0  ;;  %v8876_v4 = vld [vmem:[%s11623_s2 + $0x168] ss:$16 sps:$4 sm:$0xff]   ;;  %v8902_v16 = vld [vmem:[%s11623_s2 + $0x1ec] ss:$16 sps:$4 sm:$0xff]  }
 0x310   : > { %v2874_v49 = vadd.f32 %v10155_v30, %v2873_v0  ;;  %v8300_v43 = vpop.f32.mrb[254].mxu0  ;;  %8590 = vmatprep.subr.bf16.mxu1 %v8589_v8  ;;  %4816 = vmatpush1.bf16.msra.mxu0 %v8828_v48  ;;  %v8878_v8 = vld [vmem:[%s11623_s2 + $0x16c] ss:$16 sps:$4 sm:$0xff]   ;;  %v8897_v23 = vld [vmem:[%s11622_s24 + $0x1e0] ss:$16 sps:$4 sm:$0xff]  }
 0x311   : > { %v2885_v63 = vadd.f32 %v10155_v30, %v8300_v43  ;;  %v2876_v33 = vpop.f32.mrb[255].mxu0  ;;  %8592 = vmatpush3.bf16.msra.mxu1 %v10208_v3  ;;  %v3142_v12 = vmax.f32 %v2882_v5, 0.0  ;;  %v3158_v3 = vld [vmem:[%s11618_s8 + $0x70] sm:$0xff]  ;;  %4817 = vmatprep.subr.bf16.mxu0 %v8836_v50  ;;  %v8900_v48 = vld [vmem:[%s11623_s2 + $0x1e8] ss:$16 sps:$4 sm:$0xff]   ;;  %s11625_s8 = smov %s11624_s28 }
 0x312   : > { %v2877_v11 = vadd.f32 %v10155_v30, %v2876_v33  ;;  %8594 = vmatprep.subr.bf16.mxu1 %v8593_v40  ;;  %v3140_v2 = vmax.f32 %v2874_v49, 0.0  ;;  %v8870_v40 = vld [vmem:[%s11623_s2 + $0x148] ss:$16 sps:$4 sm:$0xff]   ;;  %v8905_v50 = vld [vmem:[%s11622_s24 + $0xc] ss:$16 sps:$4 sm:$0xff]  }
 0x313   : > { %v3143_v24 = vmax.f32 %v2885_v63, 0.0 }
 0x314   : > { %v3141_v13 = vmax.f32 %v2877_v11, 0.0  ;;  %4818 = vmatpush1.bf16.msra.mxu0 %v8834_v51  ;;  %v8908_v51 = vld [vmem:[%s11624_s28 + $0xc] ss:$16 sps:$4 sm:$0xff]   ;;  %s7571_s28 = sshll.u32 %s9543_s6, 4  ;;  %s9396_s6 = smov [#allocation2]  }
 0x315   : > { %v8601_v18 = vpack.c.bf16 %v3143_v24, %v3142_v12  ;;  %8596 = vmatpush3.bf16.msra.mxu1 %v10206_v41  ;;  %v8783_v41 = vld [vmem:[%s11621_s30] ss:$8 sps:$4 sm:$0xff]   ;;  %4819 = vmatprep.subr.bf16.mxu0 %v8842_v52  ;;  %v3739_v52 = vlaneseq  ;;  %s11511_s29 = scalar_lea.hbm %s11627_s7, %s7571_s28 }
 0x316   : > { %v8597_v9 = vpack.c.bf16 %v3141_v13, %v3140_v2  ;;  %v8807_v24 = vld [vmem:[%s11622_s24] ss:$16 sps:$4 sm:$0xff]   ;;  %v8815_v13 = vld [vmem:[%s11622_s24 + $0x24] ss:$16 sps:$4 sm:$0xff]  }
 0x318   : > { %8598 = vmatprep.subr.bf16.mxu1 %v8597_v9  ;;  %4820 = vmatpush1.bf16.msra.mxu0 %v8840_v57  ;;  %v8821_v9 = vld [vmem:[%s11622_s24 + $0x44] ss:$16 sps:$4 sm:$0xff]   ;;  %v10495_v57 = vshrl.u32 %v3739_v52, 7  ;;  %v8980_v52 = vld [vmem:[%s11625_s8 + $0x18c] ss:$16 sps:$4 sm:$0xff]  }
 0x319   : > { %8600 = vmatpush3.bf16.msra.mxu1 %v10216_v19  ;;  %v8785_v19 = vld [vmem:[%s11621_s30 + $0x4] ss:$8 sps:$4 sm:$0xff]   ;;  %4821 = vmatprep.subr.bf16.mxu0 %v8848_v58 }
 0x31a   : > { %8602 = vmatprep.subr.bf16.mxu1 %v8601_v18  ;;  %v8813_v18 = vld [vmem:[%s11622_s24 + $0x20] ss:$16 sps:$4 sm:$0xff]   ;;  %v10498_v58 = vsub.s32 0, %v10495_v57 }
 0x31c   : > { %4822 = vmatpush1.bf16.msra.mxu0 %v8846_v59  ;;  %v3737_v59 = vld [vmem:[%s11626_s0] sm:$0x3] }
 0x31d   : > { %8604 = vmatpush3.bf16.msra.mxu1 %v10214_v53  ;;  %v8788_v53 = vld [vmem:[%s11621_s30 + $0x14] ss:$8 sps:$4 sm:$0xff]   ;;  %4823 = vmatprep.subr.bf16.mxu0 %v8854_v62  ;;  %v10504_v62 = vsub.s32 1, %v10495_v57 }
 0x31e   : > { %3829 = vmatprep.subr.bf16.mxu1 %v8785_v19  ;;  %v8837_v19 = vld [vmem:[%s11622_s24 + $0xa0] ss:$16 sps:$4 sm:$0xff]  }
 0x320   : > { %3715 = vmatmul.mubr.f32.vlgmr.msra.gmra.mrb[14].mxu1 %v3158_v3  ;;  %4824 = vmatpush1.bf16.msra.mxu0 %v8852_v42  ;;  %v8819_v3 = vld [vmem:[%s11622_s24 + $0x40] ss:$16 sps:$4 sm:$0xff]   ;;  %v3742_v42 = vrot.slane %v3737_v59, %v10498_v58 }
 0x321   : > { %3830 = vmatpush1.bf16.msra.mxu1 %v8783_v41  ;;  %3861 = vmatprep.mubr.bf16.mxu1 %v9393_v27  ;;  %v8839_v41 = vld [vmem:[%s11622_s24 + $0xa4] ss:$16 sps:$4 sm:$0xff]   ;;  %v8885_v27 = vld [vmem:[%s11622_s24 + $0x1a0] ss:$16 sps:$4 sm:$0xff]  }
 0x322   : > { %3831 = vmatprep.subr.bf16.mxu1 %v8788_v53  ;;  %4825 = vmatprep.subr.bf16.mxu0 %v8860_v60  ;;  %v8845_v53 = vld [vmem:[%s11622_s24 + $0xc4] ss:$16 sps:$4 sm:$0xff]   ;;  %v3746_v60 = vrot.slane %v3737_v59, %v10504_v62  ;;  %v8975_v59 = vld [vmem:[%s11622_s24 + $0x188] ss:$16 sps:$4 sm:$0xff]  }
 0x324   : > { %4826 = vmatpush1.bf16.msra.mxu0 %v8858_v1 }
 0x325   : > { %3832 = vmatpush1.bf16.msra.mxu1 %v8786_v28  ;;  %4827 = vmatprep.subr.bf16.mxu0 %v8866_v7  ;;  %v8843_v28 = vld [vmem:[%s11622_s24 + $0xc0] ss:$16 sps:$4 sm:$0xff]  }
 0x326   : > { %3833 = vmatprep.subr.bf16.mxu1 %v8791_v25  ;;  %v8851_v25 = vld [vmem:[%s11622_s24 + $0xe4] ss:$16 sps:$4 sm:$0xff]  }
 0x328   : > { %4828 = vmatpush1.bf16.msra.mxu0 %v8864_v36 }
 0x329   : > { %4829 = vmatprep.subr.bf16.mxu0 %v8872_v37 }
 0x32c   : > { %4830 = vmatpush1.bf16.msra.mxu0 %v8870_v40 }
 0x32d   : > { %4831 = vmatprep.subr.bf16.mxu0 %v8878_v8 }
 0x330   : > { %4832 = vmatpush1.bf16.msra.mxu0 %v8876_v4 }
 0x333   : > { %v7883_v30 = vpop.f32.mrb[8].mxu1 }
 0x334   : > { %v7884_v21 = vpop.f32.mrb[9].mxu1 }
 0x335   : > { %v7885_v56 = vadd.f32 %v7884_v21, %v7883_v30  ;;  %v8827_v30 = vld [vmem:[%s11622_s24 + $0x64] ss:$16 sps:$4 sm:$0xff]   ;;  %v8825_v21 = vld [vmem:[%s11622_s24 + $0x60] ss:$16 sps:$4 sm:$0xff]  }
 0x337   : > { %v3507_v20 = vadd.f32 %v7885_v56, %v10220_v31  ;;  %v8789_v31 = vld [vmem:[%s11621_s30 + $0x20] ss:$8 sps:$4 sm:$0xff]   ;;  %v8833_v56 = vld [vmem:[%s11622_s24 + $0x84] ss:$16 sps:$4 sm:$0xff]   ;;  %s729_s30 = scalar_lea.vmem [#allocation2], %s728_s27 }
 0x338   : > { %3834 = vmatpush1.bf16.msra.mxu1 %v8789_v31  ;;  %v8849_v31 = vld [vmem:[%s11622_s24 + $0xe0] ss:$16 sps:$4 sm:$0xff]   ;;  %s7017_s25 = sshll.u32 %s729_s30, 4  ;;  %s11513_s25 = int_to_ptr.vmem [resolvable:$true] %s7017_s25 }
 0x339   : > { %3835 = vmatprep.subr.bf16.mxu1 %v8794_v26  ;;  %v8857_v26 = vld [vmem:[%s11622_s24 + $0x104] ss:$16 sps:$4 sm:$0xff]   ;;  %s9329_s4 = scalar_lea.vmem %s11513_s25, 16 }
 0x33a   : > { %p9330_p11 = scmp.ne.s32.totalorder %s11513_s25, %s9329_s4 }
 0x33c   : > { %3836 = vmatpush1.bf16.msra.mxu1 %v8792_v15  ;;  %v8855_v15 = vld [vmem:[%s11622_s24 + $0x100] ss:$16 sps:$4 sm:$0xff]   ;;  %p9331_p12 = pnand %p9330_p11, %p9560_p5 }
 0x33d   : > { %3837 = vmatprep.subr.bf16.mxu1 %v8797_v55  ;;  %v8863_v55 = vld [vmem:[%s11622_s24 + $0x124] ss:$16 sps:$4 sm:$0xff]  }
 0x33e   : > { %p9332_p13 = pneg %p9331_p12 }
 0x340   : > { %3838 = vmatpush1.bf16.msra.mxu1 %v8795_v34  ;;  %v8861_v34 = vld [vmem:[%s11622_s24 + $0x120] ss:$16 sps:$4 sm:$0xff]  }
 0x341   : > { %3839 = vmatprep.subr.bf16.mxu1 %v8800_v39  ;;  %v8869_v39 = vld [vmem:[%s11622_s24 + $0x144] ss:$16 sps:$4 sm:$0xff]  }
 0x344   : > { %3840 = vmatpush1.bf16.msra.mxu1 %v8798_v35  ;;  %v8867_v35 = vld [vmem:[%s11622_s24 + $0x140] ss:$16 sps:$4 sm:$0xff]  }
 0x345   : > { %3841 = vmatprep.subr.bf16.mxu1 %v8803_v10  ;;  %v8875_v10 = vld [vmem:[%s11622_s24 + $0x164] ss:$16 sps:$4 sm:$0xff]  }
 0x348   : > { %3842 = vmatpush1.bf16.msra.mxu1 %v8801_v6  ;;  %v8873_v6 = vld [vmem:[%s11622_s24 + $0x160] ss:$16 sps:$4 sm:$0xff]  }
 0x349   : > { %3843 = vmatprep.subr.bf16.mxu1 %v8806_v61  ;;  %v8882_v61 = vld [vmem:[%s11623_s2 + $0x188] ss:$16 sps:$4 sm:$0xff]  }
 0x34c   : > { %3844 = vmatpush1.bf16.msra.mxu1 %v8804_v14  ;;  %v8887_v14 = vld [vmem:[%s11622_s24 + $0x1a4] ss:$16 sps:$4 sm:$0xff]  }
 0x34d   : > { %4280 = vmatprep.subr.bf16.mxu1 %v8809_v17  ;;  %v8888_v17 = vld [vmem:[%s11623_s2 + $0x1a8] ss:$16 sps:$4 sm:$0xff]  }
 0x373   : > { %v7918_v46 = vpop.f32.mrb[10].mxu1 }
 0x374   : > { %v7919_v47 = vpop.f32.mrb[11].mxu1 }
 0x375   : > { %v7920_v38 = vadd.f32 %v7919_v47, %v7918_v46  ;;  %v8881_v46 = vld [vmem:[%s11622_s24 + $0x184] ss:$16 sps:$4 sm:$0xff]   ;;  %v8884_v47 = vld [vmem:[%s11623_s2 + $0x18c] ss:$16 sps:$4 sm:$0xff]  }
 0x376   : > { %4833 = vmatprep.subr.bf16.mxu0 %v8884_v47  ;;  %v8953_v47 = vld [vmem:[%s11622_s24 + $0x10c] ss:$16 sps:$4 sm:$0xff]  }
 0x377   : > { %v3577_v29 = vadd.f32 %v7920_v38, %v3507_v20  ;;  %v8831_v20 = vld [vmem:[%s11622_s24 + $0x80] ss:$16 sps:$4 sm:$0xff]   ;;  %4834 = vmatpush1.bf16.msra.mxu0 %v8882_v61  ;;  %v8951_v61 = vld [vmem:[%s11622_s24 + $0x108] ss:$16 sps:$4 sm:$0xff]  }
 0x378   : > { %v8879_v38 = vld [vmem:[%s11622_s24 + $0x180] ss:$16 sps:$4 sm:$0xff]  }
 0x3b3   : > { %v7953_v5 = vpop.f32.mrb[12].mxu1 }
 0x3b4   : > { %v7954_v0 = vpop.f32.mrb[13].mxu1 }
 0x3b5   : > { %v7955_v49 = vadd.f32 %v7954_v0, %v7953_v5 }
 0x3b7   : > { %v3647_v43 = vadd.f32 %v7955_v49, %v3577_v29  ;;  %v8890_v29 = vld [vmem:[%s11623_s2 + $0x1ac] ss:$16 sps:$4 sm:$0xff]   ;;  %v8903_v49 = vld [vmem:[%s11622_s24 + $0x8] ss:$16 sps:$4 sm:$0xff]  }
 0x3b8   : > { %4835 = vmatprep.subr.bf16.mxu0 %v8890_v29  ;;  %v8959_v29 = vld [vmem:[%s11622_s24 + $0x12c] ss:$16 sps:$4 sm:$0xff]  }
 0x3b9   : > { %4836 = vmatpush1.bf16.msra.mxu0 %v8888_v17  ;;  %v8957_v17 = vld [vmem:[%s11622_s24 + $0x128] ss:$16 sps:$4 sm:$0xff]  }
 0x3ba   : > { %4837 = vmatprep.subr.bf16.mxu0 %v8896_v22  ;;  %v8965_v22 = vld [vmem:[%s11622_s24 + $0x14c] ss:$16 sps:$4 sm:$0xff]  }
 0x3bd   : > { %4838 = vmatpush1.bf16.msra.mxu0 %v8894_v32  ;;  %v8963_v32 = vld [vmem:[%s11622_s24 + $0x148] ss:$16 sps:$4 sm:$0xff]  }
 0x3be   : > { %4839 = vmatprep.subr.bf16.mxu0 %v8902_v16  ;;  %v8971_v16 = vld [vmem:[%s11622_s24 + $0x16c] ss:$16 sps:$4 sm:$0xff]  }
 0x3c1   : > { %4840 = vmatpush1.bf16.msra.mxu0 %v8900_v48  ;;  %v8969_v48 = vld [vmem:[%s11622_s24 + $0x168] ss:$16 sps:$4 sm:$0xff]  }
 0x3c2   : > { %5297 = vmatprep.subr.bf16.mxu0 %v8908_v51  ;;  %v8977_v51 = vld [vmem:[%s11622_s24 + $0x18c] ss:$16 sps:$4 sm:$0xff]  }
 0x3f3   : > { %v7988_v63 = vpop.f32.mrb[14].mxu1 }
 0x3f4   : > { %v7989_v33 = vpop.f32.mrb[15].mxu1 }
 0x3f5   : > { %v7990_v11 = vadd.f32 %v7989_v33, %v7988_v63  ;;  %v8911_v33 = vld [vmem:[%s11622_s24 + $0x2c] ss:$16 sps:$4 sm:$0xff]  }
 0x3f7   : > { %v3717_v12 = vadd.f32 %v7990_v11, %v3647_v43  ;;  %v8906_v43 = vld [vmem:[%s11625_s8 + $0x8] ss:$16 sps:$4 sm:$0xff]   ;;  %v8914_v11 = vld [vmem:[%s11625_s8 + $0x2c] ss:$16 sps:$4 sm:$0xff]  }
 0x3f9   : > { %v3720_v2 = vpack.c.bf16 %v3717_v12, %v3717_v12  ;;  %v8909_v12 = vld [vmem:[%s11622_s24 + $0x28] ss:$16 sps:$4 sm:$0xff]  }
 0x3fb   : > { %3862 = vmatmul.mubr.bf16.vlgmr.msra.gmra.mrb[16].mxu1 %v3720_v2  ;;  %v8917_v2 = vld [vmem:[%s11622_s24 + $0x4c] ss:$16 sps:$4 sm:$0xff]  }
 0x3fc   : > { %4281 = vmatpush1.bf16.msra.mxu1 %v8807_v24  ;;  %v8912_v24 = vld [vmem:[%s11625_s8 + $0x28] ss:$16 sps:$4 sm:$0xff]  }
 0x3fd   : > { %4282 = vmatprep.subr.bf16.mxu1 %v8815_v13  ;;  %v8920_v13 = vld [vmem:[%s11625_s8 + $0x4c] ss:$16 sps:$4 sm:$0xff]  }
 0x400   : > { %4283 = vmatpush1.bf16.msra.mxu1 %v8813_v18  ;;  %v8915_v18 = vld [vmem:[%s11622_s24 + $0x48] ss:$16 sps:$4 sm:$0xff]  }
 0x401   : > { %4284 = vmatprep.subr.bf16.mxu1 %v8821_v9  ;;  %v8918_v9 = vld [vmem:[%s11625_s8 + $0x48] ss:$16 sps:$4 sm:$0xff]  }
 0x404   : > { %4285 = vmatpush1.bf16.msra.mxu1 %v8819_v3  ;;  %v8923_v3 = vld [vmem:[%s11622_s24 + $0x6c] ss:$16 sps:$4 sm:$0xff]  }
 0x405   : > { %4286 = vmatprep.subr.bf16.mxu1 %v8827_v30  ;;  %v8926_v30 = vld [vmem:[%s11625_s8 + $0x6c] ss:$16 sps:$4 sm:$0xff]  }
 0x408   : > { %4287 = vmatpush1.bf16.msra.mxu1 %v8825_v21  ;;  %v8921_v21 = vld [vmem:[%s11622_s24 + $0x68] ss:$16 sps:$4 sm:$0xff]  }
 0x409   : > { %4288 = vmatprep.subr.bf16.mxu1 %v8833_v56  ;;  %v8924_v56 = vld [vmem:[%s11625_s8 + $0x68] ss:$16 sps:$4 sm:$0xff]  }
 0x40c   : > { %4289 = vmatpush1.bf16.msra.mxu1 %v8831_v20  ;;  %v8929_v20 = vld [vmem:[%s11622_s24 + $0x8c] ss:$16 sps:$4 sm:$0xff]  }
 0x40d   : > { %4290 = vmatprep.subr.bf16.mxu1 %v8839_v41  ;;  %v8932_v41 = vld [vmem:[%s11625_s8 + $0x8c] ss:$16 sps:$4 sm:$0xff]  }
 0x410   : > { %4291 = vmatpush1.bf16.msra.mxu1 %v8837_v19  ;;  %v8927_v19 = vld [vmem:[%s11622_s24 + $0x88] ss:$16 sps:$4 sm:$0xff]  }
 0x411   : > { %4292 = vmatprep.subr.bf16.mxu1 %v8845_v53  ;;  %v8930_v53 = vld [vmem:[%s11625_s8 + $0x88] ss:$16 sps:$4 sm:$0xff]  }
 0x414   : > { %4293 = vmatpush1.bf16.msra.mxu1 %v8843_v28  ;;  %v8935_v28 = vld [vmem:[%s11622_s24 + $0xac] ss:$16 sps:$4 sm:$0xff]  }
 0x415   : > { %4294 = vmatprep.subr.bf16.mxu1 %v8851_v25  ;;  %v8938_v25 = vld [vmem:[%s11625_s8 + $0xac] ss:$16 sps:$4 sm:$0xff]  }
 0x418   : > { %4295 = vmatpush1.bf16.msra.mxu1 %v8849_v31  ;;  %v8933_v31 = vld [vmem:[%s11622_s24 + $0xa8] ss:$16 sps:$4 sm:$0xff]  }
 0x419   : > { %4296 = vmatprep.subr.bf16.mxu1 %v8857_v26  ;;  %v8936_v26 = vld [vmem:[%s11625_s8 + $0xa8] ss:$16 sps:$4 sm:$0xff]  }
 0x41c   : > { %4297 = vmatpush1.bf16.msra.mxu1 %v8855_v15  ;;  %v8941_v15 = vld [vmem:[%s11622_s24 + $0xcc] ss:$16 sps:$4 sm:$0xff]  }
 0x41d   : > { %4298 = vmatprep.subr.bf16.mxu1 %v8863_v55  ;;  %v8944_v55 = vld [vmem:[%s11625_s8 + $0xcc] ss:$16 sps:$4 sm:$0xff]  }
 0x420   : > { %4299 = vmatpush1.bf16.msra.mxu1 %v8861_v34  ;;  %v8939_v34 = vld [vmem:[%s11622_s24 + $0xc8] ss:$16 sps:$4 sm:$0xff]  }
 0x421   : > { %4300 = vmatprep.subr.bf16.mxu1 %v8869_v39  ;;  %v8942_v39 = vld [vmem:[%s11625_s8 + $0xc8] ss:$16 sps:$4 sm:$0xff]  }
 0x424   : > { %4301 = vmatpush1.bf16.msra.mxu1 %v8867_v35  ;;  %v8947_v35 = vld [vmem:[%s11622_s24 + $0xec] ss:$16 sps:$4 sm:$0xff]  }
 0x425   : > { %4302 = vmatprep.subr.bf16.mxu1 %v8875_v10  ;;  %v8950_v10 = vld [vmem:[%s11625_s8 + $0xec] ss:$16 sps:$4 sm:$0xff]  }
 0x428   : > { %4303 = vmatpush1.bf16.msra.mxu1 %v8873_v6  ;;  %v8945_v6 = vld [vmem:[%s11622_s24 + $0xe8] ss:$16 sps:$4 sm:$0xff]  }
 0x429   : > { %4304 = vmatprep.subr.bf16.mxu1 %v8881_v46  ;;  %v8948_v46 = vld [vmem:[%s11625_s8 + $0xe8] ss:$16 sps:$4 sm:$0xff]  }
 0x42c   : > { %4305 = vmatpush1.bf16.msra.mxu1 %v8879_v38  ;;  %v8956_v38 = vld [vmem:[%s11625_s8 + $0x10c] ss:$16 sps:$4 sm:$0xff]  }
 0x42d   : > { %4306 = vmatprep.subr.bf16.mxu1 %v8887_v14  ;;  %v8954_v14 = vld [vmem:[%s11625_s8 + $0x108] ss:$16 sps:$4 sm:$0xff]  }
 0x430   : > { %4307 = vmatpush1.bf16.msra.mxu1 %v8885_v27  ;;  %v8962_v27 = vld [vmem:[%s11625_s8 + $0x12c] ss:$16 sps:$4 sm:$0xff]  }
 0x431   : > { %4308 = vmatprep.subr.bf16.mxu1 %v8893_v54  ;;  %v8960_v54 = vld [vmem:[%s11625_s8 + $0x128] ss:$16 sps:$4 sm:$0xff]  }
 0x434   : > { %4309 = vmatpush1.bf16.msra.mxu1 %v8891_v44  ;;  %v8968_v44 = vld [vmem:[%s11625_s8 + $0x14c] ss:$16 sps:$4 sm:$0xff]  }
 0x435   : > { %4310 = vmatprep.subr.bf16.mxu1 %v8899_v45  ;;  %v8966_v45 = vld [vmem:[%s11625_s8 + $0x148] ss:$16 sps:$4 sm:$0xff]  }
 0x438   : > { %4311 = vmatpush1.bf16.msra.mxu1 %v8897_v23  ;;  %v8974_v23 = vld [vmem:[%s11625_s8 + $0x16c] ss:$16 sps:$4 sm:$0xff]  }
 0x439   : > { %4321 = vmatprep.subr.bf16.mxu1 %v8905_v50  ;;  %v8972_v50 = vld [vmem:[%s11625_s8 + $0x168] ss:$16 sps:$4 sm:$0xff]  }
 0x4ce   : > { %v3863_v1 = vpop.f32.mrb[16].mxu1 }
 0x4cf   : > { %v3864_v7 = vadd.f32 %v3863_v1, %v3742_v42  ;;  %v3865_v36 = vpop.f32.mrb[17].mxu1  ;;  %v8978_v42 = vld [vmem:[%s11625_s8 + $0x188] ss:$16 sps:$4 sm:$0xff]   ;;  %v8986_v1 = vld [vmem:[%s11625_s8 + $0x1ac] ss:$16 sps:$4 sm:$0xff]  }
 0x4d0   : > { %v3866_v37 = vadd.f32 %v3865_v36, %v3746_v60  ;;  %v3867_v40 = vpop.f32.mrb[18].mxu1  ;;  %v8983_v60 = vld [vmem:[%s11622_s24 + $0x1ac] ss:$16 sps:$4 sm:$0xff]   ;;  %v8984_v36 = vld [vmem:[%s11625_s8 + $0x1a8] ss:$16 sps:$4 sm:$0xff]  }
 0x4d1   : > { %9303 = vtanh.f32 %v3864_v7  ;;  %v3868_v8 = vpop.f32.mrb[19].mxu1  ;;  %v8981_v7 = vld [vmem:[%s11622_s24 + $0x1a8] ss:$16 sps:$4 sm:$0xff]   ;;  %v8992_v40 = vld [vmem:[%s11625_s8 + $0x1cc] ss:$16 sps:$4 sm:$0xff]  }
 0x4d2   : > { %9305 = vtanh.f32 %v3866_v37  ;;  %v8989_v37 = vld [vmem:[%s11622_s24 + $0x1cc] ss:$16 sps:$4 sm:$0xff]   ;;  %v8987_v8 = vld [vmem:[%s11622_s24 + $0x1c8] ss:$16 sps:$4 sm:$0xff]  }
 0x4db   : > { %v10508_v4 = vpop.eup %9303 }
 0x4dc   : > { %v10510_v5 = vpop.eup %9305  ;;  %v10524_v63 = vpack.c.bf16 %v10508_v4, %v10508_v4 }
 0x4dd   : > { %v10514_v0 = vpack.c.bf16 %v10510_v5, %v10510_v5 }
 0x4df   : > { %4312 = vmatprep.mubr.bf16.mxu1 %v10514_v0  ;;  %4841 = vmatprep.mubr.bf16.mxu0 %v10514_v0 }
 0x4e0   : > { %4313 = vmatmul.mubr.bf16.vlgmr.msra.gmra.mrb[20].mxu1 %v10524_v63  ;;  %4842 = vmatmul.mubr.bf16.vlgmr.msra.gmra.mrb[0].mxu0 %v10524_v63 }
 0x4e1   : > { %4322 = vmatpush1.bf16.msra.mxu1 %v8903_v49  ;;  %5298 = vmatpush1.bf16.msra.mxu0 %v8906_v43  ;;  %v8990_v49 = vld [vmem:[%s11625_s8 + $0x1c8] ss:$16 sps:$4 sm:$0xff]   ;;  %v8995_v43 = vld [vmem:[%s11622_s24 + $0x1ec] ss:$16 sps:$4 sm:$0xff]  }
 0x4e2   : > { %4353 = vmatprep.mubr.bf16.mxu1 %v10514_v0  ;;  %5329 = vmatprep.mubr.bf16.mxu0 %v10514_v0 }
 0x4e3   : > { %4323 = vmatprep.subr.bf16.mxu1 %v8911_v33  ;;  %5299 = vmatprep.subr.bf16.mxu0 %v8914_v11  ;;  %v8998_v33 = vld [vmem:[%s11625_s8 + $0x1ec] ss:$16 sps:$4 sm:$0xff]   ;;  %v8993_v11 = vld [vmem:[%s11622_s24 + $0x1e8] ss:$16 sps:$4 sm:$0xff]  }
 0x4e5   : > { %4324 = vmatpush1.bf16.msra.mxu1 %v8909_v12  ;;  %5300 = vmatpush1.bf16.msra.mxu0 %v8912_v24  ;;  %v8996_v12 = vld [vmem:[%s11625_s8 + $0x1e8] ss:$16 sps:$4 sm:$0xff]   ;;  %v9001_v24 = vld [vmem:[%s11623_s2 + $0x4] ss:$16 sps:$4 sm:$0xff]  }
 0x4e6   : > { %4325 = vmatprep.subr.bf16.mxu1 %v8917_v2  ;;  %5301 = vmatprep.subr.bf16.mxu0 %v8920_v13  ;;  %v8999_v2 = vld [vmem:[%s11623_s2] ss:$16 sps:$4 sm:$0xff]   ;;  %v9004_v13 = vld [vmem:[%s11623_s2 + $0x24] ss:$16 sps:$4 sm:$0xff]  }
 0x4e9   : > { %4326 = vmatpush1.bf16.msra.mxu1 %v8915_v18  ;;  %5302 = vmatpush1.bf16.msra.mxu0 %v8918_v9  ;;  %v9002_v18 = vld [vmem:[%s11623_s2 + $0x20] ss:$16 sps:$4 sm:$0xff]   ;;  %v9007_v9 = vld [vmem:[%s11623_s2 + $0x44] ss:$16 sps:$4 sm:$0xff]  }
 0x4ea   : > { %4327 = vmatprep.subr.bf16.mxu1 %v8923_v3  ;;  %5303 = vmatprep.subr.bf16.mxu0 %v8926_v30  ;;  %v9005_v3 = vld [vmem:[%s11623_s2 + $0x40] ss:$16 sps:$4 sm:$0xff]   ;;  %v9010_v30 = vld [vmem:[%s11623_s2 + $0x64] ss:$16 sps:$4 sm:$0xff]  }
 0x4ed   : > { %4328 = vmatpush1.bf16.msra.mxu1 %v8921_v21  ;;  %5304 = vmatpush1.bf16.msra.mxu0 %v8924_v56  ;;  %v9008_v21 = vld [vmem:[%s11623_s2 + $0x60] ss:$16 sps:$4 sm:$0xff]   ;;  %v9013_v56 = vld [vmem:[%s11623_s2 + $0x84] ss:$16 sps:$4 sm:$0xff]  }
 0x4ee   : > { %4329 = vmatprep.subr.bf16.mxu1 %v8929_v20  ;;  %5305 = vmatprep.subr.bf16.mxu0 %v8932_v41  ;;  %v9011_v20 = vld [vmem:[%s11623_s2 + $0x80] ss:$16 sps:$4 sm:$0xff]   ;;  %v9016_v41 = vld [vmem:[%s11623_s2 + $0xa4] ss:$16 sps:$4 sm:$0xff]  }
 0x4f1   : > { %4330 = vmatpush1.bf16.msra.mxu1 %v8927_v19  ;;  %5306 = vmatpush1.bf16.msra.mxu0 %v8930_v53  ;;  %v9014_v19 = vld [vmem:[%s11623_s2 + $0xa0] ss:$16 sps:$4 sm:$0xff]   ;;  %v9019_v53 = vld [vmem:[%s11623_s2 + $0xc4] ss:$16 sps:$4 sm:$0xff]  }
 0x4f2   : > { %4331 = vmatprep.subr.bf16.mxu1 %v8935_v28  ;;  %5307 = vmatprep.subr.bf16.mxu0 %v8938_v25  ;;  %v9017_v28 = vld [vmem:[%s11623_s2 + $0xc0] ss:$16 sps:$4 sm:$0xff]   ;;  %v9022_v25 = vld [vmem:[%s11623_s2 + $0xe4] ss:$16 sps:$4 sm:$0xff]  }
 0x4f5   : > { %4332 = vmatpush1.bf16.msra.mxu1 %v8933_v31  ;;  %5308 = vmatpush1.bf16.msra.mxu0 %v8936_v26  ;;  %v9020_v31 = vld [vmem:[%s11623_s2 + $0xe0] ss:$16 sps:$4 sm:$0xff]   ;;  %v9025_v26 = vld [vmem:[%s11623_s2 + $0x104] ss:$16 sps:$4 sm:$0xff]  }
 0x4f6   : > { %4333 = vmatprep.subr.bf16.mxu1 %v8941_v15  ;;  %5309 = vmatprep.subr.bf16.mxu0 %v8944_v55  ;;  %v9023_v15 = vld [vmem:[%s11623_s2 + $0x100] ss:$16 sps:$4 sm:$0xff]   ;;  %v9028_v55 = vld [vmem:[%s11623_s2 + $0x124] ss:$16 sps:$4 sm:$0xff]  }
 0x4f9   : > { %4334 = vmatpush1.bf16.msra.mxu1 %v8939_v34  ;;  %5310 = vmatpush1.bf16.msra.mxu0 %v8942_v39  ;;  %v9026_v34 = vld [vmem:[%s11623_s2 + $0x120] ss:$16 sps:$4 sm:$0xff]   ;;  %v9031_v39 = vld [vmem:[%s11623_s2 + $0x144] ss:$16 sps:$4 sm:$0xff]  }
 0x4fa   : > { %4335 = vmatprep.subr.bf16.mxu1 %v8947_v35  ;;  %5311 = vmatprep.subr.bf16.mxu0 %v8950_v10  ;;  %v9029_v35 = vld [vmem:[%s11623_s2 + $0x140] ss:$16 sps:$4 sm:$0xff]   ;;  %v9034_v10 = vld [vmem:[%s11623_s2 + $0x164] ss:$16 sps:$4 sm:$0xff]  }
 0x4fd   : > { %4336 = vmatpush1.bf16.msra.mxu1 %v8945_v6  ;;  %5312 = vmatpush1.bf16.msra.mxu0 %v8948_v46  ;;  %v9032_v6 = vld [vmem:[%s11623_s2 + $0x160] ss:$16 sps:$4 sm:$0xff]   ;;  %v9037_v46 = vld [vmem:[%s11623_s2 + $0x184] ss:$16 sps:$4 sm:$0xff]  }
 0x4fe   : > { %4337 = vmatprep.subr.bf16.mxu1 %v8953_v47  ;;  %5313 = vmatprep.subr.bf16.mxu0 %v8956_v38  ;;  %v9035_v47 = vld [vmem:[%s11623_s2 + $0x180] ss:$16 sps:$4 sm:$0xff]   ;;  %v9040_v38 = vld [vmem:[%s11623_s2 + $0x1a4] ss:$16 sps:$4 sm:$0xff]  }
 0x501   : > { %4338 = vmatpush1.bf16.msra.mxu1 %v8951_v61  ;;  %5314 = vmatpush1.bf16.msra.mxu0 %v8954_v14  ;;  %v9038_v61 = vld [vmem:[%s11623_s2 + $0x1a0] ss:$16 sps:$4 sm:$0xff]   ;;  %v9043_v14 = vld [vmem:[%s11623_s2 + $0x1c4] ss:$16 sps:$4 sm:$0xff]  }
 0x502   : > { %4339 = vmatprep.subr.bf16.mxu1 %v8959_v29  ;;  %5315 = vmatprep.subr.bf16.mxu0 %v8962_v27  ;;  %v9041_v29 = vld [vmem:[%s11623_s2 + $0x1c0] ss:$16 sps:$4 sm:$0xff]   ;;  %v9046_v27 = vld [vmem:[%s11623_s2 + $0x1e4] ss:$16 sps:$4 sm:$0xff]  }
 0x505   : > { %4340 = vmatpush1.bf16.msra.mxu1 %v8957_v17  ;;  %5316 = vmatpush1.bf16.msra.mxu0 %v8960_v54  ;;  %v9044_v17 = vld [vmem:[%s11623_s2 + $0x1e0] ss:$16 sps:$4 sm:$0xff]   ;;  %v9049_v54 = vld [vmem:[%s11625_s8 + $0x4] ss:$16 sps:$4 sm:$0xff]   ;;  %s9333_s2 = sshll.u32 %s9396_s6, 4  ;;  %s9334_s2 = int_to_ptr.vmem [resolvable:$false] %s9333_s2 }
 0x506   : > { %4341 = vmatprep.subr.bf16.mxu1 %v8965_v22  ;;  %5317 = vmatprep.subr.bf16.mxu0 %v8968_v44  ;;  %v9047_v22 = vld [vmem:[%s11625_s8] ss:$16 sps:$4 sm:$0xff]   ;;  %v9052_v44 = vld [vmem:[%s11625_s8 + $0x24] ss:$16 sps:$4 sm:$0xff]   ;;  %p9336_p0 = scmp.lt.s32.totalorder %s11513_s25, %s9334_s2 }
 0x509   : > { %4342 = vmatpush1.bf16.msra.mxu1 %v8963_v32  ;;  %5318 = vmatpush1.bf16.msra.mxu0 %v8966_v45  ;;  %v9050_v32 = vld [vmem:[%s11625_s8 + $0x20] ss:$16 sps:$4 sm:$0xff]   ;;  %v9055_v45 = vld [vmem:[%s11625_s8 + $0x44] ss:$16 sps:$4 sm:$0xff]  }
 0x50a   : > { %4343 = vmatprep.subr.bf16.mxu1 %v8971_v16  ;;  %5319 = vmatprep.subr.bf16.mxu0 %v8974_v23  ;;  %v9053_v16 = vld [vmem:[%s11625_s8 + $0x40] ss:$16 sps:$4 sm:$0xff]   ;;  %v9058_v23 = vld [vmem:[%s11625_s8 + $0x64] ss:$16 sps:$4 sm:$0xff]  }
 0x50d   : > { %4344 = vmatpush1.bf16.msra.mxu1 %v8969_v48  ;;  %5320 = vmatpush1.bf16.msra.mxu0 %v8972_v50  ;;  %v9061_v48 = vld [vmem:[%s11625_s8 + $0x84] ss:$16 sps:$4 sm:$0xff]   ;;  %v9059_v50 = vld [vmem:[%s11625_s8 + $0x80] ss:$16 sps:$4 sm:$0xff]  }
 0x50e   : > { %4345 = vmatprep.subr.bf16.mxu1 %v8977_v51  ;;  %5321 = vmatprep.subr.bf16.mxu0 %v8980_v52  ;;  %v9064_v51 = vld [vmem:[%s11625_s8 + $0xa4] ss:$16 sps:$4 sm:$0xff]   ;;  %v9062_v52 = vld [vmem:[%s11625_s8 + $0xa0] ss:$16 sps:$4 sm:$0xff]  }
 0x511   : > { %4346 = vmatpush1.bf16.msra.mxu1 %v8975_v59  ;;  %5322 = vmatpush1.bf16.msra.mxu0 %v8978_v42  ;;  %v9067_v59 = vld [vmem:[%s11625_s8 + $0xc4] ss:$16 sps:$4 sm:$0xff]   ;;  %v9065_v42 = vld [vmem:[%s11625_s8 + $0xc0] ss:$16 sps:$4 sm:$0xff]  }
 0x512   : > { %4347 = vmatprep.subr.bf16.mxu1 %v8983_v60  ;;  %5323 = vmatprep.subr.bf16.mxu0 %v8986_v1  ;;  %v9070_v60 = vld [vmem:[%s11625_s8 + $0xe4] ss:$16 sps:$4 sm:$0xff]   ;;  %v9068_v1 = vld [vmem:[%s11625_s8 + $0xe0] ss:$16 sps:$4 sm:$0xff]  }
 0x515   : > { %4348 = vmatpush1.bf16.msra.mxu1 %v8981_v7  ;;  %5324 = vmatpush1.bf16.msra.mxu0 %v8984_v36  ;;  %v9073_v7 = vld [vmem:[%s11625_s8 + $0x104] ss:$16 sps:$4 sm:$0xff]   ;;  %v9071_v36 = vld [vmem:[%s11625_s8 + $0x100] ss:$16 sps:$4 sm:$0xff]  }
 0x516   : > { %4349 = vmatprep.subr.bf16.mxu1 %v8989_v37  ;;  %5325 = vmatprep.subr.bf16.mxu0 %v8992_v40  ;;  %v9076_v37 = vld [vmem:[%s11625_s8 + $0x124] ss:$16 sps:$4 sm:$0xff]   ;;  %v9074_v40 = vld [vmem:[%s11625_s8 + $0x120] ss:$16 sps:$4 sm:$0xff]  }
 0x519   : > { %4350 = vmatpush1.bf16.msra.mxu1 %v8987_v8  ;;  %5326 = vmatpush1.bf16.msra.mxu0 %v8990_v49  ;;  %v9079_v8 = vld [vmem:[%s11625_s8 + $0x144] ss:$16 sps:$4 sm:$0xff]   ;;  %v9077_v49 = vld [vmem:[%s11625_s8 + $0x140] ss:$16 sps:$4 sm:$0xff]  }
 0x51a   : > { %4351 = vmatprep.subr.bf16.mxu1 %v8995_v43  ;;  %5327 = vmatprep.subr.bf16.mxu0 %v8998_v33  ;;  %v9082_v43 = vld [vmem:[%s11625_s8 + $0x164] ss:$16 sps:$4 sm:$0xff]   ;;  %v9080_v33 = vld [vmem:[%s11625_s8 + $0x160] ss:$16 sps:$4 sm:$0xff]  }
 0x51d   : > { %4352 = vmatpush1.bf16.msra.mxu1 %v8993_v11  ;;  %5328 = vmatpush1.bf16.msra.mxu0 %v8996_v12  ;;  %v9085_v11 = vld [vmem:[%s11625_s8 + $0x184] ss:$16 sps:$4 sm:$0xff]   ;;  %v9083_v12 = vld [vmem:[%s11625_s8 + $0x180] ss:$16 sps:$4 sm:$0xff]  }
 0x51e   : > { %4768 = vmatprep.subr.bf16.mxu1 %v9001_v24  ;;  %v9088_v24 = vld [vmem:[%s11625_s8 + $0x1a4] ss:$16 sps:$4 sm:$0xff]  }
 0x520   : > { %4354 = vmatmul.mubr.bf16.vlgmr.msra.gmra.mrb[24].mxu1 %v10524_v63  ;;  %5330 = vmatmul.mubr.bf16.vlgmr.msra.gmra.mrb[4].mxu0 %v10524_v63 }
 0x521   : > { %4769 = vmatpush1.bf16.msra.mxu1 %v8999_v2  ;;  %4800 = vmatprep.mubr.bf16.mxu1 %v10514_v0  ;;  %v9086_v2 = vld [vmem:[%s11625_s8 + $0x1a0] ss:$16 sps:$4 sm:$0xff]  }
 0x522   : > { %4770 = vmatprep.subr.bf16.mxu1 %v9004_v13  ;;  %v9091_v13 = vld [vmem:[%s11625_s8 + $0x1c4] ss:$16 sps:$4 sm:$0xff]  }
 0x525   : > { %4771 = vmatpush1.bf16.msra.mxu1 %v9002_v18  ;;  %v9089_v18 = vld [vmem:[%s11625_s8 + $0x1c0] ss:$16 sps:$4 sm:$0xff]  }
 0x526   : > { %4772 = vmatprep.subr.bf16.mxu1 %v9007_v9  ;;  %v9094_v9 = vld [vmem:[%s11625_s8 + $0x1e4] ss:$16 sps:$4 sm:$0xff]  }
 0x529   : > { %4773 = vmatpush1.bf16.msra.mxu1 %v9005_v3  ;;  %v9092_v3 = vld [vmem:[%s11625_s8 + $0x1e0] ss:$16 sps:$4 sm:$0xff]  }
 0x52a   : > { %4774 = vmatprep.subr.bf16.mxu1 %v9010_v30 }
 0x52d   : > { %4775 = vmatpush1.bf16.msra.mxu1 %v9008_v21 }
 0x52e   : > { %4776 = vmatprep.subr.bf16.mxu1 %v9013_v56 }
 0x531   : > { %4777 = vmatpush1.bf16.msra.mxu1 %v9011_v20 }
 0x532   : > { %4778 = vmatprep.subr.bf16.mxu1 %v9016_v41 }
 0x535   : > { %4779 = vmatpush1.bf16.msra.mxu1 %v9014_v19 }
 0x536   : > { %4780 = vmatprep.subr.bf16.mxu1 %v9019_v53 }
 0x539   : > { %4781 = vmatpush1.bf16.msra.mxu1 %v9017_v28 }
 0x53a   : > { %4782 = vmatprep.subr.bf16.mxu1 %v9022_v25  ;;  %v9394_v25 = vmov 0.0  }
 0x53d   : > { %4783 = vmatpush1.bf16.msra.mxu1 %v9020_v31 }
 0x53e   : > { %4784 = vmatprep.subr.bf16.mxu1 %v9025_v26 }
 0x541   : > { %4785 = vmatpush1.bf16.msra.mxu1 %v9023_v15 }
 0x542   : > { %4786 = vmatprep.subr.bf16.mxu1 %v9028_v55 }
 0x545   : > { %4787 = vmatpush1.bf16.msra.mxu1 %v9026_v34 }
 0x546   : > { %4788 = vmatprep.subr.bf16.mxu1 %v9031_v39 }
 0x549   : > { %4789 = vmatpush1.bf16.msra.mxu1 %v9029_v35 }
 0x54a   : > { %4790 = vmatprep.subr.bf16.mxu1 %v9034_v10  ;;  %v10930_v10 = vld [vmem:[%s11563_s10] sm:$0xf] }
 0x54d   : > { %4791 = vmatpush1.bf16.msra.mxu1 %v9032_v6  ;;  %v4431_v6 = vrot.slane %v10930_v10, %v10498_v58 }
 0x54e   : > { %4792 = vmatprep.subr.bf16.mxu1 %v9037_v46  ;;  %v10937_v46 = vld [vmem:[%s11562_s9] sm:$0xf] }
 0x551   : > { %4793 = vmatpush1.bf16.msra.mxu1 %v9035_v47 }
 0x552   : > { %4794 = vmatprep.subr.bf16.mxu1 %v9040_v38 }
 0x555   : > { %4795 = vmatpush1.bf16.msra.mxu1 %v9038_v61 }
 0x556   : > { %4796 = vmatprep.subr.bf16.mxu1 %v9043_v14  ;;  %v3943_v14 = vrot.slane %v10937_v46, %v10498_v58 }
 0x559   : > { %4797 = vmatpush1.bf16.msra.mxu1 %v9041_v29 }
 0x55a   : > { %4798 = vmatprep.subr.bf16.mxu1 %v9046_v27 }
 0x55d   : > { %4799 = vmatpush1.bf16.msra.mxu1 %v9044_v17 }
 0x55e   : > { %5256 = vmatprep.subr.bf16.mxu1 %v9049_v54 }
 0x560   : > { %4801 = vmatmul.mubr.bf16.vlgmr.msra.gmra.mrb[28].mxu1 %v10524_v63 }
 0x561   : > { %5257 = vmatpush1.bf16.msra.mxu1 %v9047_v22  ;;  %5288 = vmatprep.mubr.bf16.mxu1 %v10514_v0  ;;  %v9056_v0 = vld [vmem:[%s11625_s8 + $0x60] ss:$16 sps:$4 sm:$0xff]   ;;  %s9335_s8 = scalar_lea.vmem %s9334_s2, 32 }
 0x562   : > { %5258 = vmatprep.subr.bf16.mxu1 %v9052_v44  ;;  %v10947_v44 = vld [vmem:[%s11564_s11] sm:$0xf]  ;;  %p9337_p1 = scmp.lt.s32.totalorder %s9335_s8, %s9329_s4 }
 0x564   : > { %p9338_p2 = por %p9337_p1, %p9336_p0 }
 0x565   : > { %5259 = vmatpush1.bf16.msra.mxu1 %v9050_v32  ;;  %v4919_v32 = vrot.slane %v10947_v44, %v10498_v58 }
 0x566   : > { %5260 = vmatprep.subr.bf16.mxu1 %v9055_v45  ;;  %p9339_p3 = pnand %p9338_p2, %p9332_p13 }
 0x569   : > { %5261 = vmatpush1.bf16.msra.mxu1 %v9053_v16 }
 0x56a   : > { %5262 = vmatprep.subr.bf16.mxu1 %v9058_v23 }
 0x56d   : > { %5263 = vmatpush1.bf16.msra.mxu1 %v9056_v0 }
 0x56e   : > { %5264 = vmatprep.subr.bf16.mxu1 %v9061_v48 }
 0x571   : > { %5265 = vmatpush1.bf16.msra.mxu1 %v9059_v50 }
 0x572   : > { %5266 = vmatprep.subr.bf16.mxu1 %v9064_v51 }
 0x575   : > { %5267 = vmatpush1.bf16.msra.mxu1 %v9062_v52 }
 0x576   : > { %5268 = vmatprep.subr.bf16.mxu1 %v9067_v59 }
 0x579   : > { %5269 = vmatpush1.bf16.msra.mxu1 %v9065_v42 }
 0x57a   : > { %5270 = vmatprep.subr.bf16.mxu1 %v9070_v60 }
 0x57d   : > { %5271 = vmatpush1.bf16.msra.mxu1 %v9068_v1 }
 0x57e   : > { %5272 = vmatprep.subr.bf16.mxu1 %v9073_v7 }
 0x581   : > { %5273 = vmatpush1.bf16.msra.mxu1 %v9071_v36 }
 0x582   : > { %5274 = vmatprep.subr.bf16.mxu1 %v9076_v37 }
 0x585   : > { %5275 = vmatpush1.bf16.msra.mxu1 %v9074_v40 }
 0x586   : > { %5276 = vmatprep.subr.bf16.mxu1 %v9079_v8 }
 0x589   : > { %5277 = vmatpush1.bf16.msra.mxu1 %v9077_v49 }
 0x58a   : > { %5278 = vmatprep.subr.bf16.mxu1 %v9082_v43  ;;  %v4435_v43 = vrot.slane %v10930_v10, %v10504_v62 }
 0x58d   : > { %5279 = vmatpush1.bf16.msra.mxu1 %v9080_v33 }
 0x58e   : > { %5280 = vmatprep.subr.bf16.mxu1 %v9085_v11 }
 0x591   : > { %5281 = vmatpush1.bf16.msra.mxu1 %v9083_v12  ;;  %v4923_v12 = vrot.slane %v10947_v44, %v10504_v62 }
 0x592   : > { %5282 = vmatprep.subr.bf16.mxu1 %v9088_v24 }
 0x595   : > { %5283 = vmatpush1.bf16.msra.mxu1 %v9086_v2  ;;  %v3947_v2 = vrot.slane %v10937_v46, %v10504_v62 }
 0x596   : > { %5284 = vmatprep.subr.bf16.mxu1 %v9091_v13 }
 0x599   : > { %5285 = vmatpush1.bf16.msra.mxu1 %v9089_v18 }
 0x59a   : > { %5286 = vmatprep.subr.bf16.mxu1 %v9094_v9 }
 0x59d   : > { %5287 = vmatpush1.bf16.msra.mxu1 %v9092_v3 }
 0x59e   : > { %8301 = vmatprep.subr.bf16.mxu1 %v9394_v25 }
 0x5a0   : > { %5289 = vmatmul.mubr.bf16.vlgmr.msra.gmra.mrb[32].mxu1 %v10524_v63 }
 0x5a1   : > { %8303 = vmatprep.mubr.msk.bf16.mxu1 %vm9395_vm0, %v9394_v25 }
 0x5b3   : > { %v4314_v30 = vpop.f32.mrb[20].mxu1  ;;  %v10910_v21 = vpop.f32.mrb[0].mxu0 }
 0x5b4   : > { %v10912_v56 = vpop.f32.mrb[21].mxu1  ;;  %v10914_v20 = vpop.f32.mrb[1].mxu0  ;;  %v4315_v54 = vadd.f32 %v4314_v30, %v3943_v14 }
 0x5b5   : > { %v4318_v41 = vpop.f32.mrb[22].mxu1  ;;  %v4847_v19 = vpop.f32.mrb[2].mxu0  ;;  %v4317_v3 = vadd.f32 %v10912_v56, %v3947_v2  ;;  %v9134_v2 = vld [vmem:[%s11565_s12 + $0xd0] ss:$8 sps:$4 sm:$0xff]  }
 0x5b6   : > { %v4319_v53 = vpop.f32.mrb[23].mxu1  ;;  %v4848_v28 = vpop.f32.mrb[3].mxu0  ;;  %v5338_v22 = vpack.c.bf16 %v4315_v54, %v4315_v54  ;;  %v9097_v54 = vld [vmem:[%s11565_s12 + $0x4] ss:$8 sps:$4 sm:$0xff]  }
 0x5b7   : > { %v5441_v41 = vpack.c.bf16 %v4317_v3, %v4317_v3  ;;  %6132 = vmatprep.subr.bf16.mxu0 %v9097_v54  ;;  %v3950_v3 = vsub.s32 2, %v10495_v57 }
 0x5f3   : > { %v10919_v31 = vpop.f32.mrb[24].mxu1  ;;  %v10921_v63 = vpop.f32.mrb[4].mxu0 }
 0x5f4   : > { %v10923_v26 = vpop.f32.mrb[25].mxu1  ;;  %v10925_v15 = vpop.f32.mrb[5].mxu0 }
 0x5f5   : > { %v4359_v55 = vpop.f32.mrb[26].mxu1  ;;  %v5335_v34 = vpop.f32.mrb[6].mxu0 }
 0x5f6   : > { %v4360_v39 = vpop.f32.mrb[27].mxu1  ;;  %v5336_v35 = vpop.f32.mrb[7].mxu0 }
 0x633   : > { %v4802_v47 = vpop.f32.mrb[28].mxu1 }
 0x634   : > { %v4803_v38 = vadd.f32 %v4802_v47, %v4431_v6  ;;  %v4804_v61 = vpop.f32.mrb[29].mxu1 }
 0x635   : > { %v4806_v29 = vpop.f32.mrb[30].mxu1  ;;  %v4805_v11 = vadd.f32 %v4804_v61, %v4435_v43  ;;  %v9130_v43 = vld [vmem:[%s11565_s12 + $0xb4] ss:$8 sps:$4 sm:$0xff]  }
 0x636   : > { %v5339_v27 = vpack.c.bf16 %v4803_v38, %v4803_v38  ;;  %v4807_v17 = vpop.f32.mrb[31].mxu1 }
 0x637   : > { %v5442_v18 = vpack.c.bf16 %v4805_v11, %v4805_v11  ;;  %v9095_v17 = vld [vmem:[%s11565_s12] ss:$8 sps:$4 sm:$0xff]   ;;  %v9133_v11 = vld [vmem:[%s11565_s12 + $0xc4] ss:$8 sps:$4 sm:$0xff]  }
 0x638   : > { %8302 = vmatpush3.bf16.xpose.msra.mxu1 %v5339_v27  ;;  %6133 = vmatpush1.bf16.msra.mxu0 %v9095_v17 }
 0x639   : > { %8307 = vmatprep.subr.bf16.mxu1 %v9394_v25 }
 0x63f   : > { %8304 = vmatmul.mubr.bf16.vlgmr.msra.gmra.mrb[36].mxu1 %v5338_v22  ;;  %v9100_v22 = vld [vmem:[%s11565_s12 + $0x14] ss:$8 sps:$4 sm:$0xff]  }
 0x640   : > { %8309 = vmatprep.mubr.msk.bf16.mxu1 %vm9395_vm0, %v9394_v25  ;;  %6134 = vmatprep.subr.bf16.mxu0 %v9100_v22 }
 0x673   : > { %v5290_v45 = vpop.f32.mrb[32].mxu1 }
 0x674   : > { %v5291_v16 = vadd.f32 %v5290_v45, %v4919_v32  ;;  %v5292_v23 = vpop.f32.mrb[33].mxu1  ;;  %v9098_v32 = vld [vmem:[%s11565_s12 + $0x10] ss:$8 sps:$4 sm:$0xff]   ;;  %v9103_v45 = vld [vmem:[%s11565_s12 + $0x24] ss:$8 sps:$4 sm:$0xff]  }
 0x675   : > { %v5294_v0 = vpop.f32.mrb[34].mxu1  ;;  %v5293_v9 = vadd.f32 %v5292_v23, %v4923_v12  ;;  %6135 = vmatpush1.bf16.msra.mxu0 %v9098_v32  ;;  %v9106_v23 = vld [vmem:[%s11565_s12 + $0x34] ss:$8 sps:$4 sm:$0xff]   ;;  %v9131_v12 = vld [vmem:[%s11565_s12 + $0xc0] ss:$8 sps:$4 sm:$0xff]  }
 0x676   : > { %v5340_v48 = vpack.c.bf16 %v5291_v16, %v5291_v16  ;;  %v5295_v50 = vpop.f32.mrb[35].mxu1  ;;  %v9101_v16 = vld [vmem:[%s11565_s12 + $0x20] ss:$8 sps:$4 sm:$0xff]   ;;  %6136 = vmatprep.subr.bf16.mxu0 %v9103_v45  ;;  %v9104_v0 = vld [vmem:[%s11565_s12 + $0x30] ss:$8 sps:$4 sm:$0xff]  }
 0x677   : > { %v5443_v30 = vpack.c.bf16 %v5293_v9, %v5293_v9  ;;  %v9107_v50 = vld [vmem:[%s11565_s12 + $0x40] ss:$8 sps:$4 sm:$0xff]  }
 0x678   : > { %v5399_v51 = vsel %vm5397_vm1, %v5340_v48, 0  ;;  %v9109_v48 = vld [vmem:[%s11565_s12 + $0x44] ss:$8 sps:$4 sm:$0xff]  }
 0x679   : > { %8308 = vmatpush3.bf16.msra.mxu1 %v5399_v51  ;;  %v5500_v19 = vsel %vm5397_vm1, %v5443_v30, 0  ;;  %6137 = vmatpush1.bf16.msra.mxu0 %v9101_v16  ;;  %v9112_v51 = vld [vmem:[%s11565_s12 + $0x54] ss:$8 sps:$4 sm:$0xff]   ;;  %v4439_v30 = vrot.slane %v10930_v10, %v3950_v3 }
 0x67a   : > { %8313 = vmatprep.subr.bf16.mxu1 %v9394_v25  ;;  %6138 = vmatprep.subr.bf16.mxu0 %v9106_v23 }
 0x67d   : > { %6139 = vmatpush1.bf16.msra.mxu0 %v9104_v0 }
 0x67e   : > { %6140 = vmatprep.subr.bf16.mxu0 %v9109_v48 }
 0x681   : > { %6141 = vmatpush1.bf16.msra.mxu0 %v9107_v50 }
 0x682   : > { %6142 = vmatprep.subr.bf16.mxu0 %v9112_v51 }
 0x712   : > { %v5375_v52 = vpop.f32.mrb[36].mxu1 }
 0x713   : > { %v8305_v59 = vpop.f32.mrb[37].mxu1  ;;  %v5382_v42 = vsel %vm5381_vm2, %v5375_v52, -inf }
 0x714   : > { %5383 = vmax.xlane.f32.xlu0 %v5382_v42  ;;  %v5378_v60 = vpop.f32.mrb[38].mxu1  ;;  %v9115_v59 = vld [vmem:[%s11565_s12 + $0x64] ss:$8 sps:$4 sm:$0xff]   ;;  %v9113_v42 = vld [vmem:[%s11565_s12 + $0x60] ss:$8 sps:$4 sm:$0xff]  }
 0x715   : > { %v8306_v1 = vpop.f32.mrb[39].mxu1  ;;  %v9118_v60 = vld [vmem:[%s11565_s12 + $0x74] ss:$8 sps:$4 sm:$0xff]  }
 0x716   : > { %v9116_v1 = vld [vmem:[%s11565_s12 + $0x70] ss:$8 sps:$4 sm:$0xff]  }
 0x7a1   : > { %v5384_v7 = vpop.xlane.xlu0 %5383 }
 0x7a2   : > { %v5385_v36 = vsub.f32 %v5375_v52, %v5384_v7  ;;  %v9110_v52 = vld [vmem:[%s11565_s12 + $0x50] ss:$8 sps:$4 sm:$0xff]   ;;  %v9121_v7 = vld [vmem:[%s11565_s12 + $0x84] ss:$8 sps:$4 sm:$0xff]  }
 0x7a3   : > { %6143 = vmatpush1.bf16.msra.mxu0 %v9110_v52 }
 0x7a4   : > { %v5386_v37 = vmul.f32 1.442695, %v5385_v36  ;;  %6144 = vmatprep.subr.bf16.mxu0 %v9115_v59  ;;  %v9119_v36 = vld [vmem:[%s11565_s12 + $0x80] ss:$8 sps:$4 sm:$0xff]  }
 0x7a6   : > { %9307 = vpow2.f32 %v5386_v37  ;;  %v9124_v37 = vld [vmem:[%s11565_s12 + $0x94] ss:$8 sps:$4 sm:$0xff]  }
 0x7a7   : > { %6145 = vmatpush1.bf16.msra.mxu0 %v9113_v42 }
 0x7a8   : > { %6146 = vmatprep.subr.bf16.mxu0 %v9118_v60 }
 0x7ab   : > { %6147 = vmatpush1.bf16.msra.mxu0 %v9116_v1 }
 0x7ac   : > { %6148 = vmatprep.subr.bf16.mxu0 %v9121_v7  ;;  %v3954_v7 = vsub.s32 3, %v10495_v57 }
 0x7af   : > { %6149 = vmatpush1.bf16.msra.mxu0 %v9119_v36  ;;  %v4443_v36 = vrot.slane %v10930_v10, %v3954_v7 }
 0x7b0   : > { %v9308_v40 = vpop.eup %9307  ;;  %6150 = vmatprep.subr.bf16.mxu0 %v9124_v37 }
 0x7b1   : > { %v5388_v8 = vsel %vm5381_vm2, %v9308_v40, 0.0 }
 0x7b2   : > { %5389 = vadd.xlane.f32.xlu0 %v5388_v8  ;;  %v9127_v8 = vld [vmem:[%s11565_s12 + $0xa4] ss:$8 sps:$4 sm:$0xff]  }
 0x83f   : > { %v5390_v49 = vpop.xlane.xlu0 %5389 }
 0x840   : > { %9309 = vrcp.f32 %v5390_v49  ;;  %v9125_v49 = vld [vmem:[%s11565_s12 + $0xa0] ss:$8 sps:$4 sm:$0xff]  }
 0x84a   : > { %v9310_v33 = vpop.eup %9309 }
 0x84b   : > { %v5392_v24 = vmul.f32 %v9310_v33, %v9308_v40  ;;  %v9122_v40 = vld [vmem:[%s11565_s12 + $0x90] ss:$8 sps:$4 sm:$0xff]  }
 0x84c   : > { %6151 = vmatpush1.bf16.msra.mxu0 %v9122_v40  ;;  %v9128_v33 = vld [vmem:[%s11565_s12 + $0xb0] ss:$8 sps:$4 sm:$0xff]   ;;  %v4846_v40 = vadd.f32 %v10914_v20, %v4443_v36 }
 0x84d   : > { %v5393_v13 = vpack.c.bf16 %v5392_v24, %v5392_v24  ;;  %6152 = vmatprep.subr.bf16.mxu0 %v9127_v8  ;;  %v9136_v24 = vld [vmem:[%s11565_s12 + $0xd4] ss:$8 sps:$4 sm:$0xff]   ;;  %v4931_v8 = vrot.slane %v10947_v44, %v3954_v7  ;;  %v9182_v36 = vld [vmem:[%s11565_s12 + $0x1d0] ss:$8 sps:$4 sm:$0xff]  }
 0x84f   : > { %8310 = vmatmul.mubr.msk.bf16.vlgmr.msra.gmra.mrb[40].mxu1 %vm5381_vm2, %v5393_v13  ;;  %v9139_v13 = vld [vmem:[%s11565_s12 + $0xe4] ss:$8 sps:$4 sm:$0xff]  }
 0x850   : > { %8314 = vmatpush3.bf16.xpose.msra.mxu1 %v5442_v18  ;;  %8315 = vmatprep.mubr.msk.bf16.mxu1 %vm9395_vm0, %v9394_v25  ;;  %v9137_v18 = vld [vmem:[%s11565_s12 + $0xe0] ss:$8 sps:$4 sm:$0xff]  }
 0x851   : > { %8319 = vmatprep.subr.bf16.mxu1 %v9394_v25  ;;  %6153 = vmatpush1.bf16.msra.mxu0 %v9125_v49 }
 0x852   : > { %6154 = vmatprep.subr.bf16.mxu0 %v9130_v43  ;;  %v3955_v43 = vrot.slane %v10937_v46, %v3954_v7  ;;  %v9184_v7 = vld [vmem:[%s11565_s12 + $0x1d4] ss:$8 sps:$4 sm:$0xff]  }
 0x854   : > { %v4358_v57 = vadd.f32 %v10923_v26, %v3955_v43 }
 0x855   : > { %6155 = vmatpush1.bf16.msra.mxu0 %v9128_v33 }
 0x856   : > { %6156 = vmatprep.subr.bf16.mxu0 %v9133_v11  ;;  %v5644_v11 = vpack.c.bf16 %v4846_v40, %v4846_v40  ;;  %v5643_v10 = vpack.c.bf16 %v4358_v57, %v4358_v57  ;;  %v9185_v40 = vld [vmem:[%s11565_s12 + $0x1e0] ss:$8 sps:$4 sm:$0xff]  }
 0x857   : > { %8316 = vmatmul.mubr.bf16.vlgmr.msra.gmra.mrb[44].mxu1 %v5441_v41 }
 0x858   : > { %8320 = vmatpush3.bf16.msra.mxu1 %v5500_v19  ;;  %8321 = vmatprep.mubr.msk.bf16.mxu1 %vm9395_vm0, %v9394_v25  ;;  %v4844_v19 = vadd.f32 %v10910_v21, %v4439_v30 }
 0x859   : > { %8325 = vmatprep.subr.bf16.mxu1 %v9394_v25  ;;  %6157 = vmatpush1.bf16.msra.mxu0 %v9131_v12  ;;  %v5334_v12 = vadd.f32 %v10925_v15, %v4931_v8  ;;  %v9190_v8 = vld [vmem:[%s11565_s12 + $0x1f4] ss:$8 sps:$4 sm:$0xff]  }
 0x85a   : > { %6158 = vmatprep.subr.bf16.mxu0 %v9136_v24 }
 0x85b   : > { %v5645_v20 = vpack.c.bf16 %v5334_v12, %v5334_v12 }
 0x85d   : > { %6159 = vmatpush1.bf16.msra.mxu0 %v9134_v2 }
 0x85e   : > { %6160 = vmatprep.subr.bf16.mxu0 %v9139_v13 }
 0x861   : > { %6161 = vmatpush1.bf16.msra.mxu0 %v9137_v18 }
 0x922   : > { %v10970_v53 = vpop.f32.mrb[40].mxu1 }
 0x923   : > { %v8311_v28 = vpop.f32.mrb[41].mxu1 }
 0x924   : > { %v5438_v55 = vpop.f32.mrb[42].mxu1  ;;  %v4927_v28 = vrot.slane %v10947_v44, %v3950_v3  ;;  %v5702_v44 = vsel %vm5397_vm1, %v5645_v20, 0 }
 0x925   : > { %v8312_v34 = vpop.f32.mrb[43].mxu1 }
 0x926   : > { %v3951_v34 = vrot.slane %v10937_v46, %v3950_v3 }
 0x92a   : > { %v5478_v39 = vpop.f32.mrb[44].mxu1 }
 0x92b   : > { %v8317_v56 = vpop.f32.mrb[45].mxu1  ;;  %v5484_v35 = vsel %vm5381_vm2, %v5478_v39, -inf }
 0x92c   : > { %5485 = vmax.xlane.f32.xlu1 %v5484_v35  ;;  %v5481_v6 = vpop.f32.mrb[46].mxu1  ;;  %v5543_v56 = vpack.c.bf16 %v4844_v19, %v4844_v19  ;;  %v5332_v35 = vadd.f32 %v10921_v63, %v4927_v28  ;;  %v9142_v63 = vld [vmem:[%s11565_s12 + $0xf4] ss:$8 sps:$4 sm:$0xff]  }
 0x92d   : > { %v8318_v47 = vpop.f32.mrb[47].mxu1  ;;  %v4356_v6 = vadd.f32 %v10919_v31, %v3951_v34  ;;  %v9140_v31 = vld [vmem:[%s11565_s12 + $0xf0] ss:$8 sps:$4 sm:$0xff]   ;;  %6162 = vmatprep.subr.bf16.mxu0 %v9142_v63  ;;  %v9149_v63 = vld [vmem:[%s11565_s12 + $0x120] ss:$8 sps:$4 sm:$0xff]  }
 0x92e   : > { %v5544_v21 = vpack.c.bf16 %v5332_v35, %v5332_v35  ;;  %6163 = vmatpush1.bf16.msra.mxu0 %v9140_v31  ;;  %v9143_v35 = vld [vmem:[%s11565_s12 + $0x100] ss:$8 sps:$4 sm:$0xff]   ;;  %v9154_v31 = vld [vmem:[%s11565_s12 + $0x134] ss:$8 sps:$4 sm:$0xff]  }
 0x92f   : > { %v5542_v47 = vpack.c.bf16 %v4356_v6, %v4356_v6 }
 0x9b9   : > { %v5486_v38 = vpop.xlane.xlu1 %5485 }
 0x9ba   : > { %v5487_v61 = vsub.f32 %v5478_v39, %v5486_v38  ;;  %v5601_v38 = vsel %vm5397_vm1, %v5544_v21, 0  ;;  %v9148_v21 = vld [vmem:[%s11565_s12 + $0x114] ss:$8 sps:$4 sm:$0xff]  }
 0x9bc   : > { %v5488_v14 = vmul.f32 1.442695, %v5487_v61 }
 0x9be   : > { %9311 = vpow2.f32 %v5488_v14 }
 0x9c8   : > { %v10973_v29 = vpop.eup %9311 }
 0x9c9   : > { %v5490_v27 = vsel %vm5381_vm2, %v10973_v29, 0.0 }
 0x9ca   : > { %5491 = vadd.xlane.f32.xlu1 %v5490_v27  ;;  %v5744_v27 = vpack.c.bf16 %v10970_v53, %v10970_v53 }
 0xa57   : > { %v5492_v9 = vpop.xlane.xlu1 %5491 }
 0xa58   : > { %9313 = vrcp.f32 %v5492_v9 }
 0xa62   : > { %v9314_v41 = vpop.eup %9313 }
 0xa63   : > { %v5494_v55 = vmul.f32 %v9314_v41, %v10973_v29 }
 0xa65   : > { %v5495_v39 = vpack.c.bf16 %v5494_v55, %v5494_v55 }
 0xa67   : > { %8322 = vmatmul.mubr.msk.bf16.vlgmr.msra.gmra.mrb[48].mxu1 %vm5381_vm2, %v5495_v39 }
 0xa68   : > { %8326 = vmatpush3.bf16.xpose.msra.mxu1 %v5543_v56  ;;  %8327 = vmatprep.mubr.msk.bf16.mxu1 %vm9395_vm0, %v9394_v25 }
 0xa69   : > { %8331 = vmatprep.subr.bf16.mxu1 %v9394_v25 }
 0xa6f   : > { %8328 = vmatmul.mubr.bf16.vlgmr.msra.gmra.mrb[52].mxu1 %v5542_v47  ;;  %v9146_v47 = vld [vmem:[%s11565_s12 + $0x110] ss:$8 sps:$4 sm:$0xff]  }
 0xa70   : > { %8332 = vmatpush3.bf16.msra.mxu1 %v5601_v38  ;;  %8333 = vmatprep.mubr.msk.bf16.mxu1 %vm9395_vm0, %v9394_v25  ;;  %v9151_v38 = vld [vmem:[%s11565_s12 + $0x124] ss:$8 sps:$4 sm:$0xff]  }
 0xa71   : > { %8337 = vmatprep.subr.bf16.mxu1 %v9394_v25 }
 0xb3a   : > { %v5536_v61 = vpop.f32.mrb[48].mxu1 }
 0xb3b   : > { %v5745_v14 = vpack.c.bf16 %v5536_v61, %v5536_v61  ;;  %v8323_v29 = vpop.f32.mrb[49].mxu1  ;;  %v9152_v61 = vld [vmem:[%s11565_s12 + $0x130] ss:$8 sps:$4 sm:$0xff]  }
 0xb3c   : > { %v5539_v17 = vpop.f32.mrb[50].mxu1  ;;  %v9155_v29 = vld [vmem:[%s11565_s12 + $0x140] ss:$8 sps:$4 sm:$0xff]  }
 0xb3d   : > { %v8324_v54 = vpop.f32.mrb[51].mxu1  ;;  %6164 = vmatprep.mubr.bf16.mxu0 %v5745_v14  ;;  %v9157_v14 = vld [vmem:[%s11565_s12 + $0x144] ss:$8 sps:$4 sm:$0xff]   ;;  %v9158_v17 = vld [vmem:[%s11565_s12 + $0x150] ss:$8 sps:$4 sm:$0xff]  }
 0xb3e   : > { %6165 = vmatmul.mubr.bf16.vlgmr.msra.gmra.mrb[8].mxu0 %v5744_v27  ;;  %v9160_v27 = vld [vmem:[%s11565_s12 + $0x154] ss:$8 sps:$4 sm:$0xff]   ;;  %v9163_v54 = vld [vmem:[%s11565_s12 + $0x164] ss:$8 sps:$4 sm:$0xff]  }
 0xb42   : > { %v5579_v22 = vpop.f32.mrb[52].mxu1 }
 0xb43   : > { %v8329_v32 = vpop.f32.mrb[53].mxu1  ;;  %v5585_v45 = vsel %vm5381_vm2, %v5579_v22, -inf }
 0xb44   : > { %5586 = vmax.xlane.f32.xlu0 %v5585_v45  ;;  %v5582_v16 = vpop.f32.mrb[54].mxu1  ;;  %v9166_v32 = vld [vmem:[%s11565_s12 + $0x174] ss:$8 sps:$4 sm:$0xff]   ;;  %v9164_v45 = vld [vmem:[%s11565_s12 + $0x170] ss:$8 sps:$4 sm:$0xff]  }
 0xb45   : > { %v8330_v23 = vpop.f32.mrb[55].mxu1  ;;  %v9169_v16 = vld [vmem:[%s11565_s12 + $0x184] ss:$8 sps:$4 sm:$0xff]  }
 0xb46   : > { %v9167_v23 = vld [vmem:[%s11565_s12 + $0x180] ss:$8 sps:$4 sm:$0xff]  }
 0xbd1   : > { %v5587_v0 = vpop.xlane.xlu0 %5586 }
 0xbd2   : > { %v5588_v48 = vsub.f32 %v5579_v22, %v5587_v0  ;;  %v9161_v22 = vld [vmem:[%s11565_s12 + $0x160] ss:$8 sps:$4 sm:$0xff]   ;;  %v9172_v0 = vld [vmem:[%s11565_s12 + $0x194] ss:$8 sps:$4 sm:$0xff]  }
 0xbd4   : > { %v5589_v50 = vmul.f32 1.442695, %v5588_v48  ;;  %v9170_v48 = vld [vmem:[%s11565_s12 + $0x190] ss:$8 sps:$4 sm:$0xff]  }
 0xbd6   : > { %9315 = vpow2.f32 %v5589_v50  ;;  %v9175_v50 = vld [vmem:[%s11565_s12 + $0x1a4] ss:$8 sps:$4 sm:$0xff]  }
 0xbe0   : > { %v9316_v51 = vpop.eup %9315 }
 0xbe1   : > { %v5591_v52 = vsel %vm5381_vm2, %v9316_v51, 0.0 }
 0xbe2   : > { %5592 = vadd.xlane.f32.xlu1 %v5591_v52  ;;  %v9178_v52 = vld [vmem:[%s11565_s12 + $0x1b4] ss:$8 sps:$4 sm:$0xff]  }
 0xc11   : > { %v11093_v53 = vpop.f32.mrb[8].mxu0 }
 0xc12   : > { %v11095_v59 = vpop.f32.mrb[9].mxu0 }
 0xc13   : > { %v6170_v42 = vpop.f32.mrb[10].mxu0 }
 0xc14   : > { %v6171_v60 = vpop.f32.mrb[11].mxu0  ;;  %v9176_v42 = vld [vmem:[%s11565_s12 + $0x1b0] ss:$8 sps:$4 sm:$0xff]  }
 0xc15   : > { %v9181_v60 = vld [vmem:[%s11565_s12 + $0x1c4] ss:$8 sps:$4 sm:$0xff]  }
 0xc6f   : > { %v5593_v1 = vpop.xlane.xlu1 %5592 }
 0xc70   : > { %9317 = vrcp.f32 %v5593_v1  ;;  %v9179_v1 = vld [vmem:[%s11565_s12 + $0x1c0] ss:$8 sps:$4 sm:$0xff]  }
 0xc7a   : > { %v9318_v37 = vpop.eup %9317 }
 0xc7b   : > { %v5595_v49 = vmul.f32 %v9318_v37, %v9316_v51  ;;  %v9173_v51 = vld [vmem:[%s11565_s12 + $0x1a0] ss:$8 sps:$4 sm:$0xff]   ;;  %v9187_v37 = vld [vmem:[%s11565_s12 + $0x1e4] ss:$8 sps:$4 sm:$0xff]  }
 0xc7d   : > { %v5596_v33 = vpack.c.bf16 %v5595_v49, %v5595_v49  ;;  %v9188_v49 = vld [vmem:[%s11565_s12 + $0x1f0] ss:$8 sps:$4 sm:$0xff]  }
 0xc7f   : > { %8334 = vmatmul.mubr.msk.bf16.vlgmr.msra.gmra.mrb[56].mxu1 %vm5381_vm2, %v5596_v33 }
 0xc80   : > { %8338 = vmatpush3.bf16.xpose.msra.mxu1 %v5644_v11  ;;  %8339 = vmatprep.mubr.msk.bf16.mxu1 %vm9395_vm0, %v9394_v25 }
 0xc81   : > { %8343 = vmatprep.subr.bf16.mxu1 %v9394_v25 }
 0xc87   : > { %8340 = vmatmul.mubr.bf16.vlgmr.msra.gmra.mrb[60].mxu1 %v5643_v10  ;;  %v6216_v10 = vld [vmem:[%s11566_s13] sm:$0x3] }
 0xc88   : > { %8344 = vmatpush3.bf16.msra.mxu1 %v5702_v44  ;;  %8345 = vmatprep.mubr.msk.bf16.mxu1 %vm9395_vm0, %v9394_v25  ;;  %v9145_v25 = vld [vmem:[%s11565_s12 + $0x104] ss:$8 sps:$4 sm:$0xff]  }
 0xc89   : > { %6173 = vmatprep.subr.bf16.mxu1 %v9145_v25  ;;  %v9202_v25 = vld [vmem:[%s11569_s16 + $0x34] ss:$8 sps:$4 sm:$0xff]  }
 0xd52   : > { %v11111_v15 = vpop.f32.mrb[56].mxu1 }
 0xd53   : > { %v8335_v46 = vpop.f32.mrb[57].mxu1  ;;  %v5746_v12 = vpack.c.bf16 %v11111_v15, %v11111_v15 }
 0xd54   : > { %v5640_v24 = vpop.f32.mrb[58].mxu1 }
 0xd55   : > { %v8336_v2 = vpop.f32.mrb[59].mxu1 }
 0xd56   : > { %v6221_v2 = vrot.slane %v6216_v10, %v10498_v58 }
 0xd5a   : > { %v5680_v13 = vpop.f32.mrb[60].mxu1 }
 0xd5b   : > { %v8341_v18 = vpop.f32.mrb[61].mxu1  ;;  %v5686_v26 = vsel %vm5381_vm2, %v5680_v13, -inf }
 0xd5c   : > { %5687 = vmax.xlane.f32.xlu0 %v5686_v26  ;;  %v5683_v9 = vpop.f32.mrb[62].mxu1  ;;  %v6225_v26 = vrot.slane %v6216_v10, %v10504_v62  ;;  %v9251_v10 = vld [vmem:[%s11571_s18 + $0x40] ss:$8 sps:$4 sm:$0xff]  }
 0xd5d   : > { %v8342_v3 = vpop.f32.mrb[63].mxu1 }
 0xde9   : > { %v5688_v30 = vpop.xlane.xlu0 %5687 }
 0xdea   : > { %v5689_v41 = vsub.f32 %v5680_v13, %v5688_v30 }
 0xdec   : > { %v5690_v19 = vmul.f32 1.442695, %v5689_v41 }
 0xdee   : > { %9319 = vpow2.f32 %v5690_v19 }
 0xdf8   : > { %v9320_v28 = vpop.eup %9319 }
 0xdf9   : > { %v5692_v55 = vsel %vm5381_vm2, %v9320_v28, 0.0 }
 0xdfa   : > { %5693 = vadd.xlane.f32.xlu1 %v5692_v55  ;;  %v9197_v55 = vld [vmem:[%s11569_s16 + $0x20] ss:$8 sps:$4 sm:$0xff]  }
 0xe87   : > { %v5694_v34 = vpop.xlane.xlu1 %5693 }
 0xe88   : > { %9321 = vrcp.f32 %v5694_v34  ;;  %v9200_v34 = vld [vmem:[%s11569_s16 + $0x30] ss:$8 sps:$4 sm:$0xff]  }
 0xe92   : > { %v9322_v39 = vpop.eup %9321 }
 0xe93   : > { %v5696_v56 = vmul.f32 %v9322_v39, %v9320_v28  ;;  %v9196_v28 = vld [vmem:[%s11569_s16 + $0x14] ss:$8 sps:$4 sm:$0xff]   ;;  %v9205_v39 = vld [vmem:[%s11569_s16 + $0x44] ss:$8 sps:$4 sm:$0xff]  }
 0xe95   : > { %v5697_v6 = vpack.c.bf16 %v5696_v56, %v5696_v56  ;;  %v9203_v56 = vld [vmem:[%s11569_s16 + $0x40] ss:$8 sps:$4 sm:$0xff]  }
 0xe97   : > { %8346 = vmatmul.mubr.msk.bf16.vlgmr.msra.gmra.mrb[64].mxu1 %vm5381_vm2, %v5697_v6  ;;  %v9206_v6 = vld [vmem:[%s11569_s16 + $0x50] ss:$8 sps:$4 sm:$0xff]  }
 0xe98   : > { %6174 = vmatpush1.bf16.msra.mxu1 %v9143_v35  ;;  %v9208_v35 = vld [vmem:[%s11569_s16 + $0x54] ss:$8 sps:$4 sm:$0xff]  }
 0xe99   : > { %6175 = vmatprep.subr.bf16.mxu1 %v9148_v21  ;;  %v9211_v21 = vld [vmem:[%s11569_s16 + $0x64] ss:$8 sps:$4 sm:$0xff]  }
 0xe9c   : > { %6176 = vmatpush1.bf16.msra.mxu1 %v9146_v47  ;;  %v9209_v47 = vld [vmem:[%s11569_s16 + $0x60] ss:$8 sps:$4 sm:$0xff]  }
 0xe9d   : > { %6177 = vmatprep.subr.bf16.mxu1 %v9151_v38  ;;  %v9214_v38 = vld [vmem:[%s11569_s16 + $0x74] ss:$8 sps:$4 sm:$0xff]  }
 0xea0   : > { %6178 = vmatpush1.bf16.msra.mxu1 %v9149_v63  ;;  %v9212_v63 = vld [vmem:[%s11569_s16 + $0x70] ss:$8 sps:$4 sm:$0xff]  }
 0xea1   : > { %6179 = vmatprep.subr.bf16.mxu1 %v9154_v31  ;;  %v9217_v31 = vld [vmem:[%s11569_s16 + $0x84] ss:$8 sps:$4 sm:$0xff]  }
 0xea4   : > { %6180 = vmatpush1.bf16.msra.mxu1 %v9152_v61  ;;  %v9215_v61 = vld [vmem:[%s11569_s16 + $0x80] ss:$8 sps:$4 sm:$0xff]  }
 0xea5   : > { %6181 = vmatprep.subr.bf16.mxu1 %v9157_v14  ;;  %v9220_v14 = vld [vmem:[%s11569_s16 + $0x94] ss:$8 sps:$4 sm:$0xff]  }
 0xea8   : > { %6182 = vmatpush1.bf16.msra.mxu1 %v9155_v29  ;;  %v9218_v29 = vld [vmem:[%s11569_s16 + $0x90] ss:$8 sps:$4 sm:$0xff]  }
 0xea9   : > { %6183 = vmatprep.subr.bf16.mxu1 %v9160_v27 }
 0xeac   : > { %6184 = vmatpush1.bf16.msra.mxu1 %v9158_v17 }
 0xead   : > { %6185 = vmatprep.subr.bf16.mxu1 %v9163_v54 }
 0xeb0   : > { %6186 = vmatpush1.bf16.msra.mxu1 %v9161_v22 }
 0xeb1   : > { %6187 = vmatprep.subr.bf16.mxu1 %v9166_v32 }
 0xeb4   : > { %6188 = vmatpush1.bf16.msra.mxu1 %v9164_v45 }
 0xeb5   : > { %6189 = vmatprep.subr.bf16.mxu1 %v9169_v16 }
 0xeb8   : > { %6190 = vmatpush1.bf16.msra.mxu1 %v9167_v23  ;;  %v9223_v23 = vld [vmem:[%s11569_s16 + $0xa4] ss:$8 sps:$4 sm:$0xff]  }
 0xeb9   : > { %6191 = vmatprep.subr.bf16.mxu1 %v9172_v0  ;;  %v9221_v0 = vld [vmem:[%s11569_s16 + $0xa0] ss:$8 sps:$4 sm:$0xff]  }
 0xebc   : > { %6192 = vmatpush1.bf16.msra.mxu1 %v9170_v48  ;;  %v9226_v48 = vld [vmem:[%s11569_s16 + $0xb4] ss:$8 sps:$4 sm:$0xff]  }
 0xebd   : > { %6193 = vmatprep.subr.bf16.mxu1 %v9175_v50  ;;  %v9224_v50 = vld [vmem:[%s11569_s16 + $0xb0] ss:$8 sps:$4 sm:$0xff]  }
 0xec0   : > { %6194 = vmatpush1.bf16.msra.mxu1 %v9173_v51  ;;  %v9229_v51 = vld [vmem:[%s11569_s16 + $0xc4] ss:$8 sps:$4 sm:$0xff]  }
 0xec1   : > { %6195 = vmatprep.subr.bf16.mxu1 %v9178_v52  ;;  %v9227_v52 = vld [vmem:[%s11569_s16 + $0xc0] ss:$8 sps:$4 sm:$0xff]  }
 0xec4   : > { %6196 = vmatpush1.bf16.msra.mxu1 %v9176_v42  ;;  %v9232_v42 = vld [vmem:[%s11569_s16 + $0xd4] ss:$8 sps:$4 sm:$0xff]  }
 0xec5   : > { %6197 = vmatprep.subr.bf16.mxu1 %v9181_v60  ;;  %v9230_v60 = vld [vmem:[%s11569_s16 + $0xd0] ss:$8 sps:$4 sm:$0xff]  }
 0xec8   : > { %6198 = vmatpush1.bf16.msra.mxu1 %v9179_v1  ;;  %v9233_v1 = vld [vmem:[%s11569_s16 + $0xe0] ss:$8 sps:$4 sm:$0xff]  }
 0xec9   : > { %6199 = vmatprep.subr.bf16.mxu1 %v9184_v7  ;;  %v9235_v7 = vld [vmem:[%s11569_s16 + $0xe4] ss:$8 sps:$4 sm:$0xff]  }
 0xecc   : > { %6200 = vmatpush1.bf16.msra.mxu1 %v9182_v36  ;;  %v9238_v36 = vld [vmem:[%s11569_s16 + $0xf4] ss:$8 sps:$4 sm:$0xff]  }
 0xecd   : > { %6201 = vmatprep.subr.bf16.mxu1 %v9187_v37  ;;  %v9236_v37 = vld [vmem:[%s11569_s16 + $0xf0] ss:$8 sps:$4 sm:$0xff]  }
 0xed0   : > { %6202 = vmatpush1.bf16.msra.mxu1 %v9185_v40  ;;  %v9239_v40 = vld [vmem:[%s11571_s18] ss:$8 sps:$4 sm:$0xff]  }
 0xed1   : > { %6203 = vmatprep.subr.bf16.mxu1 %v9190_v8  ;;  %v9241_v8 = vld [vmem:[%s11571_s18 + $0x4] ss:$8 sps:$4 sm:$0xff]  }
 0xed4   : > { %6204 = vmatpush1.bf16.msra.mxu1 %v9188_v49  ;;  %v9244_v49 = vld [vmem:[%s11571_s18 + $0x14] ss:$8 sps:$4 sm:$0xff]  }
 0xed5   : > { %6730 = vmatprep.subr.bf16.mxu1 %v9241_v8  ;;  %v6558_v8 = vld [vmem:[%s11572_s19] sm:$0x3] }
 0xf6a   : > { %v5738_v43 = vpop.f32.mrb[64].mxu1 }
 0xf6b   : > { %v5747_v33 = vpack.c.bf16 %v5738_v43, %v5738_v43  ;;  %v8347_v11 = vpop.f32.mrb[65].mxu1  ;;  %v9242_v43 = vld [vmem:[%s11571_s18 + $0x10] ss:$8 sps:$4 sm:$0xff]  }
 0xf6c   : > { %v5741_v57 = vpop.f32.mrb[66].mxu1  ;;  %v9245_v11 = vld [vmem:[%s11571_s18 + $0x20] ss:$8 sps:$4 sm:$0xff]  }
 0xf6d   : > { %v8348_v20 = vpop.f32.mrb[67].mxu1  ;;  %6205 = vmatprep.mubr.bf16.mxu1 %v5747_v33  ;;  %v9247_v33 = vld [vmem:[%s11571_s18 + $0x24] ss:$8 sps:$4 sm:$0xff]   ;;  %v9248_v57 = vld [vmem:[%s11571_s18 + $0x30] ss:$8 sps:$4 sm:$0xff]  }
 0xf6e   : > { %6206 = vmatmul.mubr.bf16.vlgmr.msra.gmra.mrb[68].mxu1 %v5746_v12  ;;  %v9250_v12 = vld [vmem:[%s11571_s18 + $0x34] ss:$8 sps:$4 sm:$0xff]   ;;  %v9253_v20 = vld [vmem:[%s11571_s18 + $0x44] ss:$8 sps:$4 sm:$0xff]  }
 0xf6f   : > { %6731 = vmatpush1.bf16.msra.mxu1 %v9239_v40 }
 0xf70   : > { %6732 = vmatprep.subr.bf16.mxu1 %v9244_v49  ;;  %v6563_v49 = vrot.slane %v6558_v8, %v10498_v58 }
 0xf73   : > { %6733 = vmatpush1.bf16.msra.mxu1 %v9242_v43  ;;  %v6567_v43 = vrot.slane %v6558_v8, %v10504_v62 }
 0xf74   : > { %6734 = vmatprep.subr.bf16.mxu1 %v9247_v33 }
 0xf77   : > { %6735 = vmatpush1.bf16.msra.mxu1 %v9245_v11 }
 0xf78   : > { %6736 = vmatprep.subr.bf16.mxu1 %v9250_v12 }
 0xf7b   : > { %6737 = vmatpush1.bf16.msra.mxu1 %v9248_v57 }
 0xf7c   : > { %6738 = vmatprep.subr.bf16.mxu1 %v9253_v20 }
 0xf7f   : > { %6739 = vmatpush1.bf16.msra.mxu1 %v9251_v10 }
0x1041   : > { %v6207_v44 = vpop.f32.mrb[68].mxu1 }
0x1042   : > { %v6208_v46 = vadd.f32 %v6207_v44, %v11093_v53  ;;  %v6209_v24 = vpop.f32.mrb[69].mxu1  ;;  %v9191_v53 = vld [vmem:[%s11569_s16] ss:$8 sps:$4 sm:$0xff]   ;;  %v9256_v44 = vld [vmem:[%s11571_s18 + $0x54] ss:$8 sps:$4 sm:$0xff]  }
0x1043   : > { %v6210_v13 = vadd.f32 %v6209_v24, %v11095_v59  ;;  %v6211_v18 = vpop.f32.mrb[70].mxu1  ;;  %v9193_v59 = vld [vmem:[%s11569_s16 + $0x4] ss:$8 sps:$4 sm:$0xff]   ;;  %6740 = vmatprep.subr.bf16.mxu1 %v9256_v44 }
0x1044   : > { %v6214_v15 = vadd.f32 %v10508_v4, %v6208_v46  ;;  %v6212_v9 = vpop.f32.mrb[71].mxu1  ;;  %6481 = vmatprep.subr.bf16.mxu0 %v9193_v59  ;;  %v9194_v4 = vld [vmem:[%s11569_s16 + $0x10] ss:$8 sps:$4 sm:$0xff]   ;;  %v9259_v24 = vld [vmem:[%s11571_s18 + $0x64] ss:$8 sps:$4 sm:$0xff]  }
0x1045   : > { %v6215_v3 = vadd.f32 %v10510_v5, %v6210_v13  ;;  %6482 = vmatpush1.bf16.msra.mxu0 %v9191_v53  ;;  %v9199_v5 = vld [vmem:[%s11569_s16 + $0x24] ss:$8 sps:$4 sm:$0xff]   ;;  %v9254_v46 = vld [vmem:[%s11571_s18 + $0x50] ss:$8 sps:$4 sm:$0xff]   ;;  %v9262_v13 = vld [vmem:[%s11571_s18 + $0x74] ss:$8 sps:$4 sm:$0xff]  }
0x1046   : > { %v6228_v30 = vadd.f32 %v6221_v2, %v6214_v15  ;;  %6483 = vmatprep.subr.bf16.mxu0 %v9196_v28  ;;  %6741 = vmatpush1.bf16.msra.mxu1 %v9254_v46  ;;  %v9257_v2 = vld [vmem:[%s11571_s18 + $0x60] ss:$8 sps:$4 sm:$0xff]   ;;  %v9260_v18 = vld [vmem:[%s11571_s18 + $0x70] ss:$8 sps:$4 sm:$0xff]   ;;  %v9268_v9 = vld [vmem:[%s11571_s18 + $0x94] ss:$8 sps:$4 sm:$0xff]  }
0x1047   : > { %v6229_v41 = vadd.f32 %v6225_v26, %v6215_v3  ;;  %6742 = vmatprep.subr.bf16.mxu1 %v9259_v24  ;;  %v9265_v26 = vld [vmem:[%s11571_s18 + $0x84] ss:$8 sps:$4 sm:$0xff]   ;;  %v9263_v15 = vld [vmem:[%s11571_s18 + $0x80] ss:$8 sps:$4 sm:$0xff]   ;;  %v9266_v3 = vld [vmem:[%s11571_s18 + $0x90] ss:$8 sps:$4 sm:$0xff]  }
0x1048   : > { %v9272_v53 = vld [vmem:[%s11571_s18 + $0xb0] ss:$8 sps:$4 sm:$0xff]   ;;  %v9277_v59 = vld [vmem:[%s11571_s18 + $0xc4] ss:$8 sps:$4 sm:$0xff]   ;;  %v9275_v28 = vld [vmem:[%s11571_s18 + $0xc0] ss:$8 sps:$4 sm:$0xff]  }
0x1049   : > { %v6232_v19 = vadd.f32 %v6229_v41, %v6228_v30  ;;  %6484 = vmatpush1.bf16.msra.mxu0 %v9194_v4  ;;  %v9280_v4 = vld [vmem:[%s11571_s18 + $0xd4] ss:$8 sps:$4 sm:$0xff]  }
0x104a   : > { %6485 = vmatprep.subr.bf16.mxu0 %v9199_v5  ;;  %6743 = vmatpush1.bf16.msra.mxu1 %v9257_v2  ;;  %v9278_v5 = vld [vmem:[%s11571_s18 + $0xd0] ss:$8 sps:$4 sm:$0xff]  }
0x104b   : > { %6233 = vadd.xlane.f32.xlu0 %v6232_v19  ;;  %6744 = vmatprep.subr.bf16.mxu1 %v9262_v13  ;;  %v9274_v19 = vld [vmem:[%s11571_s18 + $0xb4] ss:$8 sps:$4 sm:$0xff]  }
0x104d   : > { %6486 = vmatpush1.bf16.msra.mxu0 %v9197_v55 }
0x104e   : > { %6487 = vmatprep.subr.bf16.mxu0 %v9202_v25  ;;  %6745 = vmatpush1.bf16.msra.mxu1 %v9260_v18 }
0x104f   : > { %6746 = vmatprep.subr.bf16.mxu1 %v9265_v26 }
0x1051   : > { %6488 = vmatpush1.bf16.msra.mxu0 %v9200_v34 }
0x1052   : > { %6489 = vmatprep.subr.bf16.mxu0 %v9205_v39  ;;  %6747 = vmatpush1.bf16.msra.mxu1 %v9263_v15  ;;  %v6230_v39 = vld [vmem:[%s11567_s14] sm:$0x3] }
0x1053   : > { %6748 = vmatprep.subr.bf16.mxu1 %v9268_v9 }
0x1055   : > { %6490 = vmatpush1.bf16.msra.mxu0 %v9203_v56  ;;  %v6231_v56 = vld [vmem:[%s11568_s15] sm:$0x3] }
0x1056   : > { %6491 = vmatprep.subr.bf16.mxu0 %v9208_v35  ;;  %6749 = vmatpush1.bf16.msra.mxu1 %v9266_v3  ;;  %v6253_v35 = vrot.slane %v6230_v39, %v10498_v58 }
0x1059   : > { %6492 = vmatpush1.bf16.msra.mxu0 %v9206_v6  ;;  %v6257_v6 = vrot.slane %v6230_v39, %v10504_v62  ;;  %v9298_v39 = vld [vmem:[%s11575_s22 + $0x28] sm:$0xff]  }
0x105a   : > { %6493 = vmatprep.subr.bf16.mxu0 %v9211_v21 }
0x105d   : > { %6494 = vmatpush1.bf16.msra.mxu0 %v9209_v47 }
0x105e   : > { %6495 = vmatprep.subr.bf16.mxu0 %v9214_v38 }
0x1061   : > { %6496 = vmatpush1.bf16.msra.mxu0 %v9212_v63  ;;  %v6266_v63 = vrot.slane %v6231_v56, %v10498_v58 }
0x1062   : > { %6497 = vmatprep.subr.bf16.mxu0 %v9217_v31  ;;  %v6270_v31 = vrot.slane %v6231_v56, %v10504_v62  ;;  %v9299_v56 = vld [vmem:[%s11575_s22 + $0x70] sm:$0xff]  }
0x1065   : > { %6498 = vmatpush1.bf16.msra.mxu0 %v9215_v61 }
0x1066   : > { %6499 = vmatprep.subr.bf16.mxu0 %v9220_v14 }
0x1069   : > { %6500 = vmatpush1.bf16.msra.mxu0 %v9218_v29 }
0x106a   : > { %6501 = vmatprep.subr.bf16.mxu0 %v9223_v23  ;;  %v6309_v23 = vld [vmem:[%s11570_s17] sm:$0x3] }
0x106d   : > { %6502 = vmatpush1.bf16.msra.mxu0 %v9221_v0  ;;  %v6314_v0 = vrot.slane %v6309_v23, %v10498_v58 }
0x106e   : > { %6503 = vmatprep.subr.bf16.mxu0 %v9226_v48  ;;  %v6318_v48 = vrot.slane %v6309_v23, %v10504_v62 }
0x1071   : > { %6504 = vmatpush1.bf16.msra.mxu0 %v9224_v50 }
0x1072   : > { %6505 = vmatprep.subr.bf16.mxu0 %v9229_v51 }
0x1075   : > { %6506 = vmatpush1.bf16.msra.mxu0 %v9227_v52 }
0x1076   : > { %6507 = vmatprep.subr.bf16.mxu0 %v9232_v42 }
0x1079   : > { %6508 = vmatpush1.bf16.msra.mxu0 %v9230_v60 }
0x107a   : > { %6509 = vmatprep.subr.bf16.mxu0 %v9235_v7 }
0x107d   : > { %6510 = vmatpush1.bf16.msra.mxu0 %v9233_v1 }
0x107e   : > { %6511 = vmatprep.subr.bf16.mxu0 %v9238_v36 }
0x1081   : > { %6512 = vmatpush1.bf16.msra.mxu0 %v9236_v37 }
0x10d8   : > { %v6234_v27 = vpop.xlane.xlu0 %6233 }
0x10d9   : > { %v6236_v17 = vmul.f32 0.00390625, %v6234_v27 }
0x10db   : > { %v11283_v54 = vsub.f32 %v6228_v30, %v6236_v17  ;;  %v11285_v22 = vsub.f32 %v6229_v41, %v6236_v17  ;;  %v9271_v30 = vld [vmem:[%s11571_s18 + $0xa4] ss:$8 sps:$4 sm:$0xff]   ;;  %v9269_v41 = vld [vmem:[%s11571_s18 + $0xa0] ss:$8 sps:$4 sm:$0xff]  }
0x10dc   : > { %6750 = vmatprep.subr.bf16.mxu1 %v9271_v30  ;;  %v9287_v30 = vld [vmem:[%s11575_s22 + $0x40] sm:$0xff]  }
0x10dd   : > { %v6239_v32 = vmul.f32 %v11283_v54, %v11283_v54  ;;  %v6240_v45 = vmul.f32 %v11285_v22, %v11285_v22  ;;  %6751 = vmatpush1.bf16.msra.mxu1 %v9269_v41  ;;  %v9288_v41 = vld [vmem:[%s11575_s22] sm:$0xff]   ;;  %8007 = vmatprep.subr.bf16.mxu0 %v9287_v30 }
0x10de   : > { %6752 = vmatprep.subr.bf16.mxu1 %v9274_v19  ;;  %v9289_v19 = vld [vmem:[%s11575_s22 + $0x48] sm:$0xff]  }
0x10df   : > { %v6241_v16 = vadd.f32 %v6240_v45, %v6239_v32  ;;  %v9283_v45 = vld [vmem:[%s11571_s18 + $0xe4] ss:$8 sps:$4 sm:$0xff]  }
0x10e1   : > { %6242 = vadd.xlane.f32.xlu1 %v6241_v16  ;;  %6753 = vmatpush1.bf16.msra.mxu1 %v9272_v53  ;;  %v9284_v16 = vld [vmem:[%s11571_s18 + $0xf0] ss:$8 sps:$4 sm:$0xff]   ;;  %v9290_v53 = vld [vmem:[%s11575_s22 + $0x8] sm:$0xff]  }
0x10e2   : > { %6754 = vmatprep.subr.bf16.mxu1 %v9277_v59  ;;  %v9291_v59 = vld [vmem:[%s11575_s22 + $0x50] sm:$0xff]  }
0x10e5   : > { %6755 = vmatpush1.bf16.msra.mxu1 %v9275_v28  ;;  %v9292_v28 = vld [vmem:[%s11575_s22 + $0x10] sm:$0xff]  }
0x10e6   : > { %6756 = vmatprep.subr.bf16.mxu1 %v9280_v4  ;;  %v9293_v4 = vld [vmem:[%s11575_s22 + $0x58] sm:$0xff]  }
0x10e9   : > { %6757 = vmatpush1.bf16.msra.mxu1 %v9278_v5  ;;  %v9294_v5 = vld [vmem:[%s11575_s22 + $0x18] sm:$0xff]  }
0x10ea   : > { %6758 = vmatprep.subr.bf16.mxu1 %v9283_v45 }
0x116e   : > { %v6243_v55 = vpop.xlane.xlu1 %6242 }
0x116f   : > { %v6244_v25 = vmul.f32 0.00390625, %v6243_v55  ;;  %v9295_v55 = vld [vmem:[%s11575_s22 + $0x60] sm:$0xff]  }
0x1171   : > { %v6245_v34 = vadd.f32 1e-05, %v6244_v25  ;;  %v9296_v25 = vld [vmem:[%s11575_s22 + $0x20] sm:$0xff]  }
0x1173   : > { %9323 = vrsqrt.f32 %v6245_v34  ;;  %v9297_v34 = vld [vmem:[%s11575_s22 + $0x68] sm:$0xff]  }
0x117d   : > { %v9324_v21 = vpop.eup %9323 }
0x117e   : > { %v6247_v47 = vmul.f32 %v9324_v21, %v11283_v54  ;;  %v6248_v38 = vmul.f32 %v9324_v21, %v11285_v22  ;;  %v9281_v54 = vld [vmem:[%s11571_s18 + $0xe0] ss:$8 sps:$4 sm:$0xff]   ;;  %v9286_v22 = vld [vmem:[%s11571_s18 + $0xf4] ss:$8 sps:$4 sm:$0xff]  }
0x117f   : > { %6759 = vmatpush1.bf16.msra.mxu1 %v9281_v54  ;;  %v9302_v21 = vld [vmem:[%s11575_s22 + $0x38] sm:$0xff]  }
0x1180   : > { %v6260_v61 = vmul.f32 %v6253_v35, %v6247_v47  ;;  %v6261_v14 = vmul.f32 %v6257_v6, %v6248_v38  ;;  %6760 = vmatprep.subr.bf16.mxu1 %v9286_v22  ;;  %v9300_v35 = vld [vmem:[%s11575_s22 + $0x30] sm:$0xff]   ;;  %v9301_v6 = vld [vmem:[%s11575_s22 + $0x78] sm:$0xff]  }
0x1182   : > { %v6273_v29 = vadd.f32 %v6266_v63, %v6260_v61  ;;  %v6274_v27 = vadd.f32 %v6270_v31, %v6261_v14  ;;  %v6773_v31 = vld [vmem:[%s11573_s20] sm:$0x3] }
0x1183   : > { %6761 = vmatpush1.bf16.msra.mxu1 %v9284_v16  ;;  %v6774_v61 = vld [vmem:[%s11574_s21] sm:$0x3]  ;;  %v6795_v14 = vrot.slane %v6773_v31, %v10498_v58 }
0x1184   : > { %v6275_v17 = vpack.c.bf16 %v6273_v29, %v6273_v29  ;;  %v6276_v32 = vpack.c.bf16 %v6274_v27, %v6274_v27  ;;  %v6808_v45 = vrot.slane %v6774_v61, %v10498_v58  ;;  %v6812_v54 = vrot.slane %v6774_v61, %v10504_v62 }
0x1186   : > { %6513 = vmatprep.mubr.bf16.mxu0 %v6276_v32 }
0x1187   : > { %6514 = vmatmul.mubr.bf16.vlgmr.msra.gmra.mrb[12].mxu0 %v6275_v17 }
0x1188   : > { %8008 = vmatpush3.bf16.msra.mxu0 %v9288_v41 }
0x1189   : > { %8009 = vmatprep.subr.bf16.mxu0 %v9289_v19 }
0x118c   : > { %8010 = vmatpush3.bf16.msra.mxu0 %v9290_v53 }
0x118d   : > { %8011 = vmatprep.subr.bf16.mxu0 %v9291_v59 }
0x1190   : > { %8012 = vmatpush3.bf16.msra.mxu0 %v9292_v28 }
0x1191   : > { %8013 = vmatprep.subr.bf16.mxu0 %v9293_v4 }
0x1194   : > { %8014 = vmatpush3.bf16.msra.mxu0 %v9294_v5 }
0x1195   : > { %8015 = vmatprep.subr.bf16.mxu0 %v9295_v55 }
0x1198   : > { %8016 = vmatpush3.bf16.msra.mxu0 %v9296_v25 }
0x1199   : > { %8017 = vmatprep.subr.bf16.mxu0 %v9297_v34 }
0x119c   : > { %8018 = vmatpush3.bf16.msra.mxu0 %v9298_v39 }
0x119d   : > { %8019 = vmatprep.subr.bf16.mxu0 %v9299_v56 }
0x11a0   : > { %8020 = vmatpush3.bf16.msra.mxu0 %v9300_v35 }
0x11a1   : > { %8021 = vmatprep.subr.bf16.mxu0 %v9301_v6 }
0x11a4   : > { %8022 = vmatpush3.bf16.msra.mxu0 %v9302_v21 }
0x125a   : > { %v6515_v50 = vpop.f32.mrb[12].mxu0 }
0x125b   : > { %v6516_v51 = vadd.f32 %v6515_v50, %v6314_v0  ;;  %v6517_v52 = vpop.f32.mrb[13].mxu0 }
0x125c   : > { %v6518_v42 = vadd.f32 %v6517_v52, %v6318_v48  ;;  %v6519_v60 = vpop.f32.mrb[14].mxu0 }
0x125d   : > { %v6522_v1 = vmax.f32 %v6516_v51, 0.0  ;;  %v6520_v7 = vpop.f32.mrb[15].mxu0 }
0x125e   : > { %v6523_v36 = vmax.f32 %v6518_v42, 0.0 }
0x125f   : > { %v6524_v40 = vpack.c.bf16 %v6522_v1, %v6522_v1 }
0x1260   : > { %v6525_v37 = vpack.c.bf16 %v6523_v36, %v6523_v36 }
0x1262   : > { %6762 = vmatprep.mubr.bf16.mxu1 %v6525_v37 }
0x1263   : > { %6763 = vmatmul.mubr.bf16.vlgmr.msra.gmra.mrb[72].mxu1 %v6524_v40 }
0x1336   : > { %v6764_v33 = vpop.f32.mrb[72].mxu1 }
0x1337   : > { %v6765_v11 = vadd.f32 %v6764_v33, %v6563_v49  ;;  %v6766_v12 = vpop.f32.mrb[73].mxu1 }
0x1338   : > { %v6767_v57 = vadd.f32 %v6766_v12, %v6567_v43  ;;  %v6768_v20 = vpop.f32.mrb[74].mxu1 }
0x1339   : > { %v6771_v10 = vadd.f32 %v6765_v11, %v6273_v29  ;;  %v6769_v44 = vpop.f32.mrb[75].mxu1  ;;  %v6799_v29 = vrot.slane %v6773_v31, %v10504_v62  ;;  %v6866_v11 = vld [vmem:[%s11576_s23] sm:$0x1] }
0x133a   : > { %v6772_v46 = vadd.f32 %v6767_v57, %v6274_v27 }
0x133c   : > { %v6775_v24 = vadd.f32 %v6772_v46, %v6771_v10 }
0x133e   : > { %6776 = vadd.xlane.f32.xlu0 %v6775_v24 }
0x13cb   : > { %v6777_v2 = vpop.xlane.xlu0 %6776 }
0x13cc   : > { %v6778_v13 = vmul.f32 0.00390625, %v6777_v2 }
0x13ce   : > { %v6779_v18 = vsub.f32 %v6771_v10, %v6778_v13  ;;  %v6780_v26 = vsub.f32 %v6772_v46, %v6778_v13 }
0x13d0   : > { %v6781_v15 = vmul.f32 %v6779_v18, %v6779_v18  ;;  %v6782_v9 = vmul.f32 %v6780_v26, %v6780_v26 }
0x13d2   : > { %v6783_v3 = vadd.f32 %v6782_v9, %v6781_v15 }
0x13d4   : > { %6784 = vadd.xlane.f32.xlu1 %v6783_v3 }
0x1461   : > { %v6785_v47 = vpop.xlane.xlu1 %6784 }
0x1462   : > { %v6786_v38 = vmul.f32 0.00390625, %v6785_v47 }
0x1464   : > { %v6787_v63 = vadd.f32 1e-05, %v6786_v38 }
0x1466   : > { %9325 = vrsqrt.f32 %v6787_v63 }
0x1470   : > { %v9326_v27 = vpop.eup %9325 }
0x1471   : > { %v6789_v17 = vmul.f32 %v9326_v27, %v6779_v18  ;;  %v6790_v32 = vmul.f32 %v9326_v27, %v6780_v26 }
0x1473   : > { %v6802_v22 = vmul.f32 %v6795_v14, %v6789_v17  ;;  %v6803_v16 = vmul.f32 %v6799_v29, %v6790_v32 }
0x1475   : > { %v6815_v23 = vadd.f32 %v6808_v45, %v6802_v22  ;;  %v6816_v0 = vadd.f32 %v6812_v54, %v6803_v16 }
0x1477   : > { %v6817_v48 = vrot.slane %v6815_v23, 4  ;;  %v6823_v50 = vrot.slane %v6816_v0, 4 }
0x1479   : > { %v6818_v51 = vadd.f32 %v6817_v48, %v6815_v23  ;;  %v6824_v52 = vadd.f32 %v6823_v50, %v6816_v0 }
0x147b   : > { %v6819_v42 = vrot.slane %v6818_v51, 2  ;;  %v6825_v60 = vrot.slane %v6824_v52, 2 }
0x147d   : > { %v6820_v1 = vadd.f32 %v6819_v42, %v6818_v51  ;;  %v6826_v7 = vadd.f32 %v6825_v60, %v6824_v52 }
0x147f   : > { %v6821_v36 = vrot.slane %v6820_v1, 1  ;;  %v6827_v37 = vrot.slane %v6826_v7, 1 }
0x1481   : > { %v6822_v40 = vadd.f32 %v6821_v36, %v6820_v1  ;;  %v6828_v58 = vadd.f32 %v6827_v37, %v6826_v7 }
0x1483   : > { %v6830_v8 = vmul.f32 0.125, %v6822_v40  ;;  %v6831_v62 = vmul.f32 0.125, %v6828_v58 }
0x1485   : > { %v6832_v49 = vpack.c.bf16 %v6830_v8, %v6830_v8  ;;  %v6833_v43 = vpack.c.bf16 %v6831_v62, %v6831_v62 }
0x1487   : > { %6995 = vmatprep.mubr.bf16.mxu0 %v6833_v43 }
0x1488   : > { %6996 = vmatmul.mubr.bf16.vlgmr.msra.gmra.mrb[16].mxu0 %v6832_v49 }
0x155b   : > { %v8023_v33 = vpop.f32.mrb[16].mxu0 }
0x155c   : > { %v8024_v12 = vpop.f32.mrb[17].mxu0 }
0x155d   : > { %v8025_v57 = vadd.f32 %v8024_v12, %v8023_v33  ;;  %v8026_v20 = vpop.f32.mrb[18].mxu0 }
0x155e   : > { %v8027_v10 = vpop.f32.mrb[19].mxu0 }
0x155f   : > { %v6998_v44 = vadd.f32 %v8025_v57, %v6866_v11 }
0x1561   : > { %7003 = vst [vmem:[%s729_s30] sm:$0x1] %v6998_v44 }
0x1562   : > { %9342 = shalt.err (!%p9339_p3)
}
0x1563   : > { %s9343_s27 = scalar_lea.hbm %s11511_s29, 16  ;;  %s9347_s1 = scalar_lea.hbm %s11627_s7, 32 }
0x1564   : > { %p9344_p4 = scmp.ne.s32.totalorder %s11511_s29, %s9343_s27  ;;  %p9348_p9 = scmp.lt.u32.totalorder %s11511_s29, %s11627_s7 }
0x1565   : > { %p9349_p10 = scmp.lt.u32.totalorder %s9347_s1, %s9343_s27  ;;  %p9351_p12 = scmp.lt.u32.totalorder %s9343_s27, %s11511_s29 }
0x1566   : > { %p9345_p7 = pnand %p9344_p4, %p9560_p5 }
0x1567   : > { %p9350_p11 = por %p9349_p10, %p9348_p9 }
0x1568   : > { %p9346_p8 = pneg %p9345_p7 }
0x1569   : > { %p9352_p13 = por %p9351_p12, %p9350_p11 }
0x156b   : > { %p9353_p0 = pnand %p9352_p13, %p9346_p8 }
0x156d   : > { %9356 = shalt.err (!%p9353_p0)
}
0x156e   : > { %8605 = dma.vmem_to_hbm [thread:$0]  (%p9560_p5), %s11513_s25, 16, %s11511_s29, %s7005_s5  }
0x156f PF: > { %s11628_s8 = sld [smem:[#allocation7_spill]]  ;;  %s11629_s4 = sld [smem:[#allocation5_spill]] }
0x1575   : > { %p8611_p1 = scmp.ge.s32.totalorder %s11628_s8, 2  ;;  %s7029_s28 = sand.u32 1, %s11629_s4  }
0x1576   : > { %s7030_s30 = scalar_lea.sflag [#allocation3], %s7029_s28 }
0x1577   : > { %p8608_p2 = pnand %p8611_p1, %p9564_p6 }
0x1579   : > { %9374 = dma.done.wait (!%p8608_p2), %s7030_s30, 16  }
0x157a   : > { %9376 = vsyncadd (!%p8608_p2), %s7030_s30, 4294967280  ;;  %s11631_s28 = sld [smem:[#allocation8_spill]]  ;;  %s11632_s27 = sld [smem:[#allocation6_spill]] }
0x157b   : > { %s11633_s1 = sld [smem:[#allocation9_spill]]  ;;  %s11634_s5 = smov %s9383_s26 }
0x1580   : > { %p34_p3 = scmp.ge.s32.totalorder %s11631_s28, 4   ;;  %s11635_s26 = smov %s11632_s27 }
0x1581   : > { %s11636_s27 = smov %s11633_s1 }
0x1582   :  { %36 = sbr.rel (!%p34_p3) target bundleno = 14 (0xe), region = 151 }
0x1589   :  { %7034 = vsyncpa [#allocation3], 1 }
0x158a   :  { %7036 = vsyncpa [#allocation3 + $0x1], 1 }

</bundles_post_ra>
